<compile_context>
chip_gen: v7x
topology: tpu7x:2x2x1
jax: 0.10.0
libtpu: 0.0.40
codegen_flags: <defaults>
</compile_context>

<pallas_src>
import functools
import math

import jax
import jax.numpy as jnp
from jax.experimental import pallas as pl
from jax.experimental.pallas import tpu as pltpu

BN_EPS = 1e-5          # PyTorch BatchNorm1d default eps
LANE = 128             # TPU vreg lane width


def _round_up(n, m):
    return ((n + m - 1) // m) * m


def _pad2d(a, rows, cols):
    pr, pc = rows - a.shape[0], cols - a.shape[1]
    return jnp.pad(a, ((0, pr), (0, pc))) if (pr or pc) else a


# ---------------------------------------------------------------------------
# Kernel
# ---------------------------------------------------------------------------
def make_vae_kernel(n_hidden, batch, matmul_dtype):
    """Kernel closed over layer count, batch size and MXU operand dtype."""
    inv_b = 1.0 / float(batch)

    def kernel(*refs):
        it = iter(refs)
        x_ref, eps_ref = next(it), next(it)
        enc = [tuple(next(it) for _ in range(4)) for _ in range(n_hidden)]   # w,b,gamma,beta
        mv_w, mv_b = next(it), next(it)                                      # fused mu||var
        dec = [tuple(next(it) for _ in range(4)) for _ in range(n_hidden)]   # w,b,gamma,beta
        fin_w, fin_b = next(it), next(it)
        recon_ref, mulogvar_ref = next(it), next(it)

        # Batch-axis reductions go to the MXU (frees the XLU slot); the ones
        # row is built once and reused by every BatchNorm layer.
        ones_row = jnp.ones((1, batch), jnp.float32)

        def linear(h, w_ref, b_ref):
            # bf16 (or f32) operands, f32 accumulation on the MXU.
            y = jnp.dot(h.astype(matmul_dtype), w_ref[...],
                        preferred_element_type=jnp.float32)
            return y + b_ref[...]

        def bn_train(h, g_ref, be_ref):
            # Training-mode BatchNorm1d, full-batch biased statistics,
            # two-pass (PyTorch-parity) formula; reductions via MXU.
            mean = jnp.dot(ones_row, h, preferred_element_type=jnp.float32) * inv_b
            hc = h - mean
            var = jnp.dot(ones_row, hc * hc, preferred_element_type=jnp.float32) * inv_b
            scale = g_ref[...] * jax.lax.rsqrt(var + BN_EPS)   # (1, F) fused scale
            return hc * scale + be_ref[...]                    # one mul + one add / element

        # ---- encode ----
        h = x_ref[...].astype(jnp.float32)
        for (w, b, g, be) in enc:
            # Bias kept: ReLU is between Linear and BN, so it is not dead work.
            h = bn_train(jnp.maximum(linear(h, w, b), 0.0), g, be)

        # ---- fc_mu || fc_var : one fused, lane-dense matmul ----
        mv = linear(h, mv_w, mv_b)          # (B, 2*Lp) = [mu || log_var]
        mulogvar_ref[...] = mv
        lp = mv.shape[1] // 2               # static, multiple of 128
        mu, log_var = mv[:, :lp], mv[:, lp:]

        # ---- reparameterize: z = mu + eps * exp(0.5*log_var) ----
        z = mu + eps_ref[...] * jnp.exp(0.5 * log_var)

        # ---- decode ----
        d = z
        for (w, b, g, be) in dec:
            d = bn_train(jnp.maximum(linear(d, w, b), 0.0), g, be)
        recon_ref[...] = linear(d, fin_w, fin_b)

    return kernel


# ---------------------------------------------------------------------------
# Wrapper
# ---------------------------------------------------------------------------
@functools.partial(jax.jit,
                   static_argnames=("input_dim", "hidden_dims", "latent_dim",
                                    "matmul_dtype"))
def vae_forward(x, eps, params, *, input_dim, hidden_dims, latent_dim,
                matmul_dtype=jnp.bfloat16):
    """Run the VAE forward pass in a single Pallas kernel.

    params: flat list [enc(w,b,gamma,beta)*, mu_w, mu_b, var_w, var_b,
                       dec(w,b,gamma,beta)*, fin_w, fin_b], weights stored
            (in, out), 1-D params stored (1, out).
    Returns (recon, mu, log_var) with the original (unpadded) feature dims.
    """
    hidden_dims = tuple(hidden_dims)
    n_hidden = len(hidden_dims)
    B = x.shape[0]

    fp = _round_up(input_dim, LANE)
    lp = _round_up(latent_dim, LANE)
    hp = [_round_up(h, LANE) for h in hidden_dims]

    it = iter(params)

    def take_linear(in_p, out_p):
        w, b = next(it), next(it)
        return (_pad2d(w, in_p, out_p).astype(matmul_dtype),
                _pad2d(b, 1, out_p).astype(jnp.float32))

    def take_bn(out_p):
        g, be = next(it), next(it)
        return (_pad2d(g, 1, out_p).astype(jnp.float32),
                _pad2d(be, 1, out_p).astype(jnp.float32))

    flat = []

    # encoder
    prev_p = fp
    for h_p in hp:
        w, b = take_linear(prev_p, h_p)
        g, be = take_bn(h_p)
        flat += [w, b, g, be]
        prev_p = h_p

    # fc_mu / fc_var fused into one (Hp, 2*Lp) weight and (1, 2*Lp) bias
    mu_w, mu_b = take_linear(hp[-1], lp)
    var_w, var_b = take_linear(hp[-1], lp)
    flat += [jnp.concatenate([mu_w, var_w], axis=1),
             jnp.concatenate([mu_b, var_b], axis=1)]

    # decoder (reversed hidden dims, as the PyTorch module reverses in place)
    rev_hp = list(reversed(hp))
    prev_p = lp
    for h_p in rev_hp:
        w, b = take_linear(prev_p, h_p)
        g, be = take_bn(h_p)
        flat += [w, b, g, be]
        prev_p = h_p

    fin_w, fin_b = take_linear(rev_hp[-1], fp)
    flat += [fin_w, fin_b]

    # lane-dense, zero-padded inputs
    x_p = _pad2d(x.astype(jnp.float32), B, fp)
    eps_p = _pad2d(eps.astype(jnp.float32), B, lp)
    inputs = [x_p, eps_p] + flat

    out_shape = (
        jax.ShapeDtypeStruct((B, fp), jnp.float32),        # recon (padded)
        jax.ShapeDtypeStruct((B, 2 * lp), jnp.float32),    # [mu || log_var] (padded)
    )

    # Explicit VMEM budget: inputs + outputs + generous activation headroom,
    # capped at v7x's 64 MiB physical VMEM.
    io_bytes = sum(int(a.size) * a.dtype.itemsize for a in inputs)
    io_bytes += sum(math.prod(s.shape) * jnp.dtype(s.dtype).itemsize for s in out_shape)
    act_bytes = 4 * B * max([fp, 2 * lp] + hp) * 4
    vmem_limit = int(min(64 * 1024 * 1024,
                         max(32 * 1024 * 1024, 2 * (io_bytes + act_bytes))))

    vmem = pl.BlockSpec(memory_space=pltpu.MemorySpace.VMEM)

    recon_p, mv = pl.pallas_call(
        make_vae_kernel(n_hidden, B, matmul_dtype),
        out_shape=out_shape,
        in_specs=[vmem] * len(inputs),
        out_specs=(vmem, vmem),
        compiler_params=pltpu.CompilerParams(vmem_limit_bytes=vmem_limit),
    )(*inputs)

    recon = recon_p[:, :input_dim]
    mu = mv[:, :latent_dim]
    log_var = mv[:, lp:lp + latent_dim]
    return recon, mu, log_var


# ---------------------------------------------------------------------------
# Deterministic parameter init (PyTorch shapes; weights stored (in, out))
# ---------------------------------------------------------------------------
def _init_linear(key, fan_in, fan_out):
    k_w, k_b = jax.random.split(key)
    bound = 1.0 / jnp.sqrt(jnp.float32(fan_in))
    w = jax.random.uniform(k_w, (fan_in, fan_out), jnp.float32, -bound, bound)
    b = jax.random.uniform(k_b, (1, fan_out), jnp.float32, -bound, bound)
    return w, b


def init_vae_params(key, input_dim, hidden_dims, latent_dim):
    params = []
    keys = iter(jax.random.split(key, 2 * len(hidden_dims) + 3))

    prev = input_dim
    for h in hidden_dims:
        w, b = _init_linear(next(keys), prev, h)
        params += [w, b, jnp.ones((1, h), jnp.float32), jnp.zeros((1, h), jnp.float32)]
        prev = h

    w, b = _init_linear(next(keys), hidden_dims[-1], latent_dim)   # fc_mu
    params += [w, b]
    w, b = _init_linear(next(keys), hidden_dims[-1], latent_dim)   # fc_var
    params += [w, b]

    rev = list(reversed(hidden_dims))
    prev = latent_dim
    for h in rev:
        w, b = _init_linear(next(keys), prev, h)
        params += [w, b, jnp.ones((1, h), jnp.float32), jnp.zeros((1, h), jnp.float32)]
        prev = h

    w, b = _init_linear(next(keys), rev[-1], input_dim)            # final decoder Linear
    params += [w, b]
    return params


# ---------------------------------------------------------------------------
# Pure-JAX reference (unpadded, f32) for correctness checking
# ---------------------------------------------------------------------------
def vae_reference(x, eps, params, *, hidden_dims):
    it = iter(params)

    def lin(h, w, b):
        return h @ w + b

    def bn(h, g, be):
        m = jnp.mean(h, axis=0, keepdims=True)
        v = jnp.mean((h - m) ** 2, axis=0, keepdims=True)
        return g * (h - m) * jax.lax.rsqrt(v + BN_EPS) + be

    h = x
    for _ in hidden_dims:
        w, b, g, be = next(it), next(it), next(it), next(it)
        h = bn(jnp.maximum(lin(h, w, b), 0.0), g, be)
    mu_w, mu_b = next(it), next(it)
    var_w, var_b = next(it), next(it)
    mu, log_var = lin(h, mu_w, mu_b), lin(h, var_w, var_b)
    d = mu + eps * jnp.exp(0.5 * log_var)
    for _ in hidden_dims:
        w, b, g, be = next(it), next(it), next(it), next(it)
        d = bn(jnp.maximum(lin(d, w, b), 0.0), g, be)
    fin_w, fin_b = next(it), next(it)
    return lin(d, fin_w, fin_b), mu, log_var


# ---------------------------------------------------------------------------
if __name__ == "__main__":
    INPUT_DIM = 16
    HIDDEN_DIMS = (32, 16)
    LATENT_DIM = 8
    BATCH = 256   # batch is the perf knob: fills the MXU M-dim (>=256 on v6e/v7x)

    root = jax.random.PRNGKey(0)
    k_params, k_x, k_eps = jax.random.split(root, 3)

    params = init_vae_params(k_params, INPUT_DIM, list(HIDDEN_DIMS), LATENT_DIM)
    x = jax.random.uniform(k_x, (BATCH, INPUT_DIM), jnp.float32)       # BCE-style inputs in [0,1)
    eps = jax.random.normal(k_eps, (BATCH, LATENT_DIM), jnp.float32)   # ~ torch.randn_like(std)

    # 1) Correctness check: f32 MXU operands vs pure-JAX reference (tight tol).
    recon32, mu32, lv32 = vae_forward(
        x, eps, params,
        input_dim=INPUT_DIM, hidden_dims=HIDDEN_DIMS, latent_dim=LATENT_DIM,
        matmul_dtype=jnp.float32,
    )
    ref_recon, ref_mu, ref_lv = vae_reference(x, eps, params, hidden_dims=HIDDEN_DIMS)
    jax.block_until_ready((recon32, mu32, lv32, ref_recon, ref_mu, ref_lv))
    assert float(jnp.max(jnp.abs(recon32 - ref_recon))) < 1e-3
    assert float(jnp.max(jnp.abs(mu32 - ref_mu))) < 1e-3
    assert float(jnp.max(jnp.abs(lv32 - ref_lv))) < 1e-3

    # 2) Performance mode: bf16 MXU operands (recommended path on v6e/v7x).
    recon, mu, log_var = vae_forward(
        x, eps, params,
        input_dim=INPUT_DIM, hidden_dims=HIDDEN_DIMS, latent_dim=LATENT_DIM,
        matmul_dtype=jnp.bfloat16,
    )
    jax.block_until_ready((recon, mu, log_var))

    assert recon.shape == (BATCH, INPUT_DIM)
    assert mu.shape == (BATCH, LATENT_DIM)
    assert log_var.shape == (BATCH, LATENT_DIM)
    assert jnp.all(jnp.isfinite(recon)) and jnp.all(jnp.isfinite(mu)) and jnp.all(jnp.isfinite(log_var))

    print("KERNEL_OK")
</pallas_src>

<mosaic_0001>
module attributes {stable_mosaic.version = 11 : i64} {
  func.func @kernel(%arg0: memref<256x128xf32, #tpu.memory_space<vmem>>, %arg1: memref<256x128xf32, #tpu.memory_space<vmem>>, %arg2: memref<128x128xf32, #tpu.memory_space<vmem>>, %arg3: memref<1x128xf32, #tpu.memory_space<vmem>>, %arg4: memref<1x128xf32, #tpu.memory_space<vmem>>, %arg5: memref<1x128xf32, #tpu.memory_space<vmem>>, %arg6: memref<128x128xf32, #tpu.memory_space<vmem>>, %arg7: memref<1x128xf32, #tpu.memory_space<vmem>>, %arg8: memref<1x128xf32, #tpu.memory_space<vmem>>, %arg9: memref<1x128xf32, #tpu.memory_space<vmem>>, %arg10: memref<128x256xf32, #tpu.memory_space<vmem>>, %arg11: memref<1x256xf32, #tpu.memory_space<vmem>>, %arg12: memref<128x128xf32, #tpu.memory_space<vmem>>, %arg13: memref<1x128xf32, #tpu.memory_space<vmem>>, %arg14: memref<1x128xf32, #tpu.memory_space<vmem>>, %arg15: memref<1x128xf32, #tpu.memory_space<vmem>>, %arg16: memref<128x128xf32, #tpu.memory_space<vmem>>, %arg17: memref<1x128xf32, #tpu.memory_space<vmem>>, %arg18: memref<1x128xf32, #tpu.memory_space<vmem>>, %arg19: memref<1x128xf32, #tpu.memory_space<vmem>>, %arg20: memref<128x128xf32, #tpu.memory_space<vmem>>, %arg21: memref<1x128xf32, #tpu.memory_space<vmem>>, %arg22: memref<256x128xf32, #tpu.memory_space<vmem>>, %arg23: memref<256x256xf32, #tpu.memory_space<vmem>>) attributes {dimension_semantics = [], scalar_prefetch = 0 : i64, scratch_operands = 0 : i64, tpu.core_type = #tpu.core_type<tc>} {
    %cst = arith.constant 1.000000e+00 : f32
    %0 = vector.broadcast %cst : f32 to vector<1x256xf32>
    %c0 = arith.constant 0 : index
    %c0_0 = arith.constant 0 : index
    %1 = vector.load %arg0[%c0, %c0_0] : memref<256x128xf32, #tpu.memory_space<vmem>>, vector<256x128xf32>
    %c0_1 = arith.constant 0 : index
    %c0_2 = arith.constant 0 : index
    %2 = vector.load %arg2[%c0_1, %c0_2] : memref<128x128xf32, #tpu.memory_space<vmem>>, vector<128x128xf32>
    %cst_3 = arith.constant dense<0.000000e+00> : vector<256x128xf32>
    %3 = tpu.matmul %1, %2, %cst_3 {dimension_numbers = #tpu.dot_dimension_numbers<[1], [0], [0], [1], [0, 0, 1, 1], [], []>} : vector<256x128xf32>, vector<128x128xf32>, vector<256x128xf32> -> vector<256x128xf32>
    %c0_4 = arith.constant 0 : index
    %c0_5 = arith.constant 0 : index
    %4 = vector.load %arg3[%c0_4, %c0_5] : memref<1x128xf32, #tpu.memory_space<vmem>>, vector<1x128xf32>
    %5 = vector.broadcast %4 : vector<1x128xf32> to vector<256x128xf32>
    %6 = arith.addf %3, %5 : vector<256x128xf32>
    %cst_6 = arith.constant 0.000000e+00 : f32
    %7 = vector.broadcast %cst_6 : f32 to vector<256x128xf32>
    %8 = arith.maximumf %6, %7 : vector<256x128xf32>
    %cst_7 = arith.constant dense<0.000000e+00> : vector<1x128xf32>
    %9 = tpu.matmul %0, %8, %cst_7 {dimension_numbers = #tpu.dot_dimension_numbers<[1], [0], [0], [1], [0, 0, 1, 1], [], []>} : vector<1x256xf32>, vector<256x128xf32>, vector<1x128xf32> -> vector<1x128xf32>
    %cst_8 = arith.constant 3.906250e-03 : f32
    %10 = vector.broadcast %cst_8 : f32 to vector<1x128xf32>
    %11 = arith.mulf %9, %10 : vector<1x128xf32>
    %12 = vector.broadcast %11 : vector<1x128xf32> to vector<256x128xf32>
    %13 = arith.subf %8, %12 : vector<256x128xf32>
    %14 = arith.mulf %13, %13 : vector<256x128xf32>
    %cst_9 = arith.constant dense<0.000000e+00> : vector<1x128xf32>
    %15 = tpu.matmul %0, %14, %cst_9 {dimension_numbers = #tpu.dot_dimension_numbers<[1], [0], [0], [1], [0, 0, 1, 1], [], []>} : vector<1x256xf32>, vector<256x128xf32>, vector<1x128xf32> -> vector<1x128xf32>
    %cst_10 = arith.constant 3.906250e-03 : f32
    %16 = vector.broadcast %cst_10 : f32 to vector<1x128xf32>
    %17 = arith.mulf %15, %16 : vector<1x128xf32>
    %c0_11 = arith.constant 0 : index
    %c0_12 = arith.constant 0 : index
    %18 = vector.load %arg4[%c0_11, %c0_12] : memref<1x128xf32, #tpu.memory_space<vmem>>, vector<1x128xf32>
    %cst_13 = arith.constant 9.99999974E-6 : f32
    %19 = vector.broadcast %cst_13 : f32 to vector<1x128xf32>
    %20 = arith.addf %17, %19 : vector<1x128xf32>
    %21 = math.rsqrt %20 : vector<1x128xf32>
    %22 = arith.mulf %18, %21 : vector<1x128xf32>
    %23 = vector.broadcast %22 : vector<1x128xf32> to vector<256x128xf32>
    %24 = arith.mulf %13, %23 : vector<256x128xf32>
    %c0_14 = arith.constant 0 : index
    %c0_15 = arith.constant 0 : index
    %25 = vector.load %arg5[%c0_14, %c0_15] : memref<1x128xf32, #tpu.memory_space<vmem>>, vector<1x128xf32>
    %26 = vector.broadcast %25 : vector<1x128xf32> to vector<256x128xf32>
    %27 = arith.addf %24, %26 : vector<256x128xf32>
    %c0_16 = arith.constant 0 : index
    %c0_17 = arith.constant 0 : index
    %28 = vector.load %arg6[%c0_16, %c0_17] : memref<128x128xf32, #tpu.memory_space<vmem>>, vector<128x128xf32>
    %cst_18 = arith.constant dense<0.000000e+00> : vector<256x128xf32>
    %29 = tpu.matmul %27, %28, %cst_18 {dimension_numbers = #tpu.dot_dimension_numbers<[1], [0], [0], [1], [0, 0, 1, 1], [], []>} : vector<256x128xf32>, vector<128x128xf32>, vector<256x128xf32> -> vector<256x128xf32>
    %c0_19 = arith.constant 0 : index
    %c0_20 = arith.constant 0 : index
    %30 = vector.load %arg7[%c0_19, %c0_20] : memref<1x128xf32, #tpu.memory_space<vmem>>, vector<1x128xf32>
    %31 = vector.broadcast %30 : vector<1x128xf32> to vector<256x128xf32>
    %32 = arith.addf %29, %31 : vector<256x128xf32>
    %cst_21 = arith.constant 0.000000e+00 : f32
    %33 = vector.broadcast %cst_21 : f32 to vector<256x128xf32>
    %34 = arith.maximumf %32, %33 : vector<256x128xf32>
    %cst_22 = arith.constant dense<0.000000e+00> : vector<1x128xf32>
    %35 = tpu.matmul %0, %34, %cst_22 {dimension_numbers = #tpu.dot_dimension_numbers<[1], [0], [0], [1], [0, 0, 1, 1], [], []>} : vector<1x256xf32>, vector<256x128xf32>, vector<1x128xf32> -> vector<1x128xf32>
    %cst_23 = arith.constant 3.906250e-03 : f32
    %36 = vector.broadcast %cst_23 : f32 to vector<1x128xf32>
    %37 = arith.mulf %35, %36 : vector<1x128xf32>
    %38 = vector.broadcast %37 : vector<1x128xf32> to vector<256x128xf32>
    %39 = arith.subf %34, %38 : vector<256x128xf32>
    %40 = arith.mulf %39, %39 : vector<256x128xf32>
    %cst_24 = arith.constant dense<0.000000e+00> : vector<1x128xf32>
    %41 = tpu.matmul %0, %40, %cst_24 {dimension_numbers = #tpu.dot_dimension_numbers<[1], [0], [0], [1], [0, 0, 1, 1], [], []>} : vector<1x256xf32>, vector<256x128xf32>, vector<1x128xf32> -> vector<1x128xf32>
    %cst_25 = arith.constant 3.906250e-03 : f32
    %42 = vector.broadcast %cst_25 : f32 to vector<1x128xf32>
    %43 = arith.mulf %41, %42 : vector<1x128xf32>
    %c0_26 = arith.constant 0 : index
    %c0_27 = arith.constant 0 : index
    %44 = vector.load %arg8[%c0_26, %c0_27] : memref<1x128xf32, #tpu.memory_space<vmem>>, vector<1x128xf32>
    %cst_28 = arith.constant 9.99999974E-6 : f32
    %45 = vector.broadcast %cst_28 : f32 to vector<1x128xf32>
    %46 = arith.addf %43, %45 : vector<1x128xf32>
    %47 = math.rsqrt %46 : vector<1x128xf32>
    %48 = arith.mulf %44, %47 : vector<1x128xf32>
    %49 = vector.broadcast %48 : vector<1x128xf32> to vector<256x128xf32>
    %50 = arith.mulf %39, %49 : vector<256x128xf32>
    %c0_29 = arith.constant 0 : index
    %c0_30 = arith.constant 0 : index
    %51 = vector.load %arg9[%c0_29, %c0_30] : memref<1x128xf32, #tpu.memory_space<vmem>>, vector<1x128xf32>
    %52 = vector.broadcast %51 : vector<1x128xf32> to vector<256x128xf32>
    %53 = arith.addf %50, %52 : vector<256x128xf32>
    %c0_31 = arith.constant 0 : index
    %c0_32 = arith.constant 0 : index
    %54 = vector.load %arg10[%c0_31, %c0_32] : memref<128x256xf32, #tpu.memory_space<vmem>>, vector<128x256xf32>
    %cst_33 = arith.constant dense<0.000000e+00> : vector<256x256xf32>
    %55 = tpu.matmul %53, %54, %cst_33 {dimension_numbers = #tpu.dot_dimension_numbers<[1], [0], [0], [1], [0, 0, 1, 1], [], []>} : vector<256x128xf32>, vector<128x256xf32>, vector<256x256xf32> -> vector<256x256xf32>
    %c0_34 = arith.constant 0 : index
    %c0_35 = arith.constant 0 : index
    %56 = vector.load %arg11[%c0_34, %c0_35] : memref<1x256xf32, #tpu.memory_space<vmem>>, vector<1x256xf32>
    %57 = vector.broadcast %56 : vector<1x256xf32> to vector<256x256xf32>
    %58 = arith.addf %55, %57 : vector<256x256xf32>
    %c0_36 = arith.constant 0 : index
    %c0_37 = arith.constant 0 : index
    %59 = vector.load %arg23[%c0_36, %c0_37] : memref<256x256xf32, #tpu.memory_space<vmem>>, vector<256x256xf32>
    tpu.vector_store %arg23[%c0_36, %c0_37], %58 {strides = array<i32>} : memref<256x256xf32, #tpu.memory_space<vmem>>, vector<256x256xf32>,
    %60 = vector.extract_strided_slice %58 {offsets = [0, 0], sizes = [256, 128], strides = [1, 1]} : vector<256x256xf32> to vector<256x128xf32>
    %61 = vector.extract_strided_slice %58 {offsets = [0, 128], sizes = [256, 128], strides = [1, 1]} : vector<256x256xf32> to vector<256x128xf32>
    %c0_38 = arith.constant 0 : index
    %c0_39 = arith.constant 0 : index
    %62 = vector.load %arg1[%c0_38, %c0_39] : memref<256x128xf32, #tpu.memory_space<vmem>>, vector<256x128xf32>
    %cst_40 = arith.constant 5.000000e-01 : f32
    %63 = vector.broadcast %cst_40 : f32 to vector<256x128xf32>
    %64 = arith.mulf %63, %61 : vector<256x128xf32>
    %65 = math.exp %64 : vector<256x128xf32>
    %66 = arith.mulf %62, %65 : vector<256x128xf32>
    %67 = arith.addf %60, %66 : vector<256x128xf32>
    %c0_41 = arith.constant 0 : index
    %c0_42 = arith.constant 0 : index
    %68 = vector.load %arg12[%c0_41, %c0_42] : memref<128x128xf32, #tpu.memory_space<vmem>>, vector<128x128xf32>
    %cst_43 = arith.constant dense<0.000000e+00> : vector<256x128xf32>
    %69 = tpu.matmul %67, %68, %cst_43 {dimension_numbers = #tpu.dot_dimension_numbers<[1], [0], [0], [1], [0, 0, 1, 1], [], []>} : vector<256x128xf32>, vector<128x128xf32>, vector<256x128xf32> -> vector<256x128xf32>
    %c0_44 = arith.constant 0 : index
    %c0_45 = arith.constant 0 : index
    %70 = vector.load %arg13[%c0_44, %c0_45] : memref<1x128xf32, #tpu.memory_space<vmem>>, vector<1x128xf32>
    %71 = vector.broadcast %70 : vector<1x128xf32> to vector<256x128xf32>
    %72 = arith.addf %69, %71 : vector<256x128xf32>
    %cst_46 = arith.constant 0.000000e+00 : f32
    %73 = vector.broadcast %cst_46 : f32 to vector<256x128xf32>
    %74 = arith.maximumf %72, %73 : vector<256x128xf32>
    %cst_47 = arith.constant dense<0.000000e+00> : vector<1x128xf32>
    %75 = tpu.matmul %0, %74, %cst_47 {dimension_numbers = #tpu.dot_dimension_numbers<[1], [0], [0], [1], [0, 0, 1, 1], [], []>} : vector<1x256xf32>, vector<256x128xf32>, vector<1x128xf32> -> vector<1x128xf32>
    %cst_48 = arith.constant 3.906250e-03 : f32
    %76 = vector.broadcast %cst_48 : f32 to vector<1x128xf32>
    %77 = arith.mulf %75, %76 : vector<1x128xf32>
    %78 = vector.broadcast %77 : vector<1x128xf32> to vector<256x128xf32>
    %79 = arith.subf %74, %78 : vector<256x128xf32>
    %80 = arith.mulf %79, %79 : vector<256x128xf32>
    %cst_49 = arith.constant dense<0.000000e+00> : vector<1x128xf32>
    %81 = tpu.matmul %0, %80, %cst_49 {dimension_numbers = #tpu.dot_dimension_numbers<[1], [0], [0], [1], [0, 0, 1, 1], [], []>} : vector<1x256xf32>, vector<256x128xf32>, vector<1x128xf32> -> vector<1x128xf32>
    %cst_50 = arith.constant 3.906250e-03 : f32
    %82 = vector.broadcast %cst_50 : f32 to vector<1x128xf32>
    %83 = arith.mulf %81, %82 : vector<1x128xf32>
    %c0_51 = arith.constant 0 : index
    %c0_52 = arith.constant 0 : index
    %84 = vector.load %arg14[%c0_51, %c0_52] : memref<1x128xf32, #tpu.memory_space<vmem>>, vector<1x128xf32>
    %cst_53 = arith.constant 9.99999974E-6 : f32
    %85 = vector.broadcast %cst_53 : f32 to vector<1x128xf32>
    %86 = arith.addf %83, %85 : vector<1x128xf32>
    %87 = math.rsqrt %86 : vector<1x128xf32>
    %88 = arith.mulf %84, %87 : vector<1x128xf32>
    %89 = vector.broadcast %88 : vector<1x128xf32> to vector<256x128xf32>
    %90 = arith.mulf %79, %89 : vector<256x128xf32>
    %c0_54 = arith.constant 0 : index
    %c0_55 = arith.constant 0 : index
    %91 = vector.load %arg15[%c0_54, %c0_55] : memref<1x128xf32, #tpu.memory_space<vmem>>, vector<1x128xf32>
    %92 = vector.broadcast %91 : vector<1x128xf32> to vector<256x128xf32>
    %93 = arith.addf %90, %92 : vector<256x128xf32>
    %c0_56 = arith.constant 0 : index
    %c0_57 = arith.constant 0 : index
    %94 = vector.load %arg16[%c0_56, %c0_57] : memref<128x128xf32, #tpu.memory_space<vmem>>, vector<128x128xf32>
    %cst_58 = arith.constant dense<0.000000e+00> : vector<256x128xf32>
    %95 = tpu.matmul %93, %94, %cst_58 {dimension_numbers = #tpu.dot_dimension_numbers<[1], [0], [0], [1], [0, 0, 1, 1], [], []>} : vector<256x128xf32>, vector<128x128xf32>, vector<256x128xf32> -> vector<256x128xf32>
    %c0_59 = arith.constant 0 : index
    %c0_60 = arith.constant 0 : index
    %96 = vector.load %arg17[%c0_59, %c0_60] : memref<1x128xf32, #tpu.memory_space<vmem>>, vector<1x128xf32>
    %97 = vector.broadcast %96 : vector<1x128xf32> to vector<256x128xf32>
    %98 = arith.addf %95, %97 : vector<256x128xf32>
    %cst_61 = arith.constant 0.000000e+00 : f32
    %99 = vector.broadcast %cst_61 : f32 to vector<256x128xf32>
    %100 = arith.maximumf %98, %99 : vector<256x128xf32>
    %cst_62 = arith.constant dense<0.000000e+00> : vector<1x128xf32>
    %101 = tpu.matmul %0, %100, %cst_62 {dimension_numbers = #tpu.dot_dimension_numbers<[1], [0], [0], [1], [0, 0, 1, 1], [], []>} : vector<1x256xf32>, vector<256x128xf32>, vector<1x128xf32> -> vector<1x128xf32>
    %cst_63 = arith.constant 3.906250e-03 : f32
    %102 = vector.broadcast %cst_63 : f32 to vector<1x128xf32>
    %103 = arith.mulf %101, %102 : vector<1x128xf32>
    %104 = vector.broadcast %103 : vector<1x128xf32> to vector<256x128xf32>
    %105 = arith.subf %100, %104 : vector<256x128xf32>
    %106 = arith.mulf %105, %105 : vector<256x128xf32>
    %cst_64 = arith.constant dense<0.000000e+00> : vector<1x128xf32>
    %107 = tpu.matmul %0, %106, %cst_64 {dimension_numbers = #tpu.dot_dimension_numbers<[1], [0], [0], [1], [0, 0, 1, 1], [], []>} : vector<1x256xf32>, vector<256x128xf32>, vector<1x128xf32> -> vector<1x128xf32>
    %cst_65 = arith.constant 3.906250e-03 : f32
    %108 = vector.broadcast %cst_65 : f32 to vector<1x128xf32>
    %109 = arith.mulf %107, %108 : vector<1x128xf32>
    %c0_66 = arith.constant 0 : index
    %c0_67 = arith.constant 0 : index
    %110 = vector.load %arg18[%c0_66, %c0_67] : memref<1x128xf32, #tpu.memory_space<vmem>>, vector<1x128xf32>
    %cst_68 = arith.constant 9.99999974E-6 : f32
    %111 = vector.broadcast %cst_68 : f32 to vector<1x128xf32>
    %112 = arith.addf %109, %111 : vector<1x128xf32>
    %113 = math.rsqrt %112 : vector<1x128xf32>
    %114 = arith.mulf %110, %113 : vector<1x128xf32>
    %115 = vector.broadcast %114 : vector<1x128xf32> to vector<256x128xf32>
    %116 = arith.mulf %105, %115 : vector<256x128xf32>
    %c0_69 = arith.constant 0 : index
    %c0_70 = arith.constant 0 : index
    %117 = vector.load %arg19[%c0_69, %c0_70] : memref<1x128xf32, #tpu.memory_space<vmem>>, vector<1x128xf32>
    %118 = vector.broadcast %117 : vector<1x128xf32> to vector<256x128xf32>
    %119 = arith.addf %116, %118 : vector<256x128xf32>
    %c0_71 = arith.constant 0 : index
    %c0_72 = arith.constant 0 : index
    %120 = vector.load %arg20[%c0_71, %c0_72] : memref<128x128xf32, #tpu.memory_space<vmem>>, vector<128x128xf32>
    %cst_73 = arith.constant dense<0.000000e+00> : vector<256x128xf32>
    %121 = tpu.matmul %119, %120, %cst_73 {dimension_numbers = #tpu.dot_dimension_numbers<[1], [0], [0], [1], [0, 0, 1, 1], [], []>} : vector<256x128xf32>, vector<128x128xf32>, vector<256x128xf32> -> vector<256x128xf32>
    %c0_74 = arith.constant 0 : index
    %c0_75 = arith.constant 0 : index
    %122 = vector.load %arg21[%c0_74, %c0_75] : memref<1x128xf32, #tpu.memory_space<vmem>>, vector<1x128xf32>
    %123 = vector.broadcast %122 : vector<1x128xf32> to vector<256x128xf32>
    %124 = arith.addf %121, %123 : vector<256x128xf32>
    %c0_76 = arith.constant 0 : index
    %c0_77 = arith.constant 0 : index
    %125 = vector.load %arg22[%c0_76, %c0_77] : memref<256x128xf32, #tpu.memory_space<vmem>>, vector<256x128xf32>
    tpu.vector_store %arg22[%c0_76, %c0_77], %124 {strides = array<i32>} : memref<256x128xf32, #tpu.memory_space<vmem>>, vector<256x128xf32>,
    return
  }
}

</mosaic_0001>

<bundles_post_ra>
// kernel: vae_forward.1
= control target key start
LH: loop header
LB: loop body
LE: loop exit
PB: predicated region body
PF: predicated region fallthrough
CT: control target
= control target key end

     0   :  { %v8197_v56 = vmov 1.0   ;;  %s8162_s2 = inlined_call_operand.vmem [shape: f32[128,128], index: 2, kind: input, shape index: {}]   ;;  %s8163_s0 = inlined_call_operand.vmem [shape: f32[256,128], index: 0, kind: input, shape index: {}]   ;;  %s8164_s3 = inlined_call_operand.vmem [shape: f32[1,128], index: 3, kind: input, shape index: {}]   ;;  %s8165_s6 = inlined_call_operand.vmem [shape: f32[128,128], index: 6, kind: input, shape index: {}]   ;;  %s8166_s4 = inlined_call_operand.vmem [shape: f32[1,128], index: 4, kind: input, shape index: {}]   ;;  %s8167_s5 = inlined_call_operand.vmem [shape: f32[1,128], index: 5, kind: input, shape index: {}]   ;;  %s8168_s7 = inlined_call_operand.vmem [shape: f32[1,128], index: 7, kind: input, shape index: {}]   ;;  %s8169_s10 = inlined_call_operand.vmem [shape: f32[128,256], index: 10, kind: input, shape index: {}]   ;;  %s8170_s12 = inlined_call_operand.vmem [shape: f32[128,128], index: 12, kind: input, shape index: {}]   ;;  %s8171_s8 = inlined_call_operand.vmem [shape: f32[1,128], index: 8, kind: input, shape index: {}]   ;;  %s8172_s9 = inlined_call_operand.vmem [shape: f32[1,128], index: 9, kind: input, shape index: {}]   ;;  %s8173_s11 = inlined_call_operand.vmem [shape: f32[1,256], index: 11, kind: input, shape index: {}]   ;;  %s8174_s23 = inlined_call_operand.vmem [shape: f32[256,256], index: 23, kind: output, shape index: {1}]   ;;  %s8175_s1 = inlined_call_operand.vmem [shape: f32[256,128], index: 1, kind: input, shape index: {}]   ;;  %s8176_s13 = inlined_call_operand.vmem [shape: f32[1,128], index: 13, kind: input, shape index: {}]   ;;  %s8177_s16 = inlined_call_operand.vmem [shape: f32[128,128], index: 16, kind: input, shape index: {}]   ;;  %s8178_s14 = inlined_call_operand.vmem [shape: f32[1,128], index: 14, kind: input, shape index: {}]   ;;  %s8179_s15 = inlined_call_operand.vmem [shape: f32[1,128], index: 15, kind: input, shape index: {}]   ;;  %s8180_s17 = inlined_call_operand.vmem [shape: f32[1,128], index: 17, kind: input, shape index: {}]   ;;  %s8181_s20 = inlined_call_operand.vmem [shape: f32[128,128], index: 20, kind: input, shape index: {}]   ;;  %s8182_s18 = inlined_call_operand.vmem [shape: f32[1,128], index: 18, kind: input, shape index: {}]   ;;  %s8183_s19 = inlined_call_operand.vmem [shape: f32[1,128], index: 19, kind: input, shape index: {}]   ;;  %s8184_s21 = inlined_call_operand.vmem [shape: f32[1,128], index: 21, kind: input, shape index: {}]   ;;  %s8185_s22 = inlined_call_operand.vmem [shape: f32[256,128], index: 22, kind: output, shape index: {0}]  }
   0x1   :  { %8246 = sst [smem:[#allocation2_spill]] %s8162_s2  ;;  %449 = vmatprep.mubr.f32.mxu1 %v8197_v56 }
   0x2   :  { %8247 = sst [smem:[#allocation3_spill]] %s8163_s0  ;;  %s8254_s24 = sld [smem:[#allocation2_spill]] }
   0x3   :  { %8248 = sst [smem:[#allocation4_spill]] %s8164_s3 }
   0x4   :  { %8249 = sst [smem:[#allocation5_spill]] %s8165_s6  ;;  %s8256_s30 = sld [smem:[#allocation4_spill]] }
   0x5   :  { %8250 = sst [smem:[#allocation6_spill]] %s8166_s4  ;;  %s8255_s4 = sld [smem:[#allocation3_spill]] }
   0x6   :  { %8251 = sst [smem:[#allocation7_spill]] %s8167_s5  ;;  %s8257_s0 = sld [smem:[#allocation5_spill]] }
   0x7   :  { %8252 = sst [smem:[#allocation8_spill]] %s8168_s7  ;;  %s8273_s29 = sld [smem:[#allocation7_spill]] }
   0x8   :  { %8253 = sst [smem:[#allocation9_spill]] %s8169_s10  ;;  %v105_v0 = vld [vmem:[%s8254_s24] sm:$0xff]  ;;  %v106_v1 = vld [vmem:[%s8254_s24 + $0x8] sm:$0xff]  ;;  %v107_v2 = vld [vmem:[%s8254_s24 + $0x10] sm:$0xff]  ;;  %s8272_s10 = sld [smem:[#allocation6_spill]] }
   0x9   :  { %v4163_v3 = vpack.c.bf16 %v106_v1, %v105_v0  ;;  %v108_v4 = vld [vmem:[%s8254_s24 + $0x18] sm:$0xff]  ;;  %v109_v6 = vld [vmem:[%s8254_s24 + $0x20] sm:$0xff]  ;;  %v110_v7 = vld [vmem:[%s8254_s24 + $0x28] sm:$0xff]  ;;  %s8275_s25 = sld [smem:[#allocation9_spill]] }
   0xa   :  { %v4167_v5 = vpack.c.bf16 %v108_v4, %v107_v2  ;;  %v4171_v8 = vpack.c.bf16 %v110_v7, %v109_v6  ;;  %v111_v10 = vld [vmem:[%s8254_s24 + $0x30] sm:$0xff]  ;;  %v112_v11 = vld [vmem:[%s8254_s24 + $0x38] sm:$0xff]  ;;  %v113_v13 = vld [vmem:[%s8254_s24 + $0x40] sm:$0xff] }
   0xb   :  { %4164 = vmatprep.subr.bf16.mxu0 %v4163_v3  ;;  %v73_v9 = vld [vmem:[%s8255_s4] sm:$0xff]  ;;  %v4175_v12 = vpack.c.bf16 %v112_v11, %v111_v10  ;;  %v114_v14 = vld [vmem:[%s8254_s24 + $0x48] sm:$0xff]  ;;  %v115_v16 = vld [vmem:[%s8254_s24 + $0x50] sm:$0xff] }
   0xc   :  { %4166 = vmatpush3.bf16.msra.mxu0 %v4163_v3  ;;  %3795 = vmatprep.mubr.f32.mxu0 %v73_v9  ;;  %v4179_v15 = vpack.c.bf16 %v114_v14, %v113_v13  ;;  %v116_v17 = vld [vmem:[%s8254_s24 + $0x58] sm:$0xff]  ;;  %v117_v19 = vld [vmem:[%s8254_s24 + $0x60] sm:$0xff]  ;;  %v118_v20 = vld [vmem:[%s8254_s24 + $0x68] sm:$0xff] }
   0xd   :  { %4168 = vmatprep.subr.bf16.mxu0 %v4167_v5  ;;  %v4183_v18 = vpack.c.bf16 %v116_v17, %v115_v16  ;;  %v4187_v21 = vpack.c.bf16 %v118_v20, %v117_v19  ;;  %v119_v22 = vld [vmem:[%s8254_s24 + $0x70] sm:$0xff]  ;;  %v120_v23 = vld [vmem:[%s8254_s24 + $0x78] sm:$0xff]  ;;  %v74_v25 = vld [vmem:[%s8255_s4 + $0x8] sm:$0xff] }
   0xe   :  { %v4191_v24 = vpack.c.bf16 %v120_v23, %v119_v22  ;;  %v75_v26 = vld [vmem:[%s8255_s4 + $0x10] sm:$0xff]  ;;  %v76_v27 = vld [vmem:[%s8255_s4 + $0x18] sm:$0xff]  ;;  %v77_v28 = vld [vmem:[%s8255_s4 + $0x20] sm:$0xff] }
   0xf   :  { %v78_v29 = vld [vmem:[%s8255_s4 + $0x28] sm:$0xff]  ;;  %v79_v30 = vld [vmem:[%s8255_s4 + $0x30] sm:$0xff]  ;;  %v80_v31 = vld [vmem:[%s8255_s4 + $0x38] sm:$0xff] }
  0x10   :  { %4170 = vmatpush3.bf16.msra.mxu0 %v4167_v5  ;;  %v81_v32 = vld [vmem:[%s8255_s4 + $0x40] sm:$0xff]  ;;  %v82_v33 = vld [vmem:[%s8255_s4 + $0x48] sm:$0xff]  ;;  %v83_v34 = vld [vmem:[%s8255_s4 + $0x50] sm:$0xff] }
  0x11   :  { %4172 = vmatprep.subr.bf16.mxu0 %v4171_v8  ;;  %v84_v35 = vld [vmem:[%s8255_s4 + $0x58] sm:$0xff]  ;;  %v85_v36 = vld [vmem:[%s8255_s4 + $0x60] sm:$0xff]  ;;  %v86_v37 = vld [vmem:[%s8255_s4 + $0x68] sm:$0xff] }
  0x12   :  { %v87_v38 = vld [vmem:[%s8255_s4 + $0x70] sm:$0xff]  ;;  %v88_v39 = vld [vmem:[%s8255_s4 + $0x78] sm:$0xff]  ;;  %v89_v40 = vld [vmem:[%s8255_s4 + $0x80] sm:$0xff] }
  0x13   :  { %v90_v41 = vld [vmem:[%s8255_s4 + $0x88] sm:$0xff]  ;;  %v91_v42 = vld [vmem:[%s8255_s4 + $0x90] sm:$0xff]  ;;  %v92_v43 = vld [vmem:[%s8255_s4 + $0x98] sm:$0xff] }
  0x14   :  { %4174 = vmatpush3.bf16.msra.mxu0 %v4171_v8  ;;  %v93_v44 = vld [vmem:[%s8255_s4 + $0xa0] sm:$0xff]  ;;  %v94_v45 = vld [vmem:[%s8255_s4 + $0xa8] sm:$0xff]  ;;  %v95_v46 = vld [vmem:[%s8255_s4 + $0xb0] sm:$0xff] }
  0x15   :  { %4176 = vmatprep.subr.bf16.mxu0 %v4175_v12  ;;  %v96_v47 = vld [vmem:[%s8255_s4 + $0xb8] sm:$0xff]  ;;  %v97_v48 = vld [vmem:[%s8255_s4 + $0xc0] sm:$0xff]  ;;  %v98_v49 = vld [vmem:[%s8255_s4 + $0xc8] sm:$0xff] }
  0x16   :  { %v99_v50 = vld [vmem:[%s8255_s4 + $0xd0] sm:$0xff]  ;;  %v100_v51 = vld [vmem:[%s8255_s4 + $0xd8] sm:$0xff]  ;;  %v101_v52 = vld [vmem:[%s8255_s4 + $0xe0] sm:$0xff] }
  0x17   :  { %v102_v53 = vld [vmem:[%s8255_s4 + $0xe8] sm:$0xff]  ;;  %v103_v54 = vld [vmem:[%s8255_s4 + $0xf0] sm:$0xff]  ;;  %v104_v55 = vld [vmem:[%s8255_s4 + $0xf8] sm:$0xff]  ;;  %s8274_s4 = sld [smem:[#allocation8_spill]] }
  0x18   :  { %4178 = vmatpush3.bf16.msra.mxu0 %v4175_v12  ;;  %v4977_v7 = vld [vmem:[%s8256_s30] ss:$0 sm:$0xff] }
  0x19   :  { %4180 = vmatprep.subr.bf16.mxu0 %v4179_v15 }
  0x1c   :  { %4182 = vmatpush3.bf16.msra.mxu0 %v4179_v15 }
  0x1d   :  { %4184 = vmatprep.subr.bf16.mxu0 %v4183_v18 }
  0x20   :  { %4186 = vmatpush3.bf16.msra.mxu0 %v4183_v18 }
  0x21   :  { %4188 = vmatprep.subr.bf16.mxu0 %v4187_v21 }
  0x24   :  { %4190 = vmatpush3.bf16.msra.mxu0 %v4187_v21 }
  0x25   :  { %4192 = vmatprep.subr.bf16.mxu0 %v4191_v24 }
  0x28   :  { %4194 = vmatpush3.bf16.msra.mxu0 %v4191_v24 }
  0x2b   :  { %3796 = vmatmul.mubr.f32.vlgmr.msra.gmra.mrb[0].mxu0 %v74_v25 }
  0x2c   :  { %3798 = vmatprep.mubr.f32.mxu0 %v75_v26 }
  0x2f   :  { %3799 = vmatmul.mubr.f32.gmra.mrb[2].mxu0 %v76_v27 }
  0x30   :  { %3801 = vmatprep.mubr.f32.mxu0 %v77_v28 }
  0x33   :  { %3802 = vmatmul.mubr.f32.gmra.mrb[4].mxu0 %v78_v29 }
  0x34   :  { %3804 = vmatprep.mubr.f32.mxu0 %v79_v30 }
  0x37   :  { %3805 = vmatmul.mubr.f32.gmra.mrb[6].mxu0 %v80_v31 }
  0x38   :  { %3807 = vmatprep.mubr.f32.mxu0 %v81_v32 }
  0x3b   :  { %3808 = vmatmul.mubr.f32.gmra.mrb[8].mxu0 %v82_v33 }
  0x3c   :  { %3810 = vmatprep.mubr.f32.mxu0 %v83_v34 }
  0x3f   :  { %3811 = vmatmul.mubr.f32.gmra.mrb[10].mxu0 %v84_v35 }
  0x40   :  { %3813 = vmatprep.mubr.f32.mxu0 %v85_v36 }
  0x43   :  { %3814 = vmatmul.mubr.f32.gmra.mrb[12].mxu0 %v86_v37 }
  0x44   :  { %3816 = vmatprep.mubr.f32.mxu0 %v87_v38 }
  0x47   :  { %3817 = vmatmul.mubr.f32.gmra.mrb[14].mxu0 %v88_v39 }
  0x48   :  { %3819 = vmatprep.mubr.f32.mxu0 %v89_v40 }
  0x4b   :  { %3820 = vmatmul.mubr.f32.gmra.mrb[16].mxu0 %v90_v41 }
  0x4c   :  { %3822 = vmatprep.mubr.f32.mxu0 %v91_v42 }
  0x4f   :  { %3823 = vmatmul.mubr.f32.gmra.mrb[18].mxu0 %v92_v43 }
  0x50   :  { %3825 = vmatprep.mubr.f32.mxu0 %v93_v44 }
  0x53   :  { %3826 = vmatmul.mubr.f32.gmra.mrb[20].mxu0 %v94_v45 }
  0x54   :  { %3828 = vmatprep.mubr.f32.mxu0 %v95_v46 }
  0x57   :  { %3829 = vmatmul.mubr.f32.gmra.mrb[22].mxu0 %v96_v47 }
  0x58   :  { %3831 = vmatprep.mubr.f32.mxu0 %v97_v48 }
  0x5b   :  { %3832 = vmatmul.mubr.f32.gmra.mrb[24].mxu0 %v98_v49 }
  0x5c   :  { %3834 = vmatprep.mubr.f32.mxu0 %v99_v50 }
  0x5f   :  { %3835 = vmatmul.mubr.f32.gmra.mrb[26].mxu0 %v100_v51 }
  0x60   :  { %3837 = vmatprep.mubr.f32.mxu0 %v101_v52 }
  0x63   :  { %3838 = vmatmul.mubr.f32.gmra.mrb[28].mxu0 %v102_v53 }
  0x64   :  { %3840 = vmatprep.mubr.f32.mxu0 %v103_v54 }
  0x67   :  { %3841 = vmatmul.mubr.f32.gmra.mrb[30].mxu0 %v104_v55 }
  0xfe   :  { %v3797_v57 = vpop.f32.mrb[0].mxu0 }
  0xff   :  { %v194_v58 = vpop.f32.mrb[1].mxu0  ;;  %v4984_v10 = vadd.f32 %v3797_v57, %v4977_v7 }
 0x100   :  { %v4987_v11 = vadd.f32 %v4977_v7, %v194_v58 }
 0x101   :  { %v354_v15 = vmax.f32 %v4984_v10, 0.0 }
 0x102   :  { %v3800_v59 = vpop.f32.mrb[2].mxu0  ;;  %v353_v17 = vmax.f32 %v4987_v11, 0.0 }
 0x103   :  { %v204_v60 = vpop.f32.mrb[3].mxu0  ;;  %v4998_v18 = vadd.f32 %v3800_v59, %v4977_v7 }
 0x104   :  { %v5001_v19 = vadd.f32 %v4977_v7, %v204_v60  ;;  %v4197_v32 = vpack.c.bf16 %v354_v15, %v353_v17 }
 0x105   :  { %v356_v29 = vmax.f32 %v4998_v18, 0.0 }
 0x106   :  { %v3803_v61 = vpop.f32.mrb[4].mxu0  ;;  %v355_v30 = vmax.f32 %v5001_v19, 0.0 }
 0x107   :  { %v214_v62 = vpop.f32.mrb[5].mxu0  ;;  %v5006_v23 = vadd.f32 %v3803_v61, %v4977_v7 }
 0x108   :  { %v5012_v26 = vadd.f32 %v4977_v7, %v214_v62  ;;  %v4201_v42 = vpack.c.bf16 %v356_v29, %v355_v30 }
 0x109   :  { %v358_v35 = vmax.f32 %v5006_v23, 0.0 }
 0x10a   :  { %v3806_v63 = vpop.f32.mrb[6].mxu0  ;;  %v357_v38 = vmax.f32 %v5012_v26, 0.0 }
 0x10b   :  { %v224_v0 = vpop.f32.mrb[7].mxu0  ;;  %v5035_v39 = vadd.f32 %v3806_v63, %v4977_v7 }
 0x10c   :  { %v5049_v43 = vadd.f32 %v4977_v7, %v224_v0  ;;  %v4205_v49 = vpack.c.bf16 %v358_v35, %v357_v38 }
 0x10d   :  { %v360_v50 = vmax.f32 %v5035_v39, 0.0 }
 0x10e   :  { %v3809_v1 = vpop.f32.mrb[8].mxu0  ;;  %v359_v53 = vmax.f32 %v5049_v43, 0.0 }
 0x10f   :  { %v234_v2 = vpop.f32.mrb[9].mxu0  ;;  %v5070_v54 = vadd.f32 %v3809_v1, %v4977_v7 }
 0x110   :  { %v5073_v55 = vadd.f32 %v4977_v7, %v234_v2  ;;  %v4209_v2 = vpack.c.bf16 %v360_v50, %v359_v53 }
 0x112   :  { %v3812_v3 = vpop.f32.mrb[10].mxu0 }
 0x113   :  { %v4968_v4 = vpop.f32.mrb[11].mxu0  ;;  %v5078_v60 = vadd.f32 %v3812_v3, %v4977_v7  ;;  %v8194_v3 = vmax.f32 %v5070_v54, 0.0 }
 0x114   :  { %v5085_v63 = vadd.f32 %v4977_v7, %v4968_v4 }
 0x116   :  { %v4970_v5 = vpop.f32.mrb[12].mxu0 }
 0x117   :  { %v4972_v6 = vpop.f32.mrb[13].mxu0 }
 0x11a   :  { %v4979_v8 = vpop.f32.mrb[14].mxu0 }
 0x11b   :  { %v4981_v9 = vpop.f32.mrb[15].mxu0 }
 0x11e   :  { %v3821_v12 = vpop.f32.mrb[16].mxu0 }
 0x11f   :  { %v4990_v13 = vadd.f32 %v3821_v12, %v4977_v7  ;;  %v274_v14 = vpop.f32.mrb[17].mxu0  ;;  %v361_v12 = vmax.f32 %v5073_v55, 0.0 }
 0x120   :  { %v4994_v16 = vadd.f32 %v4977_v7, %v274_v14 }
 0x121   :  { %v370_v20 = vmax.f32 %v4990_v13, 0.0 }
 0x122   :  { %v369_v21 = vmax.f32 %v4994_v16, 0.0  ;;  %v3824_v22 = vpop.f32.mrb[18].mxu0 }
 0x123   :  { %v5009_v24 = vadd.f32 %v3824_v22, %v4977_v7  ;;  %v284_v25 = vpop.f32.mrb[19].mxu0 }
 0x124   :  { %v5015_v27 = vadd.f32 %v4977_v7, %v284_v25  ;;  %v4195_v28 = vpack.c.bf16 %v370_v20, %v369_v21  ;;  %v8190_v25 = vmax.f32 %v5078_v60, 0.0 }
 0x125   :  { %v372_v31 = vmax.f32 %v5009_v24, 0.0 }
 0x126   :  { %v371_v33 = vmax.f32 %v5015_v27, 0.0  ;;  %v3827_v34 = vpop.f32.mrb[20].mxu0  ;;  %4196 = vmatprep.subr.bf16.mxu1 %v4195_v28 }
 0x127   :  { %v5031_v36 = vadd.f32 %v3827_v34, %v4977_v7  ;;  %v294_v37 = vpop.f32.mrb[21].mxu0  ;;  %4198 = vmatpush3.bf16.msra.mxu1 %v4197_v32  ;;  %v8191_v34 = vmax.f32 %v5085_v63, 0.0 }
 0x128   :  { %v4199_v40 = vpack.c.bf16 %v372_v31, %v371_v33  ;;  %v5042_v41 = vadd.f32 %v4977_v7, %v294_v37  ;;  %v5109_v37 = vadd.f32 %v4970_v5, %v4977_v7 }
 0x129   :  { %v374_v44 = vmax.f32 %v5031_v36, 0.0 }
 0x12a   :  { %v373_v45 = vmax.f32 %v5042_v41, 0.0  ;;  %v3830_v46 = vpop.f32.mrb[22].mxu0  ;;  %4200 = vmatprep.subr.bf16.mxu1 %v4199_v40 }
 0x12b   :  { %v5054_v47 = vadd.f32 %v3830_v46, %v4977_v7  ;;  %v304_v48 = vpop.f32.mrb[23].mxu0  ;;  %4202 = vmatpush3.bf16.msra.mxu1 %v4201_v42  ;;  %v4213_v46 = vpack.c.bf16 %v8194_v3, %v361_v12 }
 0x12c   :  { %v4203_v51 = vpack.c.bf16 %v374_v44, %v373_v45  ;;  %v5066_v52 = vadd.f32 %v4977_v7, %v304_v48  ;;  %v5124_v48 = vadd.f32 %v4977_v7, %v4972_v6 }
 0x12d   :  { %v376_v57 = vmax.f32 %v5054_v47, 0.0 }
 0x12e   :  { %v375_v58 = vmax.f32 %v5066_v52, 0.0  ;;  %v3833_v59 = vpop.f32.mrb[24].mxu0  ;;  %4204 = vmatprep.subr.bf16.mxu1 %v4203_v51 }
 0x12f   :  { %v5081_v61 = vadd.f32 %v3833_v59, %v4977_v7  ;;  %v314_v62 = vpop.f32.mrb[25].mxu0  ;;  %4206 = vmatpush3.bf16.msra.mxu1 %v4205_v49 }
 0x130   :  { %v4207_v0 = vpack.c.bf16 %v376_v57, %v375_v58  ;;  %v5092_v1 = vadd.f32 %v4977_v7, %v314_v62 }
 0x131   :  { %v378_v4 = vmax.f32 %v5081_v61, 0.0 }
 0x132   :  { %v377_v14 = vmax.f32 %v5092_v1, 0.0  ;;  %v3836_v22 = vpop.f32.mrb[26].mxu0  ;;  %4208 = vmatprep.subr.bf16.mxu1 %v4207_v0  ;;  %v4217_v0 = vpack.c.bf16 %v8190_v25, %v8191_v34 }
 0x133   :  { %v5104_v28 = vadd.f32 %v3836_v22, %v4977_v7  ;;  %v324_v32 = vpop.f32.mrb[27].mxu0  ;;  %4210 = vmatpush3.bf16.msra.mxu1 %v4209_v2  ;;  %v8201_v2 = vmax.f32 %v5109_v37, 0.0 }
 0x134   :  { %v4211_v40 = vpack.c.bf16 %v378_v4, %v377_v14  ;;  %v5116_v42 = vadd.f32 %v4977_v7, %v324_v32  ;;  %v8202_v32 = vmax.f32 %v5124_v48, 0.0 }
 0x135   :  { %v8192_v5 = vmax.f32 %v5104_v28, 0.0 }
 0x136   :  { %v8193_v49 = vmax.f32 %v5116_v42, 0.0  ;;  %v3839_v51 = vpop.f32.mrb[28].mxu0  ;;  %4212 = vmatprep.subr.bf16.mxu1 %v4211_v40  ;;  %v5146_v40 = vadd.f32 %v4979_v8, %v4977_v7  ;;  %v8259_v61 = vmax.f32 %v5116_v42, 0.0 }
 0x137   :  { %v5129_v59 = vadd.f32 %v3839_v51, %v4977_v7  ;;  %v334_v62 = vpop.f32.mrb[29].mxu0  ;;  %4214 = vmatpush3.bf16.msra.mxu1 %v4213_v46  ;;  %v5150_v46 = vadd.f32 %v4977_v7, %v4981_v9  ;;  %v4221_v9 = vpack.c.bf16 %v8201_v2, %v8202_v32 }
 0x138   :  { %v4215_v6 = vpack.c.bf16 %v8192_v5, %v8193_v49  ;;  %v5141_v22 = vadd.f32 %v4977_v7, %v334_v62 }
 0x139   :  { %v8203_v51 = vmax.f32 %v5129_v59, 0.0 }
 0x13a   :  { %v8204_v25 = vmax.f32 %v5141_v22, 0.0  ;;  %v3842_v34 = vpop.f32.mrb[30].mxu0  ;;  %4216 = vmatprep.subr.bf16.mxu1 %v4215_v6  ;;  %v8199_v6 = vmax.f32 %v5146_v40, 0.0 }
 0x13b   :  { %v5155_v5 = vadd.f32 %v3842_v34, %v4977_v7  ;;  %v344_v62 = vpop.f32.mrb[31].mxu0  ;;  %4218 = vmatpush3.bf16.msra.mxu1 %v4217_v0  ;;  %v8200_v34 = vmax.f32 %v5150_v46, 0.0 }
 0x13c   :  { %v4219_v8 = vpack.c.bf16 %v8203_v51, %v8204_v25  ;;  %v5162_v49 = vadd.f32 %v4977_v7, %v344_v62 }
 0x13d   :  { %v8195_v3 = vmax.f32 %v5155_v5, 0.0  ;;  %v4225_v62 = vpack.c.bf16 %v8199_v6, %v8200_v34  ;;  %v456_v6 = vlaneseq }
 0x13e   :  { %v8196_v0 = vmax.f32 %v5162_v49, 0.0  ;;  %4220 = vmatprep.subr.bf16.mxu1 %v4219_v8  ;;  %v676_v8 = vld [vmem:[%s8257_s0] sm:$0xff] }
 0x13f   :  { %4222 = vmatpush3.bf16.msra.mxu1 %v4221_v9  ;;  %v677_v9 = vld [vmem:[%s8257_s0 + $0x8] sm:$0xff]  ;;  %v5194_v32 = vshrl.u32 %v456_v6, 7 }
 0x140   :  { %v4223_v7 = vpack.c.bf16 %v8195_v3, %v8196_v0  ;;  %v678_v3 = vld [vmem:[%s8257_s0 + $0x10] sm:$0xff]  ;;  %v4259_v0 = vpack.c.bf16 %v677_v9, %v676_v8 }
 0x141   :  { %v5197_v25 = vsub.s32 0, %v5194_v32 }
 0x142   :  { %4224 = vmatprep.subr.bf16.mxu1 %v4223_v7  ;;  %v679_v7 = vld [vmem:[%s8257_s0 + $0x18] sm:$0xff]  ;;  %4260 = vmatprep.subr.bf16.mxu0 %v4259_v0 }
 0x143   :  { %4226 = vmatpush3.bf16.msra.mxu1 %v4225_v62  ;;  %v4263_v62 = vpack.c.bf16 %v679_v7, %v678_v3  ;;  %4262 = vmatpush3.bf16.msra.mxu0 %v4259_v0 }
 0x145   :  { %4264 = vmatprep.subr.bf16.mxu0 %v4263_v62 }
 0x146   :  { %450 = vmatmul.mubr.f32.vlgmr.msra.gmra.mrb[0].mxu1 %v8197_v56 }
 0x147   :  { %588 = vmatprep.mubr.f32.mxu1 %v8197_v56  ;;  %4266 = vmatpush3.bf16.msra.mxu0 %v4263_v62 }
 0x219   :  { %v3323_v56 = vpop.f32.mrb[0].mxu1 }
 0x21a   :  { %v3324_v34 = vpop.f32.mrb[1].mxu1 }
 0x21b   :  { %v3325_v2 = vadd.f32 %v3324_v34, %v3323_v56 }
 0x21d   :  { %v455_v51 = vmul.f32 0.00390625, %v3325_v2 }
 0x21f   :  { %v5200_v8 = vrot.slane %v455_v51, %v5197_v25  ;;  %v8258_v51 = vmax.f32 %v5070_v54, 0.0 }
 0x221   :  { %v5205_v3 = vsub.f32 %v353_v17, %v5200_v8  ;;  %v5210_v0 = vsub.f32 %v354_v15, %v5200_v8  ;;  %v5215_v56 = vsub.f32 %v369_v21, %v5200_v8  ;;  %v5220_v2 = vsub.f32 %v370_v20, %v5200_v8 }
 0x222   :  { %v5225_v11 = vsub.f32 %v371_v33, %v5200_v8  ;;  %v5230_v10 = vsub.f32 %v372_v31, %v5200_v8  ;;  %v5243_v20 = vsub.f32 %v355_v30, %v5200_v8  ;;  %v5248_v21 = vsub.f32 %v356_v29, %v5200_v8 }
 0x223   :  { %v492_v15 = vmul.f32 %v5205_v3, %v5205_v3  ;;  %v493_v16 = vmul.f32 %v5210_v0, %v5210_v0  ;;  %v508_v13 = vmul.f32 %v5215_v56, %v5215_v56  ;;  %v509_v17 = vmul.f32 %v5220_v2, %v5220_v2 }
 0x224   :  { %v5253_v24 = vsub.f32 %v373_v45, %v5200_v8  ;;  %v5258_v27 = vsub.f32 %v374_v44, %v5200_v8  ;;  %v510_v19 = vmul.f32 %v5225_v11, %v5225_v11  ;;  %v511_v30 = vmul.f32 %v5230_v10, %v5230_v10 }
 0x225   :  { %v5267_v18 = vsub.f32 %v357_v38, %v5200_v8  ;;  %v4227_v29 = vpack.c.bf16 %v509_v17, %v508_v13  ;;  %v4229_v31 = vpack.c.bf16 %v493_v16, %v492_v15  ;;  %v5272_v33 = vsub.f32 %v358_v35, %v5200_v8 }
 0x226   :  { %v5277_v36 = vsub.f32 %v375_v58, %v5200_v8  ;;  %v494_v41 = vmul.f32 %v5243_v20, %v5243_v20  ;;  %v495_v26 = vmul.f32 %v5248_v21, %v5248_v21  ;;  %v5286_v38 = vsub.f32 %v376_v57, %v5200_v8 }
 0x227   :  { %v512_v23 = vmul.f32 %v5253_v24, %v5253_v24  ;;  %v513_v35 = vmul.f32 %v5258_v27, %v5258_v27  ;;  %4228 = vmatprep.subr.bf16.mxu1 %v4227_v29  ;;  %v4231_v44 = vpack.c.bf16 %v511_v30, %v510_v19  ;;  %v5295_v45 = vsub.f32 %v359_v53, %v5200_v8 }
 0x228   :  { %4230 = vmatpush3.bf16.msra.mxu1 %v4229_v31  ;;  %v5300_v47 = vsub.f32 %v360_v50, %v5200_v8  ;;  %v5305_v52 = vsub.f32 %v377_v14, %v5200_v8  ;;  %v496_v57 = vmul.f32 %v5267_v18, %v5267_v18  ;;  %v497_v58 = vmul.f32 %v5272_v33, %v5272_v33 }
 0x229   :  { %4232 = vmatprep.subr.bf16.mxu1 %v4231_v44  ;;  %v4233_v43 = vpack.c.bf16 %v495_v26, %v494_v41  ;;  %v5314_v53 = vsub.f32 %v378_v4, %v5200_v8  ;;  %v514_v39 = vmul.f32 %v5277_v36, %v5277_v36  ;;  %v515_v50 = vmul.f32 %v5286_v38, %v5286_v38 }
 0x22a   :  { %v4235_v1 = vpack.c.bf16 %v513_v35, %v512_v23  ;;  %v5323_v14 = vsub.f32 %v361_v12, %v5200_v8  ;;  %v5328_v6 = vsub.f32 %v8258_v51, %v5200_v8  ;;  %v5333_v4 = vsub.f32 %v8259_v61, %v5200_v8 }
 0x22b   :  { %v498_v34 = vmul.f32 %v5295_v45, %v5295_v45  ;;  %v499_v9 = vmul.f32 %v5300_v47, %v5300_v47  ;;  %v4237_v55 = vpack.c.bf16 %v497_v58, %v496_v57  ;;  %v8260_v12 = vmax.f32 %v5104_v28, 0.0 }
 0x22c   :  { %4234 = vmatpush3.bf16.msra.mxu1 %v4233_v43  ;;  %v516_v54 = vmul.f32 %v5305_v52, %v5305_v52  ;;  %v517_v42 = vmul.f32 %v5314_v53, %v5314_v53  ;;  %v4239_v62 = vpack.c.bf16 %v515_v50, %v514_v39  ;;  %v8261_v15 = vmax.f32 %v5085_v63, 0.0 }
 0x22d   :  { %4236 = vmatprep.subr.bf16.mxu1 %v4235_v1  ;;  %v5342_v7 = vsub.f32 %v8260_v12, %v5200_v8  ;;  %v8262_v13 = vmax.f32 %v5078_v60, 0.0  ;;  %v8263_v28 = vmax.f32 %v5141_v22, 0.0  ;;  %v500_v30 = vmul.f32 %v5323_v14, %v5323_v14 }
 0x22e   :  { %v5351_v16 = vsub.f32 %v8261_v15, %v5200_v8  ;;  %v501_v29 = vmul.f32 %v5328_v6, %v5328_v6  ;;  %v4241_v63 = vpack.c.bf16 %v499_v9, %v498_v34  ;;  %v8264_v31 = vmax.f32 %v5129_v59, 0.0 }
 0x22f   :  { %v5356_v17 = vsub.f32 %v8262_v13, %v5200_v8  ;;  %v5361_v19 = vsub.f32 %v8263_v28, %v5200_v8  ;;  %v518_v60 = vmul.f32 %v5333_v4, %v5333_v4  ;;  %v519_v22 = vmul.f32 %v5342_v7, %v5342_v7 }
 0x230   :  { %4238 = vmatpush3.bf16.msra.mxu1 %v4237_v55  ;;  %v5370_v41 = vsub.f32 %v8264_v31, %v5200_v8  ;;  %v4243_v26 = vpack.c.bf16 %v517_v42, %v516_v54  ;;  %v8265_v23 = vmax.f32 %v5124_v48, 0.0  ;;  %v8266_v44 = vmax.f32 %v5109_v37, 0.0 }
 0x231   :  { %4240 = vmatprep.subr.bf16.mxu1 %v4239_v62  ;;  %v8267_v59 = vmax.f32 %v5162_v49, 0.0  ;;  %v502_v43 = vmul.f32 %v5351_v16, %v5351_v16  ;;  %v503_v39 = vmul.f32 %v5356_v17, %v5356_v17  ;;  %v4245_v48 = vpack.c.bf16 %v501_v29, %v500_v30  ;;  %v680_v29 = vld [vmem:[%s8257_s0 + $0x20] sm:$0xff] }
 0x232   :  { %v5379_v35 = vsub.f32 %v8265_v23, %v5200_v8  ;;  %v5384_v57 = vsub.f32 %v8266_v44, %v5200_v8  ;;  %v8268_v50 = vmax.f32 %v5155_v5, 0.0  ;;  %v520_v37 = vmul.f32 %v5361_v19, %v5361_v19  ;;  %v684_v23 = vld [vmem:[%s8257_s0 + $0x40] sm:$0xff]  ;;  %v685_v44 = vld [vmem:[%s8257_s0 + $0x48] sm:$0xff] }
 0x233   :  { %v5389_v58 = vsub.f32 %v8267_v59, %v5200_v8  ;;  %v521_v49 = vmul.f32 %v5370_v41, %v5370_v41  ;;  %v4247_v51 = vpack.c.bf16 %v519_v22, %v518_v60  ;;  %v8269_v61 = vmax.f32 %v5150_v46, 0.0  ;;  %v682_v60 = vld [vmem:[%s8257_s0 + $0x30] sm:$0xff]  ;;  %v683_v22 = vld [vmem:[%s8257_s0 + $0x38] sm:$0xff] }
 0x234   :  { %4242 = vmatpush3.bf16.msra.mxu1 %v4241_v63  ;;  %v5398_v1 = vsub.f32 %v8268_v50, %v5200_v8  ;;  %v8270_v9 = vmax.f32 %v5146_v40, 0.0  ;;  %v504_v55 = vmul.f32 %v5379_v35, %v5379_v35  ;;  %v505_v12 = vmul.f32 %v5384_v57, %v5384_v57  ;;  %v681_v63 = vld [vmem:[%s8257_s0 + $0x28] sm:$0xff]  ;;  %v688_v50 = vld [vmem:[%s8257_s0 + $0x60] sm:$0xff] }
 0x235   :  { %4244 = vmatprep.subr.bf16.mxu1 %v4243_v26  ;;  %v5407_v34 = vsub.f32 %v8269_v61, %v5200_v8  ;;  %v4249_v54 = vpack.c.bf16 %v503_v39, %v502_v43  ;;  %v522_v42 = vmul.f32 %v5389_v58, %v5389_v58  ;;  %v4251_v62 = vpack.c.bf16 %v521_v49, %v520_v37  ;;  %v686_v43 = vld [vmem:[%s8257_s0 + $0x50] sm:$0xff]  ;;  %v687_v39 = vld [vmem:[%s8257_s0 + $0x58] sm:$0xff]  ;;  %v689_v37 = vld [vmem:[%s8257_s0 + $0x68] sm:$0xff] }
 0x236   :  { %v5412_v5 = vsub.f32 %v8270_v9, %v5200_v8  ;;  %v523_v46 = vmul.f32 %v5398_v1, %v5398_v1  ;;  %v4253_v15 = vpack.c.bf16 %v505_v12, %v504_v55  ;;  %v8271_v30 = vmov 1.0   ;;  %v691_v61 = vld [vmem:[%s8257_s0 + $0x78] sm:$0xff] }
 0x237   :  { %v506_v40 = vmul.f32 %v5407_v34, %v5407_v34  ;;  %v4267_v31 = vpack.c.bf16 %v681_v63, %v680_v29  ;;  %v4271_v26 = vpack.c.bf16 %v683_v22, %v682_v60  ;;  %v4275_v59 = vpack.c.bf16 %v685_v44, %v684_v23  ;;  %v5477_v29 = vld [vmem:[%s8273_s29] ss:$0 sm:$0xff] }
 0x238   :  { %4246 = vmatpush3.bf16.msra.mxu1 %v4245_v48  ;;  %v507_v8 = vmul.f32 %v5412_v5, %v5412_v5  ;;  %v4255_v13 = vpack.c.bf16 %v523_v46, %v522_v42  ;;  %v4279_v48 = vpack.c.bf16 %v687_v39, %v686_v43  ;;  %v4283_v49 = vpack.c.bf16 %v689_v37, %v688_v50 }
 0x239   :  { %4248 = vmatprep.subr.bf16.mxu1 %v4247_v51  ;;  %4268 = vmatprep.subr.bf16.mxu0 %v4267_v31  ;;  %v690_v51 = vld [vmem:[%s8257_s0 + $0x70] sm:$0xff] }
 0x23a   :  { %v4257_v28 = vpack.c.bf16 %v507_v8, %v506_v40  ;;  %4270 = vmatpush3.bf16.msra.mxu0 %v4267_v31  ;;  %v4287_v9 = vpack.c.bf16 %v691_v61, %v690_v51 }
 0x23b   :  { %4272 = vmatprep.subr.bf16.mxu0 %v4271_v26 }
 0x23c   :  { %4250 = vmatpush3.bf16.msra.mxu1 %v4249_v54 }
 0x23d   :  { %4252 = vmatprep.subr.bf16.mxu1 %v4251_v62  ;;  %v595_v62 = vld [vmem:[%s8272_s10] sm:$0x1] }
 0x23e   :  { %4274 = vmatpush3.bf16.msra.mxu0 %v4271_v26 }
 0x23f   :  { %4276 = vmatprep.subr.bf16.mxu0 %v4275_v59 }
 0x240   :  { %4254 = vmatpush3.bf16.msra.mxu1 %v4253_v15 }
 0x241   :  { %4256 = vmatprep.subr.bf16.mxu1 %v4255_v13 }
 0x242   :  { %4278 = vmatpush3.bf16.msra.mxu0 %v4275_v59 }
 0x243   :  { %4280 = vmatprep.subr.bf16.mxu0 %v4279_v48 }
 0x244   :  { %4258 = vmatpush3.bf16.msra.mxu1 %v4257_v28 }
 0x246   :  { %4282 = vmatpush3.bf16.msra.mxu0 %v4279_v48 }
 0x247   :  { %589 = vmatmul.mubr.f32.vlgmr.msra.gmra.mrb[2].mxu1 %v8271_v30  ;;  %4284 = vmatprep.subr.bf16.mxu0 %v4283_v49 }
 0x248   :  { %1020 = vmatprep.mubr.f32.mxu1 %v8271_v30 }
 0x24a   :  { %4286 = vmatpush3.bf16.msra.mxu0 %v4283_v49 }
 0x24b   :  { %4288 = vmatprep.subr.bf16.mxu0 %v4287_v9 }
 0x24e   :  { %4290 = vmatpush3.bf16.msra.mxu0 %v4287_v9 }
 0x31a   :  { %v3358_v55 = vpop.f32.mrb[2].mxu1 }
 0x31b   :  { %v3359_v12 = vpop.f32.mrb[3].mxu1 }
 0x31c   :  { %v3360_v54 = vadd.f32 %v3359_v12, %v3358_v55 }
 0x31e   :  { %v594_v42 = vmul.f32 0.00390625, %v3360_v54 }
 0x320   :  { %v596_v46 = vadd.f32 1e-05, %v594_v42 }
 0x322   :  { %4629 = vrsqrt.f32 %v596_v46 }
 0x32c   :  { %v4630_v40 = vpop.eup %4629 }
 0x32d   :  { %v598_v8 = vmul.f32 %v4630_v40, %v595_v62 }
 0x32f   :  { %v5468_v15 = vrot.slane %v598_v8, %v5197_v25 }
 0x331   :  { %v605_v13 = vmul.f32 %v5468_v15, %v5205_v3  ;;  %v606_v28 = vmul.f32 %v5468_v15, %v5210_v0  ;;  %v607_v63 = vmul.f32 %v5468_v15, %v5243_v20  ;;  %v608_v22 = vmul.f32 %v5468_v15, %v5248_v21 }
 0x332   :  { %v609_v3 = vmul.f32 %v5468_v15, %v5267_v18  ;;  %v610_v26 = vmul.f32 %v5468_v15, %v5272_v33  ;;  %v611_v23 = vmul.f32 %v5468_v15, %v5295_v45  ;;  %v612_v21 = vmul.f32 %v5468_v15, %v5300_v47 }
 0x333   :  { %v645_v31 = vadd.f32 %v5477_v29, %v606_v28  ;;  %v644_v60 = vadd.f32 %v5477_v29, %v605_v13  ;;  %v646_v0 = vadd.f32 %v5477_v29, %v607_v63  ;;  %v647_v20 = vadd.f32 %v5477_v29, %v608_v22 }
 0x334   :  { %v648_v44 = vadd.f32 %v5477_v29, %v609_v3  ;;  %v649_v18 = vadd.f32 %v5477_v29, %v610_v26  ;;  %v613_v59 = vmul.f32 %v5468_v15, %v5323_v14  ;;  %v650_v43 = vadd.f32 %v5477_v29, %v611_v23 }
 0x335   :  { %3875 = vmatprep.mubr.f32.mxu0 %v644_v60  ;;  %v614_v33 = vmul.f32 %v5468_v15, %v5328_v6  ;;  %v651_v45 = vadd.f32 %v5477_v29, %v612_v21  ;;  %v615_v39 = vmul.f32 %v5468_v15, %v5351_v16  ;;  %v616_v47 = vmul.f32 %v5468_v15, %v5356_v17 }
 0x336   :  { %3876 = vmatmul.mubr.f32.vlgmr.msra.gmra.mrb[32].mxu0 %v645_v31  ;;  %v652_v48 = vadd.f32 %v5477_v29, %v613_v59  ;;  %v617_v50 = vmul.f32 %v5468_v15, %v5379_v35  ;;  %v618_v6 = vmul.f32 %v5468_v15, %v5384_v57  ;;  %v619_v49 = vmul.f32 %v5468_v15, %v5407_v34 }
 0x337   :  { %3878 = vmatprep.mubr.f32.mxu0 %v646_v0  ;;  %v653_v14 = vadd.f32 %v5477_v29, %v614_v33  ;;  %v654_v37 = vadd.f32 %v5477_v29, %v615_v39  ;;  %v655_v16 = vadd.f32 %v5477_v29, %v616_v47  ;;  %v620_v17 = vmul.f32 %v5468_v15, %v5412_v5 }
 0x338   :  { %v656_v51 = vadd.f32 %v5477_v29, %v617_v50  ;;  %v657_v35 = vadd.f32 %v5477_v29, %v618_v6  ;;  %v621_v61 = vmul.f32 %v5468_v15, %v5215_v56  ;;  %v658_v9 = vadd.f32 %v5477_v29, %v619_v49 }
 0x339   :  { %v622_v57 = vmul.f32 %v5468_v15, %v5220_v2  ;;  %v659_v34 = vadd.f32 %v5477_v29, %v620_v17  ;;  %v623_v55 = vmul.f32 %v5468_v15, %v5225_v11  ;;  %v624_v5 = vmul.f32 %v5468_v15, %v5230_v10 }
 0x33a   :  { %3879 = vmatmul.mubr.f32.gmra.mrb[34].mxu0 %v647_v20  ;;  %v660_v12 = vadd.f32 %v5477_v29, %v621_v61  ;;  %v625_v54 = vmul.f32 %v5468_v15, %v5253_v24  ;;  %v626_v2 = vmul.f32 %v5468_v15, %v5258_v27  ;;  %v627_v46 = vmul.f32 %v5468_v15, %v5277_v36 }
 0x33b   :  { %3881 = vmatprep.mubr.f32.mxu0 %v648_v44  ;;  %v661_v56 = vadd.f32 %v5477_v29, %v622_v57  ;;  %v662_v42 = vadd.f32 %v5477_v29, %v623_v55  ;;  %v663_v11 = vadd.f32 %v5477_v29, %v624_v5  ;;  %v628_v10 = vmul.f32 %v5468_v15, %v5286_v38 }
 0x33c   :  { %v664_v62 = vadd.f32 %v5477_v29, %v625_v54  ;;  %v665_v24 = vadd.f32 %v5477_v29, %v626_v2  ;;  %v629_v40 = vmul.f32 %v5468_v15, %v5305_v52  ;;  %v666_v8 = vadd.f32 %v5477_v29, %v627_v46 }
 0x33d   :  { %v630_v27 = vmul.f32 %v5468_v15, %v5314_v53  ;;  %v667_v36 = vadd.f32 %v5477_v29, %v628_v10  ;;  %v631_v13 = vmul.f32 %v5468_v15, %v5333_v4  ;;  %v632_v38 = vmul.f32 %v5468_v15, %v5342_v7 }
 0x33e   :  { %3882 = vmatmul.mubr.f32.gmra.mrb[36].mxu0 %v649_v18  ;;  %v668_v28 = vadd.f32 %v5477_v29, %v629_v40  ;;  %v633_v63 = vmul.f32 %v5468_v15, %v5361_v19  ;;  %v634_v53 = vmul.f32 %v5468_v15, %v5370_v41  ;;  %v635_v60 = vmul.f32 %v5468_v15, %v5389_v58 }
 0x33f   :  { %3884 = vmatprep.mubr.f32.mxu0 %v650_v43  ;;  %v669_v52 = vadd.f32 %v5477_v29, %v630_v27  ;;  %v670_v31 = vadd.f32 %v5477_v29, %v631_v13  ;;  %v671_v4 = vadd.f32 %v5477_v29, %v632_v38  ;;  %v636_v7 = vmul.f32 %v5468_v15, %v5398_v1 }
 0x340   :  { %v672_v22 = vadd.f32 %v5477_v29, %v633_v63  ;;  %v673_v19 = vadd.f32 %v5477_v29, %v634_v53  ;;  %v674_v3 = vadd.f32 %v5477_v29, %v635_v60 }
 0x341   :  { %v675_v41 = vadd.f32 %v5477_v29, %v636_v7  ;;  %v5580_v29 = vld [vmem:[%s8274_s4] ss:$0 sm:$0xff] }
 0x342   :  { %3885 = vmatmul.mubr.f32.gmra.mrb[38].mxu0 %v651_v45 }
 0x343   :  { %3887 = vmatprep.mubr.f32.mxu0 %v652_v48 }
 0x346   :  { %3888 = vmatmul.mubr.f32.gmra.mrb[40].mxu0 %v653_v14 }
 0x347   :  { %3890 = vmatprep.mubr.f32.mxu0 %v654_v37 }
 0x34a   :  { %3891 = vmatmul.mubr.f32.gmra.mrb[42].mxu0 %v655_v16 }
 0x34b   :  { %3893 = vmatprep.mubr.f32.mxu0 %v656_v51 }
 0x34e   :  { %3894 = vmatmul.mubr.f32.gmra.mrb[44].mxu0 %v657_v35 }
 0x34f   :  { %3896 = vmatprep.mubr.f32.mxu0 %v658_v9 }
 0x352   :  { %3897 = vmatmul.mubr.f32.gmra.mrb[46].mxu0 %v659_v34 }
 0x353   :  { %3899 = vmatprep.mubr.f32.mxu0 %v660_v12 }
 0x356   :  { %3900 = vmatmul.mubr.f32.gmra.mrb[48].mxu0 %v661_v56 }
 0x357   :  { %3902 = vmatprep.mubr.f32.mxu0 %v662_v42 }
 0x35a   :  { %3903 = vmatmul.mubr.f32.gmra.mrb[50].mxu0 %v663_v11 }
 0x35b   :  { %3905 = vmatprep.mubr.f32.mxu0 %v664_v62 }
 0x35e   :  { %3906 = vmatmul.mubr.f32.gmra.mrb[52].mxu0 %v665_v24 }
 0x35f   :  { %3908 = vmatprep.mubr.f32.mxu0 %v666_v8 }
 0x362   :  { %3909 = vmatmul.mubr.f32.gmra.mrb[54].mxu0 %v667_v36 }
 0x363   :  { %3911 = vmatprep.mubr.f32.mxu0 %v668_v28 }
 0x366   :  { %3912 = vmatmul.mubr.f32.gmra.mrb[56].mxu0 %v669_v52 }
 0x367   :  { %3914 = vmatprep.mubr.f32.mxu0 %v670_v31 }
 0x36a   :  { %3915 = vmatmul.mubr.f32.gmra.mrb[58].mxu0 %v671_v4 }
 0x36b   :  { %3917 = vmatprep.mubr.f32.mxu0 %v672_v22 }
 0x36e   :  { %3918 = vmatmul.mubr.f32.gmra.mrb[60].mxu0 %v673_v19 }
 0x36f   :  { %3920 = vmatprep.mubr.f32.mxu0 %v674_v3 }
 0x372   :  { %3921 = vmatmul.mubr.f32.gmra.mrb[62].mxu0 %v675_v41 }
 0x409   :  { %v3877_v0 = vpop.f32.mrb[32].mxu0 }
 0x40a   :  { %v765_v26 = vpop.f32.mrb[33].mxu0  ;;  %v5587_v47 = vadd.f32 %v3877_v0, %v5580_v29 }
 0x40b   :  { %v5590_v14 = vadd.f32 %v5580_v29, %v765_v26 }
 0x40c   :  { %v925_v16 = vmax.f32 %v5587_v47, 0.0 }
 0x40d   :  { %v3880_v20 = vpop.f32.mrb[34].mxu0  ;;  %v924_v51 = vmax.f32 %v5590_v14, 0.0 }
 0x40e   :  { %v775_v58 = vpop.f32.mrb[35].mxu0  ;;  %v5601_v17 = vadd.f32 %v3880_v20, %v5580_v29 }
 0x40f   :  { %v5604_v35 = vadd.f32 %v5580_v29, %v775_v58  ;;  %v4293_v42 = vpack.c.bf16 %v925_v16, %v924_v51 }
 0x410   :  { %v927_v2 = vmax.f32 %v5601_v17, 0.0 }
 0x411   :  { %v3883_v23 = vpop.f32.mrb[36].mxu0  ;;  %v926_v11 = vmax.f32 %v5604_v35, 0.0 }
 0x412   :  { %v785_v44 = vpop.f32.mrb[37].mxu0  ;;  %v5609_v34 = vadd.f32 %v3883_v23, %v5580_v29 }
 0x413   :  { %v5615_v5 = vadd.f32 %v5580_v29, %v785_v44  ;;  %v4297_v38 = vpack.c.bf16 %v927_v2, %v926_v11 }
 0x414   :  { %v929_v24 = vmax.f32 %v5609_v34, 0.0 }
 0x415   :  { %v3886_v21 = vpop.f32.mrb[38].mxu0  ;;  %v928_v27 = vmax.f32 %v5615_v5, 0.0 }
 0x416   :  { %v795_v18 = vpop.f32.mrb[39].mxu0  ;;  %v5638_v36 = vadd.f32 %v3886_v21, %v5580_v29 }
 0x417   :  { %v5652_v52 = vadd.f32 %v5580_v29, %v795_v18  ;;  %v4301_v22 = vpack.c.bf16 %v929_v24, %v928_v27 }
 0x418   :  { %v931_v7 = vmax.f32 %v5638_v36, 0.0 }
 0x419   :  { %v3889_v59 = vpop.f32.mrb[40].mxu0  ;;  %v930_v41 = vmax.f32 %v5652_v52, 0.0 }
 0x41a   :  { %v805_v43 = vpop.f32.mrb[41].mxu0  ;;  %v5673_v0 = vadd.f32 %v3889_v59, %v5580_v29 }
 0x41b   :  { %v5676_v26 = vadd.f32 %v5580_v29, %v805_v43 }
 0x41d   :  { %v3892_v1 = vpop.f32.mrb[42].mxu0 }
 0x41e   :  { %v5571_v15 = vpop.f32.mrb[43].mxu0  ;;  %v5681_v44 = vadd.f32 %v3892_v1, %v5580_v29  ;;  %v4305_v1 = vpack.c.bf16 %v931_v7, %v930_v41 }
 0x41f   :  { %v5688_v59 = vadd.f32 %v5580_v29, %v5571_v15 }
 0x421   :  { %v5573_v33 = vpop.f32.mrb[44].mxu0 }
 0x422   :  { %v5575_v45 = vpop.f32.mrb[45].mxu0 }
 0x425   :  { %v5582_v39 = vpop.f32.mrb[46].mxu0 }
 0x426   :  { %v5584_v48 = vpop.f32.mrb[47].mxu0 }
 0x429   :  { %v3901_v50 = vpop.f32.mrb[48].mxu0 }
 0x42a   :  { %v5593_v37 = vadd.f32 %v3901_v50, %v5580_v29  ;;  %v845_v6 = vpop.f32.mrb[49].mxu0 }
 0x42b   :  { %v5597_v49 = vadd.f32 %v5580_v29, %v845_v6  ;;  %v8205_v6 = vmax.f32 %v5673_v0, 0.0 }
 0x42c   :  { %v941_v61 = vmax.f32 %v5593_v37, 0.0 }
 0x42d   :  { %v940_v9 = vmax.f32 %v5597_v49, 0.0  ;;  %v3904_v57 = vpop.f32.mrb[50].mxu0 }
 0x42e   :  { %v5612_v55 = vadd.f32 %v3904_v57, %v5580_v29  ;;  %v855_v12 = vpop.f32.mrb[51].mxu0  ;;  %v8208_v57 = vmax.f32 %v5676_v26, 0.0 }
 0x42f   :  { %v4291_v56 = vpack.c.bf16 %v941_v61, %v940_v9  ;;  %v5622_v54 = vadd.f32 %v5580_v29, %v855_v12 }
 0x430   :  { %v943_v46 = vmax.f32 %v5612_v55, 0.0 }
 0x431   :  { %v942_v62 = vmax.f32 %v5622_v54, 0.0  ;;  %v3907_v10 = vpop.f32.mrb[52].mxu0  ;;  %4292 = vmatprep.subr.bf16.mxu1 %v4291_v56 }
 0x432   :  { %v5634_v40 = vadd.f32 %v3907_v10, %v5580_v29  ;;  %v865_v8 = vpop.f32.mrb[53].mxu0  ;;  %4294 = vmatpush3.bf16.msra.mxu1 %v4293_v42  ;;  %v8206_v42 = vmax.f32 %v5681_v44, 0.0 }
 0x433   :  { %v4295_v13 = vpack.c.bf16 %v943_v46, %v942_v62  ;;  %v5645_v28 = vadd.f32 %v5580_v29, %v865_v8 }
 0x434   :  { %v945_v63 = vmax.f32 %v5634_v40, 0.0 }
 0x435   :  { %v944_v31 = vmax.f32 %v5645_v28, 0.0  ;;  %v3910_v53 = vpop.f32.mrb[54].mxu0  ;;  %4296 = vmatprep.subr.bf16.mxu1 %v4295_v13  ;;  %v8207_v13 = vmax.f32 %v5688_v59, 0.0 }
 0x436   :  { %v5657_v4 = vadd.f32 %v3910_v53, %v5580_v29  ;;  %v875_v60 = vpop.f32.mrb[55].mxu0  ;;  %4298 = vmatpush3.bf16.msra.mxu1 %v4297_v38  ;;  %v5712_v38 = vadd.f32 %v5573_v33, %v5580_v29 }
 0x437   :  { %v4299_v19 = vpack.c.bf16 %v945_v63, %v944_v31  ;;  %v5669_v3 = vadd.f32 %v5580_v29, %v875_v60 }
 0x438   :  { %v947_v20 = vmax.f32 %v5657_v4, 0.0 }
 0x439   :  { %v946_v58 = vmax.f32 %v5669_v3, 0.0  ;;  %v3913_v23 = vpop.f32.mrb[56].mxu0  ;;  %4300 = vmatprep.subr.bf16.mxu1 %v4299_v19  ;;  %v5727_v19 = vadd.f32 %v5580_v29, %v5575_v45 }
 0x43a   :  { %v5684_v21 = vadd.f32 %v3913_v23, %v5580_v29  ;;  %v885_v18 = vpop.f32.mrb[57].mxu0  ;;  %4302 = vmatpush3.bf16.msra.mxu1 %v4301_v22  ;;  %v4309_v22 = vpack.c.bf16 %v8205_v6, %v8208_v57 }
 0x43b   :  { %v4303_v43 = vpack.c.bf16 %v947_v20, %v946_v58  ;;  %v5695_v50 = vadd.f32 %v5580_v29, %v885_v18 }
 0x43c   :  { %v8211_v15 = vmax.f32 %v5684_v21, 0.0 }
 0x43d   :  { %v948_v12 = vmax.f32 %v5695_v50, 0.0  ;;  %v3916_v56 = vpop.f32.mrb[58].mxu0  ;;  %4304 = vmatprep.subr.bf16.mxu1 %v4303_v43 }
 0x43e   :  { %v5707_v10 = vadd.f32 %v3916_v56, %v5580_v29  ;;  %v895_v8 = vpop.f32.mrb[59].mxu0  ;;  %4306 = vmatpush3.bf16.msra.mxu1 %v4305_v1  ;;  %v4313_v56 = vpack.c.bf16 %v8206_v42, %v8207_v13 }
 0x43f   :  { %v4307_v53 = vpack.c.bf16 %v8211_v15, %v948_v12  ;;  %v5719_v60 = vadd.f32 %v5580_v29, %v895_v8  ;;  %v8216_v8 = vmax.f32 %v5712_v38, 0.0 }
 0x440   :  { %v8209_v33 = vmax.f32 %v5707_v10, 0.0 }
 0x441   :  { %v8210_v23 = vmax.f32 %v5719_v60, 0.0  ;;  %v3919_v18 = vpop.f32.mrb[60].mxu0  ;;  %4308 = vmatprep.subr.bf16.mxu1 %v4307_v53  ;;  %v8217_v53 = vmax.f32 %v5727_v19, 0.0 }
 0x442   :  { %v5732_v43 = vadd.f32 %v3919_v18, %v5580_v29  ;;  %v905_v1 = vpop.f32.mrb[61].mxu0  ;;  %4310 = vmatpush3.bf16.msra.mxu1 %v4309_v22  ;;  %v5749_v22 = vadd.f32 %v5582_v39, %v5580_v29  ;;  %v5753_v18 = vadd.f32 %v5580_v29, %v5584_v48 }
 0x443   :  { %v4311_v45 = vpack.c.bf16 %v8209_v33, %v8210_v23  ;;  %v5744_v6 = vadd.f32 %v5580_v29, %v905_v1  ;;  %v4317_v48 = vpack.c.bf16 %v8216_v8, %v8217_v53 }
 0x444   :  { %v8218_v42 = vmax.f32 %v5732_v43, 0.0 }
 0x445   :  { %v8219_v13 = vmax.f32 %v5744_v6, 0.0  ;;  %v3922_v57 = vpop.f32.mrb[62].mxu0  ;;  %4312 = vmatprep.subr.bf16.mxu1 %v4311_v45  ;;  %v8214_v45 = vmax.f32 %v5749_v22, 0.0 }
 0x446   :  { %v5758_v33 = vadd.f32 %v3922_v57, %v5580_v29  ;;  %v915_v1 = vpop.f32.mrb[63].mxu0  ;;  %4314 = vmatpush3.bf16.msra.mxu1 %v4313_v56  ;;  %v8215_v57 = vmax.f32 %v5753_v18, 0.0 }
 0x447   :  { %v4315_v39 = vpack.c.bf16 %v8218_v42, %v8219_v13  ;;  %v5765_v23 = vadd.f32 %v5580_v29, %v915_v1 }
 0x448   :  { %v8212_v15 = vmax.f32 %v5758_v33, 0.0  ;;  %v4321_v1 = vpack.c.bf16 %v8214_v45, %v8215_v57  ;;  %v1254_v45 = vld [vmem:[%s8275_s25 + $0x38] sm:$0xff] }
 0x449   :  { %v8213_v56 = vmax.f32 %v5765_v23, 0.0  ;;  %4316 = vmatprep.subr.bf16.mxu1 %v4315_v39  ;;  %v1248_v39 = vld [vmem:[%s8275_s25 + $0x8] sm:$0xff] }
 0x44a   :  { %4318 = vmatpush3.bf16.msra.mxu1 %v4317_v48  ;;  %v1250_v48 = vld [vmem:[%s8275_s25 + $0x18] sm:$0xff] }
 0x44b   :  { %v4319_v29 = vpack.c.bf16 %v8212_v15, %v8213_v56  ;;  %v1247_v15 = vld [vmem:[%s8275_s25] sm:$0xff]  ;;  %v5794_v56 = vpack.c.bf16 %v1250_v48, %v1248_v39  ;;  %v1253_v48 = vld [vmem:[%s8275_s25 + $0x30] sm:$0xff] }
 0x44c   :  { %v1251_v39 = vld [vmem:[%s8275_s25 + $0x20] sm:$0xff] }
 0x44d   :  { %4320 = vmatprep.subr.bf16.mxu1 %v4319_v29  ;;  %v1249_v29 = vld [vmem:[%s8275_s25 + $0x10] sm:$0xff]  ;;  %4356 = vmatprep.subr.bf16.mxu0 %v5794_v56  ;;  %v5817_v53 = vpack.c.bf16 %v1253_v48, %v1251_v39 }
 0x44e   :  { %4322 = vmatpush3.bf16.msra.mxu1 %v4321_v1  ;;  %v1252_v1 = vld [vmem:[%s8275_s25 + $0x28] sm:$0xff]  ;;  %v5805_v57 = vpack.c.bf16 %v1249_v29, %v1247_v15 }
 0x44f   :  { %v5807_v8 = vpack.c.bf16 %v1254_v45, %v1252_v1 }
 0x450   :  { %4358 = vmatpush1.bf16.msra.mxu0 %v5805_v57 }
 0x451   :  { %1021 = vmatmul.mubr.f32.vlgmr.msra.gmra.mrb[4].mxu1 %v8271_v30  ;;  %4360 = vmatprep.subr.bf16.mxu0 %v5807_v8 }
 0x452   :  { %1159 = vmatprep.mubr.f32.mxu1 %v8271_v30 }
 0x454   :  { %4362 = vmatpush1.bf16.msra.mxu0 %v5817_v53 }
 0x524   :  { %v3441_v15 = vpop.f32.mrb[4].mxu1 }
 0x525   :  { %v3442_v45 = vpop.f32.mrb[5].mxu1 }
 0x526   :  { %v3443_v29 = vadd.f32 %v3442_v45, %v3441_v15 }
 0x528   :  { %v1026_v1 = vmul.f32 0.00390625, %v3443_v29 }
 0x52a   :  { %v5822_v42 = vrot.slane %v1026_v1, %v5197_v25  ;;  %v8278_v1 = vmax.f32 %v5673_v0, 0.0 }
 0x52c   :  { %v5827_v13 = vsub.f32 %v924_v51, %v5822_v42  ;;  %v5832_v39 = vsub.f32 %v925_v16, %v5822_v42  ;;  %v5837_v48 = vsub.f32 %v940_v9, %v5822_v42  ;;  %v5842_v15 = vsub.f32 %v941_v61, %v5822_v42 }
 0x52d   :  { %v5847_v14 = vsub.f32 %v942_v62, %v5822_v42  ;;  %v5852_v47 = vsub.f32 %v943_v46, %v5822_v42  ;;  %v5865_v61 = vsub.f32 %v926_v11, %v5822_v42  ;;  %v5870_v9 = vsub.f32 %v927_v2, %v5822_v42 }
 0x52e   :  { %v1063_v16 = vmul.f32 %v5827_v13, %v5827_v13  ;;  %v1064_v49 = vmul.f32 %v5832_v39, %v5832_v39  ;;  %v1079_v37 = vmul.f32 %v5837_v48, %v5837_v48  ;;  %v1080_v51 = vmul.f32 %v5842_v15, %v5842_v15 }
 0x52f   :  { %v5875_v55 = vsub.f32 %v944_v31, %v5822_v42  ;;  %v5880_v54 = vsub.f32 %v945_v63, %v5822_v42  ;;  %v1081_v35 = vmul.f32 %v5847_v14, %v5847_v14  ;;  %v1082_v11 = vmul.f32 %v5852_v47, %v5852_v47 }
 0x530   :  { %v5889_v17 = vsub.f32 %v928_v27, %v5822_v42  ;;  %v4323_v2 = vpack.c.bf16 %v1080_v51, %v1079_v37  ;;  %v4325_v46 = vpack.c.bf16 %v1064_v49, %v1063_v16  ;;  %v5894_v62 = vsub.f32 %v929_v24, %v5822_v42 }
 0x531   :  { %v5899_v40 = vsub.f32 %v946_v58, %v5822_v42  ;;  %v1065_v28 = vmul.f32 %v5865_v61, %v5865_v61  ;;  %v1066_v5 = vmul.f32 %v5870_v9, %v5870_v9  ;;  %v5908_v27 = vsub.f32 %v947_v20, %v5822_v42 }
 0x532   :  { %v1083_v34 = vmul.f32 %v5875_v55, %v5875_v55  ;;  %v1084_v24 = vmul.f32 %v5880_v54, %v5880_v54  ;;  %4324 = vmatprep.subr.bf16.mxu1 %v4323_v2  ;;  %v4327_v63 = vpack.c.bf16 %v1082_v11, %v1081_v35  ;;  %v5917_v31 = vsub.f32 %v930_v41, %v5822_v42 }
 0x533   :  { %4326 = vmatpush3.bf16.msra.mxu1 %v4325_v46  ;;  %v5922_v4 = vsub.f32 %v931_v7, %v5822_v42  ;;  %v5927_v3 = vsub.f32 %v948_v12, %v5822_v42  ;;  %v1067_v20 = vmul.f32 %v5889_v17, %v5889_v17  ;;  %v1068_v58 = vmul.f32 %v5894_v62, %v5894_v62 }
 0x534   :  { %4328 = vmatprep.subr.bf16.mxu1 %v4327_v63  ;;  %v4329_v52 = vpack.c.bf16 %v1066_v5, %v1065_v28  ;;  %v8276_v41 = vmax.f32 %v5684_v21, 0.0  ;;  %v1085_v36 = vmul.f32 %v5899_v40, %v5899_v40  ;;  %v1086_v7 = vmul.f32 %v5908_v27, %v5908_v27 }
 0x535   :  { %v4331_v50 = vpack.c.bf16 %v1084_v24, %v1083_v34  ;;  %v8277_v12 = vmax.f32 %v5676_v26, 0.0  ;;  %v5950_v16 = vsub.f32 %v8278_v1, %v5822_v42  ;;  %v8279_v21 = vmax.f32 %v5719_v60, 0.0 }
 0x536   :  { %v5936_v45 = vsub.f32 %v8276_v41, %v5822_v42  ;;  %v1069_v37 = vmul.f32 %v5917_v31, %v5917_v31  ;;  %v1070_v51 = vmul.f32 %v5922_v4, %v5922_v4  ;;  %v4333_v26 = vpack.c.bf16 %v1068_v58, %v1067_v20 }
 0x537   :  { %4330 = vmatpush3.bf16.msra.mxu1 %v4329_v52  ;;  %v5945_v29 = vsub.f32 %v8277_v12, %v5822_v42  ;;  %v5955_v49 = vsub.f32 %v8279_v21, %v5822_v42  ;;  %v8280_v35 = vmax.f32 %v5707_v10, 0.0  ;;  %v1087_v0 = vmul.f32 %v5927_v3, %v5927_v3 }
 0x538   :  { %4332 = vmatprep.subr.bf16.mxu1 %v4331_v50  ;;  %v1088_v60 = vmul.f32 %v5936_v45, %v5936_v45  ;;  %v4335_v2 = vpack.c.bf16 %v1086_v7, %v1085_v36  ;;  %v8281_v46 = vmax.f32 %v5688_v59, 0.0  ;;  %v8282_v5 = vmax.f32 %v5681_v44, 0.0 }
 0x539   :  { %v5964_v11 = vsub.f32 %v8280_v35, %v5822_v42  ;;  %v8283_v10 = vmax.f32 %v5744_v6, 0.0  ;;  %v1071_v63 = vmul.f32 %v5945_v29, %v5945_v29  ;;  %v1072_v20 = vmul.f32 %v5950_v16, %v5950_v16 }
 0x53a   :  { %v5973_v28 = vsub.f32 %v8281_v46, %v5822_v42  ;;  %v5978_v34 = vsub.f32 %v8282_v5, %v5822_v42  ;;  %v4337_v59 = vpack.c.bf16 %v1070_v51, %v1069_v37  ;;  %v8284_v58 = vmax.f32 %v5732_v43, 0.0 }
 0x53b   :  { %4334 = vmatpush3.bf16.msra.mxu1 %v4333_v26  ;;  %v5983_v24 = vsub.f32 %v8283_v10, %v5822_v42  ;;  %v1089_v44 = vmul.f32 %v5955_v49, %v5955_v49  ;;  %v1090_v6 = vmul.f32 %v5964_v11, %v5964_v11  ;;  %v4339_v41 = vpack.c.bf16 %v1088_v60, %v1087_v0 }
 0x53c   :  { %4336 = vmatprep.subr.bf16.mxu1 %v4335_v2  ;;  %v5992_v52 = vsub.f32 %v8284_v58, %v5822_v42  ;;  %v8285_v36 = vmax.f32 %v5727_v19, 0.0  ;;  %v8286_v50 = vmax.f32 %v5712_v38, 0.0  ;;  %v8287_v43 = vmax.f32 %v5765_v23, 0.0 }
 0x53d   :  { %v1073_v21 = vmul.f32 %v5973_v28, %v5973_v28  ;;  %v1074_v37 = vmul.f32 %v5978_v34, %v5978_v34  ;;  %v4341_v19 = vpack.c.bf16 %v1072_v20, %v1071_v63  ;;  %v8288_v51 = vmax.f32 %v5758_v33, 0.0 }
 0x53e   :  { %v6001_v7 = vsub.f32 %v8285_v36, %v5822_v42  ;;  %v6006_v12 = vsub.f32 %v8286_v50, %v5822_v42  ;;  %v6011_v1 = vsub.f32 %v8287_v43, %v5822_v42  ;;  %v1091_v38 = vmul.f32 %v5983_v24, %v5983_v24  ;;  %v1262_v50 = vld [vmem:[%s8275_s25 + $0x78] sm:$0xff] }
 0x53f   :  { %4338 = vmatpush3.bf16.msra.mxu1 %v4337_v59  ;;  %v6020_v26 = vsub.f32 %v8288_v51, %v5822_v42  ;;  %v1092_v23 = vmul.f32 %v5992_v52, %v5992_v52  ;;  %v4343_v35 = vpack.c.bf16 %v1090_v6, %v1089_v44  ;;  %v8289_v0 = vmax.f32 %v5753_v18, 0.0  ;;  %v1256_v6 = vld [vmem:[%s8275_s25 + $0x48] sm:$0xff] }
 0x540   :  { %4340 = vmatprep.subr.bf16.mxu1 %v4339_v41  ;;  %v8290_v2 = vmax.f32 %v5749_v22, 0.0  ;;  %v1075_v46 = vmul.f32 %v6001_v7, %v6001_v7  ;;  %v1076_v5 = vmul.f32 %v6006_v12, %v6006_v12  ;;  %v4345_v10 = vpack.c.bf16 %v1074_v37, %v1073_v21  ;;  %v1258_v41 = vld [vmem:[%s8275_s25 + $0x58] sm:$0xff]  ;;  %v1259_v21 = vld [vmem:[%s8275_s25 + $0x60] sm:$0xff]  ;;  %v1261_v37 = vld [vmem:[%s8275_s25 + $0x70] sm:$0xff] }
 0x541   :  { %v6029_v60 = vsub.f32 %v8289_v0, %v5822_v42  ;;  %v1093_v63 = vmul.f32 %v6011_v1, %v6011_v1  ;;  %v1094_v18 = vmul.f32 %v6020_v26, %v6020_v26  ;;  %v4347_v20 = vpack.c.bf16 %v1092_v23, %v1091_v38  ;;  %v1264_v51 = vld [vmem:[%s8275_s25 + $0x88] sm:$0xff]  ;;  %v1266_v38 = vld [vmem:[%s8275_s25 + $0x98] sm:$0xff]  ;;  %v1265_v0 = vld [vmem:[%s8275_s25 + $0x90] sm:$0xff] }
 0x542   :  { %v6034_v33 = vsub.f32 %v8290_v2, %v5822_v42  ;;  %v4349_v59 = vpack.c.bf16 %v1076_v5, %v1075_v46  ;;  %v4363_v36 = vpack.c.bf16 %v1258_v41, %v1256_v6  ;;  %v4371_v23 = vpack.c.bf16 %v1266_v38, %v1264_v51  ;;  %v1268_v46 = vld [vmem:[%s8275_s25 + $0xa8] sm:$0xff]  ;;  %v1270_v5 = vld [vmem:[%s8275_s25 + $0xb8] sm:$0xff] }
 0x543   :  { %4342 = vmatpush3.bf16.msra.mxu1 %v4341_v19  ;;  %v1077_v42 = vmul.f32 %v6029_v60, %v6029_v60  ;;  %v4351_v58 = vpack.c.bf16 %v1094_v18, %v1093_v63  ;;  %v4369_v19 = vpack.c.bf16 %v1261_v37, %v1259_v21  ;;  %v1267_v63 = vld [vmem:[%s8275_s25 + $0xa0] sm:$0xff]  ;;  %v1269_v18 = vld [vmem:[%s8275_s25 + $0xb0] sm:$0xff]  ;;  %v1276_v41 = vld [vmem:[%s8275_s25 + $0xe8] sm:$0xff] }
 0x544   :  { %4344 = vmatprep.subr.bf16.mxu1 %v4343_v35  ;;  %v1078_v22 = vmul.f32 %v6034_v33, %v6034_v33  ;;  %4364 = vmatprep.subr.bf16.mxu0 %v4363_v36  ;;  %v1263_v35 = vld [vmem:[%s8275_s25 + $0x80] sm:$0xff]  ;;  %v1805_v21 = vld [vmem:[%s8170_s12 + $0x8] sm:$0xff] }
 0x545   :  { %v4373_v2 = vpack.c.bf16 %v1265_v0, %v1263_v35  ;;  %v1166_v0 = vld [vmem:[%s8171_s8] sm:$0x1] }
 0x546   :  { %v4353_v44 = vpack.c.bf16 %v1078_v22, %v1077_v42  ;;  %v1272_v42 = vld [vmem:[%s8275_s25 + $0xc8] sm:$0xff]  ;;  %v1274_v22 = vld [vmem:[%s8275_s25 + $0xd8] sm:$0xff] }
 0x547   :  { %4346 = vmatpush3.bf16.msra.mxu1 %v4345_v10  ;;  %v4375_v10 = vpack.c.bf16 %v1270_v5, %v1268_v46 }
 0x548   :  { %4348 = vmatprep.subr.bf16.mxu1 %v4347_v20  ;;  %v4377_v20 = vpack.c.bf16 %v1269_v18, %v1267_v63  ;;  %v6144_v63 = vld [vmem:[%s8172_s9] ss:$0 sm:$0xff] }
 0x54b   :  { %4350 = vmatpush3.bf16.msra.mxu1 %v4349_v59  ;;  %v4379_v59 = vpack.c.bf16 %v1274_v22, %v1272_v42  ;;  %v1807_v42 = vld [vmem:[%s8170_s12 + $0x18] sm:$0xff] }
 0x54c   :  { %4352 = vmatprep.subr.bf16.mxu1 %v4351_v58  ;;  %v1271_v58 = vld [vmem:[%s8275_s25 + $0xc0] sm:$0xff] }
 0x54f   :  { %4354 = vmatpush3.bf16.msra.mxu1 %v4353_v44  ;;  %v1273_v44 = vld [vmem:[%s8275_s25 + $0xd0] sm:$0xff] }
 0x550   :  { %4611 = vmatprep.subr.bf16.mxu1 %v5794_v56  ;;  %v1255_v56 = vld [vmem:[%s8275_s25 + $0x40] sm:$0xff]  ;;  %v4381_v6 = vpack.c.bf16 %v1273_v44, %v1271_v58 }
 0x552   :  { %1160 = vmatmul.mubr.f32.vlgmr.msra.gmra.mrb[6].mxu1 %v8271_v30 }
 0x553   :  { %4619 = vmatpush1.bf16.msra.mxu1 %v5805_v57  ;;  %v1257_v57 = vld [vmem:[%s8275_s25 + $0x50] sm:$0xff] }
 0x554   :  { %4612 = vmatprep.subr.bf16.mxu1 %v5807_v8  ;;  %v4365_v8 = vpack.c.bf16 %v1257_v57, %v1255_v56  ;;  %v1275_v57 = vld [vmem:[%s8275_s25 + $0xe0] sm:$0xff] }
 0x556   :  { %4366 = vmatpush1.bf16.msra.mxu0 %v4365_v8 }
 0x557   :  { %4620 = vmatpush1.bf16.msra.mxu1 %v5817_v53  ;;  %v1260_v53 = vld [vmem:[%s8275_s25 + $0x68] sm:$0xff] }
 0x558   :  { %4613 = vmatprep.subr.bf16.mxu1 %v4363_v36  ;;  %v4367_v43 = vpack.c.bf16 %v1262_v50, %v1260_v53  ;;  %v1278_v36 = vld [vmem:[%s8275_s25 + $0xf8] sm:$0xff]  ;;  %v4702_v50 = vmov 0.0  }
 0x559   :  { %v4383_v56 = vpack.c.bf16 %v1278_v36, %v1276_v41  ;;  %1355 = vmatprep.mubr.f32.mxu0 %v4702_v50  ;;  %1481 = vmatprep.mubr.f32.mxu1 %v4702_v50 }
 0x55a   :  { %4368 = vmatprep.subr.bf16.mxu0 %v4367_v43 }
 0x55b   :  { %4621 = vmatpush1.bf16.msra.mxu1 %v4365_v8  ;;  %4370 = vmatpush1.bf16.msra.mxu0 %v4369_v19  ;;  %v1277_v8 = vld [vmem:[%s8275_s25 + $0xf0] sm:$0xff] }
 0x55c   :  { %4614 = vmatprep.subr.bf16.mxu1 %v4367_v43  ;;  %4372 = vmatprep.subr.bf16.mxu0 %v4371_v23  ;;  %v4385_v53 = vpack.c.bf16 %v1277_v8, %v1275_v57  ;;  %v1804_v43 = vld [vmem:[%s8170_s12] sm:$0xff] }
 0x55d   :  { %v4387_v37 = vpack.c.bf16 %v1805_v21, %v1804_v43 }
 0x55f   :  { %4622 = vmatpush1.bf16.msra.mxu1 %v4369_v19  ;;  %4374 = vmatpush1.bf16.msra.mxu0 %v4373_v2 }
 0x560   :  { %4615 = vmatprep.subr.bf16.mxu1 %v4371_v23  ;;  %4376 = vmatprep.subr.bf16.mxu0 %v4375_v10 }
 0x563   :  { %4623 = vmatpush1.bf16.msra.mxu1 %v4373_v2  ;;  %4378 = vmatpush1.bf16.msra.mxu0 %v4377_v20 }
 0x564   :  { %4616 = vmatprep.subr.bf16.mxu1 %v4375_v10  ;;  %4380 = vmatprep.subr.bf16.mxu0 %v4379_v59 }
 0x567   :  { %4624 = vmatpush1.bf16.msra.mxu1 %v4377_v20  ;;  %4382 = vmatpush1.bf16.msra.mxu0 %v4381_v6  ;;  %v1806_v20 = vld [vmem:[%s8170_s12 + $0x10] sm:$0xff] }
 0x568   :  { %4617 = vmatprep.subr.bf16.mxu1 %v4379_v59  ;;  %4384 = vmatprep.subr.bf16.mxu0 %v4383_v56  ;;  %v4391_v44 = vpack.c.bf16 %v1807_v42, %v1806_v20 }
 0x56b   :  { %4625 = vmatpush1.bf16.msra.mxu1 %v4381_v6  ;;  %4386 = vmatpush1.bf16.msra.mxu0 %v4385_v53 }
 0x56c   :  { %4618 = vmatprep.subr.bf16.mxu1 %v4383_v56 }
 0x56f   :  { %4626 = vmatpush1.bf16.msra.mxu1 %v4385_v53 }
 0x570   :  { %4388 = vmatprep.subr.bf16.mxu1 %v4387_v37 }
 0x625   :  { %v3476_v19 = vpop.f32.mrb[6].mxu1 }
 0x626   :  { %v3477_v51 = vpop.f32.mrb[7].mxu1 }
 0x627   :  { %v3478_v38 = vadd.f32 %v3477_v51, %v3476_v19 }
 0x629   :  { %v1165_v23 = vmul.f32 0.00390625, %v3478_v38 }
 0x62b   :  { %v1167_v35 = vadd.f32 1e-05, %v1165_v23 }
 0x62d   :  { %4631 = vrsqrt.f32 %v1167_v35 }
 0x637   :  { %v4632_v2 = vpop.eup %4631 }
 0x638   :  { %v1169_v46 = vmul.f32 %v4632_v2, %v1166_v0 }
 0x63a   :  { %v6137_v5 = vrot.slane %v1169_v46, %v5197_v25 }
 0x63c   :  { %v1176_v10 = vmul.f32 %v6137_v5, %v5827_v13  ;;  %v1197_v18 = vmul.f32 %v6137_v5, %v5880_v54  ;;  %v1177_v22 = vmul.f32 %v6137_v5, %v5832_v39  ;;  %v1198_v13 = vmul.f32 %v6137_v5, %v5899_v40 }
 0x63d   :  { %v1178_v54 = vmul.f32 %v6137_v5, %v5865_v61  ;;  %v1192_v6 = vmul.f32 %v6137_v5, %v5837_v48  ;;  %v1193_v41 = vmul.f32 %v6137_v5, %v5842_v15  ;;  %v1194_v39 = vmul.f32 %v6137_v5, %v5847_v14 }
 0x63e   :  { %v1215_v59 = vadd.f32 %v6144_v63, %v1176_v10  ;;  %v1236_v58 = vadd.f32 %v6144_v63, %v1197_v18  ;;  %v1199_v40 = vmul.f32 %v6137_v5, %v5908_v27  ;;  %v1195_v61 = vmul.f32 %v6137_v5, %v5852_v47 }
 0x63f   :  { %v1196_v48 = vmul.f32 %v6137_v5, %v5875_v55  ;;  %v1216_v36 = vadd.f32 %v6144_v63, %v1177_v22  ;;  %v1237_v15 = vadd.f32 %v6144_v63, %v1198_v13  ;;  %v1179_v14 = vmul.f32 %v6137_v5, %v5870_v9 }
 0x640   :  { %1356 = vmatmul.mubr.f32.vlgmr.msra.gmra.mrb[64].mxu0 %v1215_v59  ;;  %1482 = vmatmul.mubr.f32.vlgmr.msra.gmra.mrb[8].mxu1 %v1236_v58  ;;  %v1200_v27 = vmul.f32 %v6137_v5, %v5927_v3  ;;  %v1217_v47 = vadd.f32 %v6144_v63, %v1178_v54  ;;  %v1238_v55 = vadd.f32 %v6144_v63, %v1199_v40  ;;  %v1813_v40 = vld [vmem:[%s8170_s12 + $0x48] sm:$0xff] }
 0x641   :  { %1361 = vmatprep.mubr.f32.mxu0 %v4702_v50  ;;  %1487 = vmatprep.mubr.f32.mxu1 %v4702_v50  ;;  %v6187_v56 = vadd.f32 %v6144_v63, %v1192_v6  ;;  %v6190_v57 = vadd.f32 %v6144_v63, %v1193_v41  ;;  %v6193_v9 = vadd.f32 %v6144_v63, %v1194_v39  ;;  %v1812_v39 = vld [vmem:[%s8170_s12 + $0x40] sm:$0xff] }
 0x642   :  { %4390 = vmatpush3.bf16.msra.mxu1 %v4387_v37  ;;  %v6196_v3 = vadd.f32 %v6144_v63, %v1195_v61  ;;  %v6199_v8 = vadd.f32 %v6144_v63, %v1196_v48  ;;  %v1180_v53 = vmul.f32 %v6137_v5, %v5889_v17  ;;  %v1201_v43 = vmul.f32 %v6137_v5, %v5936_v45  ;;  %v1814_v48 = vld [vmem:[%s8170_s12 + $0x50] sm:$0xff] }
 0x643   :  { %4392 = vmatprep.subr.bf16.mxu1 %v4391_v44  ;;  %v1218_v21 = vadd.f32 %v6144_v63, %v1179_v14  ;;  %v1239_v37 = vadd.f32 %v6144_v63, %v1200_v27  ;;  %v1181_v19 = vmul.f32 %v6137_v5, %v5894_v62  ;;  %v1202_v51 = vmul.f32 %v6137_v5, %v5955_v49  ;;  %v1816_v14 = vld [vmem:[%s8170_s12 + $0x60] sm:$0xff]  ;;  %v1817_v27 = vld [vmem:[%s8170_s12 + $0x68] sm:$0xff] }
 0x644   :  { %1362 = vmatmul.mubr.f32.gmra.mrb[66].mxu0 %v1216_v36  ;;  %1488 = vmatmul.mubr.f32.gmra.mrb[10].mxu1 %v1237_v15  ;;  %v1219_v17 = vadd.f32 %v6144_v63, %v1180_v53  ;;  %v1240_v45 = vadd.f32 %v6144_v63, %v1201_v43  ;;  %v1182_v38 = vmul.f32 %v6137_v5, %v5917_v31  ;;  %v1815_v36 = vld [vmem:[%s8170_s12 + $0x58] sm:$0xff] }
 0x645   :  { %1367 = vmatprep.mubr.f32.mxu0 %v4702_v50  ;;  %1493 = vmatprep.mubr.f32.mxu1 %v4702_v50  ;;  %v1203_v23 = vmul.f32 %v6137_v5, %v5964_v11  ;;  %v1220_v62 = vadd.f32 %v6144_v63, %v1181_v19  ;;  %v1241_v49 = vadd.f32 %v6144_v63, %v1202_v51 }
 0x646   :  { %4394 = vmatpush3.bf16.msra.mxu1 %v4391_v44  ;;  %v1183_v35 = vmul.f32 %v6137_v5, %v5922_v4  ;;  %v1204_v0 = vmul.f32 %v6137_v5, %v5983_v24  ;;  %v1221_v31 = vadd.f32 %v6144_v63, %v1182_v38  ;;  %v1184_v2 = vmul.f32 %v6137_v5, %v5945_v29 }
 0x647   :  { %v1242_v11 = vadd.f32 %v6144_v63, %v1203_v23  ;;  %v1205_v46 = vmul.f32 %v6137_v5, %v5992_v52  ;;  %v1185_v10 = vmul.f32 %v6137_v5, %v5950_v16  ;;  %v1206_v18 = vmul.f32 %v6137_v5, %v6011_v1 }
 0x648   :  { %1368 = vmatmul.mubr.f32.gmra.mrb[68].mxu0 %v1217_v47  ;;  %1494 = vmatmul.mubr.f32.gmra.mrb[12].mxu1 %v1238_v55  ;;  %v1222_v4 = vadd.f32 %v6144_v63, %v1183_v35  ;;  %v1243_v24 = vadd.f32 %v6144_v63, %v1204_v0  ;;  %v1223_v29 = vadd.f32 %v6144_v63, %v1184_v2  ;;  %v1818_v55 = vld [vmem:[%s8170_s12 + $0x70] sm:$0xff] }
 0x649   :  { %1373 = vmatprep.mubr.f32.mxu0 %v4702_v50  ;;  %1499 = vmatprep.mubr.f32.mxu1 %v4702_v50  ;;  %v1244_v52 = vadd.f32 %v6144_v63, %v1205_v46  ;;  %v1186_v20 = vmul.f32 %v6137_v5, %v5973_v28  ;;  %v1207_v42 = vmul.f32 %v6137_v5, %v6020_v26 }
 0x64a   :  { %v1224_v16 = vadd.f32 %v6144_v63, %v1185_v10  ;;  %v1245_v1 = vadd.f32 %v6144_v63, %v1206_v18  ;;  %v1187_v22 = vmul.f32 %v6137_v5, %v5978_v34  ;;  %v1188_v26 = vmul.f32 %v6137_v5, %v6001_v7 }
 0x64b   :  { %v1225_v13 = vadd.f32 %v6144_v63, %v1186_v20  ;;  %v1246_v28 = vadd.f32 %v6144_v63, %v1207_v42  ;;  %v1189_v58 = vmul.f32 %v6137_v5, %v6006_v12  ;;  %v1190_v44 = vmul.f32 %v6137_v5, %v6029_v60  ;;  %v1808_v60 = vld [vmem:[%s8170_s12 + $0x20] sm:$0xff] }
 0x64c   :  { %1374 = vmatmul.mubr.f32.gmra.mrb[70].mxu0 %v1218_v21  ;;  %1500 = vmatmul.mubr.f32.gmra.mrb[14].mxu1 %v1239_v37  ;;  %v1226_v59 = vadd.f32 %v6144_v63, %v1187_v22  ;;  %v1227_v34 = vadd.f32 %v6144_v63, %v1188_v26  ;;  %v1191_v7 = vmul.f32 %v6137_v5, %v6034_v33  ;;  %v1809_v33 = vld [vmem:[%s8170_s12 + $0x28] sm:$0xff] }
 0x64d   :  { %1379 = vmatprep.mubr.f32.mxu0 %v4702_v50  ;;  %1505 = vmatprep.mubr.f32.mxu1 %v4702_v50  ;;  %v1228_v54 = vadd.f32 %v6144_v63, %v1189_v58  ;;  %v1229_v6 = vadd.f32 %v6144_v63, %v1190_v44  ;;  %v4395_v5 = vpack.c.bf16 %v1809_v33, %v1808_v60 }
 0x64e   :  { %v1230_v12 = vadd.f32 %v6144_v63, %v1191_v7  ;;  %v1810_v63 = vld [vmem:[%s8170_s12 + $0x30] sm:$0xff]  ;;  %v4403_v61 = vpack.c.bf16 %v1813_v40, %v1812_v39  ;;  %v4407_v15 = vpack.c.bf16 %v1815_v36, %v1814_v48  ;;  %v4411_v47 = vpack.c.bf16 %v1817_v27, %v1816_v14  ;;  %v1633_v27 = vld [vmem:[%s8175_s1 + $0xa8] sm:$0xff] }
 0x64f   :  { %4396 = vmatprep.subr.bf16.mxu1 %v4395_v5 }
 0x650   :  { %1380 = vmatmul.mubr.f32.gmra.mrb[72].mxu0 %v1219_v17  ;;  %1506 = vmatmul.mubr.f32.gmra.mrb[16].mxu1 %v1240_v45 }
 0x651   :  { %1385 = vmatprep.mubr.f32.mxu0 %v4702_v50  ;;  %1511 = vmatprep.mubr.f32.mxu1 %v4702_v50 }
 0x652   :  { %4398 = vmatpush3.bf16.msra.mxu1 %v4395_v5 }
 0x654   :  { %1386 = vmatmul.mubr.f32.gmra.mrb[74].mxu0 %v1220_v62  ;;  %1512 = vmatmul.mubr.f32.gmra.mrb[18].mxu1 %v1241_v49 }
 0x655   :  { %1391 = vmatprep.mubr.f32.mxu0 %v4702_v50  ;;  %1517 = vmatprep.mubr.f32.mxu1 %v4702_v50 }
 0x658   :  { %1392 = vmatmul.mubr.f32.gmra.mrb[76].mxu0 %v1221_v31  ;;  %1518 = vmatmul.mubr.f32.gmra.mrb[20].mxu1 %v1242_v11 }
 0x659   :  { %1397 = vmatprep.mubr.f32.mxu0 %v4702_v50  ;;  %1523 = vmatprep.mubr.f32.mxu1 %v4702_v50 }
 0x65c   :  { %1398 = vmatmul.mubr.f32.gmra.mrb[78].mxu0 %v1222_v4  ;;  %1524 = vmatmul.mubr.f32.gmra.mrb[22].mxu1 %v1243_v24 }
 0x65d   :  { %1403 = vmatprep.mubr.f32.mxu0 %v4702_v50  ;;  %1529 = vmatprep.mubr.f32.mxu1 %v4702_v50 }
 0x660   :  { %1404 = vmatmul.mubr.f32.gmra.mrb[80].mxu0 %v1223_v29  ;;  %1530 = vmatmul.mubr.f32.gmra.mrb[24].mxu1 %v1244_v52 }
 0x661   :  { %1409 = vmatprep.mubr.f32.mxu0 %v4702_v50  ;;  %1535 = vmatprep.mubr.f32.mxu1 %v4702_v50 }
 0x664   :  { %1410 = vmatmul.mubr.f32.gmra.mrb[82].mxu0 %v1224_v16  ;;  %1536 = vmatmul.mubr.f32.gmra.mrb[26].mxu1 %v1245_v1 }
 0x665   :  { %1415 = vmatprep.mubr.f32.mxu0 %v4702_v50  ;;  %1541 = vmatprep.mubr.f32.mxu1 %v4702_v50 }
 0x668   :  { %1416 = vmatmul.mubr.f32.gmra.mrb[84].mxu0 %v1225_v13  ;;  %1542 = vmatmul.mubr.f32.gmra.mrb[28].mxu1 %v1246_v28 }
 0x669   :  { %1421 = vmatprep.mubr.f32.mxu0 %v4702_v50 }
 0x66c   :  { %1422 = vmatmul.mubr.f32.gmra.mrb[86].mxu0 %v1226_v59 }
 0x66d   :  { %1427 = vmatprep.mubr.f32.mxu0 %v4702_v50 }
 0x670   :  { %1428 = vmatmul.mubr.f32.gmra.mrb[88].mxu0 %v1227_v34 }
 0x671   :  { %1433 = vmatprep.mubr.f32.mxu0 %v4702_v50 }
 0x674   :  { %1434 = vmatmul.mubr.f32.gmra.mrb[90].mxu0 %v1228_v54 }
 0x675   :  { %1439 = vmatprep.mubr.f32.mxu0 %v4702_v50 }
 0x678   :  { %1440 = vmatmul.mubr.f32.gmra.mrb[92].mxu0 %v1229_v6 }
 0x679   :  { %1445 = vmatprep.mubr.f32.mxu0 %v4702_v50 }
 0x67c   :  { %1446 = vmatmul.mubr.f32.gmra.mrb[94].mxu0 %v1230_v12 }
 0x67d   :  { %1451 = vmatprep.mubr.f32.mxu0 %v4702_v50 }
 0x680   :  { %1452 = vmatmul.mubr.f32.gmra.mrb[96].mxu0 %v6187_v56  ;;  %v1819_v56 = vld [vmem:[%s8170_s12 + $0x78] sm:$0xff] }
 0x681   :  { %1457 = vmatprep.mubr.f32.mxu0 %v4702_v50 }
 0x684   :  { %1458 = vmatmul.mubr.f32.gmra.mrb[98].mxu0 %v6190_v57  ;;  %v4415_v57 = vpack.c.bf16 %v1819_v56, %v1818_v55 }
 0x685   :  { %1463 = vmatprep.mubr.f32.mxu0 %v4702_v50 }
 0x688   :  { %1464 = vmatmul.mubr.f32.gmra.mrb[100].mxu0 %v6193_v9  ;;  %v1279_v9 = vld [vmem:[%s8173_s11] sm:$0x3] }
 0x689   :  { %1469 = vmatprep.mubr.f32.mxu0 %v4702_v50 }
 0x68c   :  { %1470 = vmatmul.mubr.f32.gmra.mrb[102].mxu0 %v6196_v3  ;;  %v1287_v3 = vsub.s32 1, %v5194_v32 }
 0x68d   :  { %1475 = vmatprep.mubr.f32.mxu0 %v4702_v50  ;;  %v1811_v50 = vld [vmem:[%s8170_s12 + $0x38] sm:$0xff] }
 0x68e   :  { %v4399_v41 = vpack.c.bf16 %v1811_v50, %v1810_v63  ;;  %v6334_v53 = vrot.slane %v1279_v9, %v1287_v3 }
 0x690   :  { %1476 = vmatmul.mubr.f32.gmra.mrb[104].mxu0 %v6199_v8  ;;  %4400 = vmatprep.subr.bf16.mxu1 %v4399_v41  ;;  %v6332_v8 = vrot.slane %v1279_v9, %v5197_v25 }
 0x691   :  { %4402 = vmatpush3.bf16.msra.mxu1 %v4399_v41 }
 0x692   :  { %4404 = vmatprep.subr.bf16.mxu1 %v4403_v61 }
 0x695   :  { %4406 = vmatpush3.bf16.msra.mxu1 %v4403_v61  ;;  %v1612_v61 = vld [vmem:[%s8175_s1] sm:$0xff] }
 0x696   :  { %4408 = vmatprep.subr.bf16.mxu1 %v4407_v15 }
 0x699   :  { %4410 = vmatpush3.bf16.msra.mxu1 %v4407_v15 }
 0x69a   :  { %4412 = vmatprep.subr.bf16.mxu1 %v4411_v47 }
 0x69d   :  { %4414 = vmatpush3.bf16.msra.mxu1 %v4411_v47 }
 0x69e   :  { %4416 = vmatprep.subr.bf16.mxu1 %v4415_v57 }
 0x6a1   :  { %4418 = vmatpush3.bf16.msra.mxu1 %v4415_v57 }
 0x713   :  { %v1357_v43 = vpop.f32.mrb[64].mxu0  ;;  %v1483_v21 = vpop.f32.mrb[8].mxu1 }
 0x714   :  { %v6337_v37 = vadd.f32 %v1357_v43, %v6332_v8  ;;  %v6340_v19 = vadd.f32 %v1483_v21, %v6332_v8  ;;  %v1359_v51 = vpop.f32.mrb[65].mxu0  ;;  %v1485_v17 = vpop.f32.mrb[9].mxu1 }
 0x715   :  { %v1360_v45 = vadd.f32 %v1359_v51, %v6334_v53  ;;  %v1486_v38 = vadd.f32 %v1485_v17, %v6334_v53 }
 0x716   :  { %1548 = vst [vmem:[%s8174_s23] sm:$0xff] %v6337_v37  ;;  %1590 = vst [vmem:[%s8174_s23 + $0x150] sm:$0xff] %v6340_v19 }
 0x717   :  { %1549 = vst [vmem:[%s8174_s23 + $0x8] sm:$0xff] %v1360_v45  ;;  %v1644_v32 = vmul.f32 0.5, %v1360_v45  ;;  %1591 = vst [vmem:[%s8174_s23 + $0x158] sm:$0xff] %v1486_v38  ;;  %v1665_v23 = vmul.f32 0.5, %v1486_v38  ;;  %v1363_v62 = vpop.f32.mrb[66].mxu0  ;;  %v1489_v49 = vpop.f32.mrb[10].mxu1 }
 0x718   :  { %v6359_v35 = vadd.f32 %v1363_v62, %v6332_v8  ;;  %v6362_v0 = vadd.f32 %v1489_v49, %v6332_v8  ;;  %v1365_v31 = vpop.f32.mrb[67].mxu0  ;;  %v1491_v11 = vpop.f32.mrb[11].mxu1  ;;  %v1613_v38 = vld [vmem:[%s8175_s1 + $0x8] sm:$0xff] }
 0x719   :  { %v1676_v2 = vmul.f32 1.442695, %v1644_v32  ;;  %v1718_v46 = vmul.f32 1.442695, %v1665_v23  ;;  %v1366_v4 = vadd.f32 %v1365_v31, %v6334_v53  ;;  %v1492_v24 = vadd.f32 %v1491_v11, %v6334_v53 }
 0x71a   :  { %1550 = vst [vmem:[%s8174_s23 + $0x10] sm:$0xff] %v6359_v35  ;;  %1592 = vst [vmem:[%s8174_s23 + $0x160] sm:$0xff] %v6362_v0 }
 0x71b   :  { %4633 = vpow2.f32 %v1676_v2  ;;  %1551 = vst [vmem:[%s8174_s23 + $0x18] sm:$0xff] %v1366_v4  ;;  %v1645_v10 = vmul.f32 0.5, %v1366_v4  ;;  %1593 = vst [vmem:[%s8174_s23 + $0x168] sm:$0xff] %v1492_v24  ;;  %v1666_v18 = vmul.f32 0.5, %v1492_v24  ;;  %v1369_v29 = vpop.f32.mrb[68].mxu0  ;;  %v1495_v52 = vpop.f32.mrb[12].mxu1 }
 0x71c   :  { %4635 = vpow2.f32 %v1718_v46  ;;  %v6381_v20 = vadd.f32 %v1369_v29, %v6332_v8  ;;  %v6384_v42 = vadd.f32 %v1495_v52, %v6332_v8  ;;  %v1371_v16 = vpop.f32.mrb[69].mxu0  ;;  %v1497_v1 = vpop.f32.mrb[13].mxu1  ;;  %v1634_v2 = vld [vmem:[%s8175_s1 + $0xb0] sm:$0xff] }
 0x71d   :  { %v1678_v22 = vmul.f32 1.442695, %v1645_v10  ;;  %v1720_v13 = vmul.f32 1.442695, %v1666_v18  ;;  %v1372_v28 = vadd.f32 %v1371_v16, %v6334_v53  ;;  %v1498_v26 = vadd.f32 %v1497_v1, %v6334_v53 }
 0x71e   :  { %1552 = vst [vmem:[%s8174_s23 + $0x20] sm:$0xff] %v6381_v20  ;;  %1594 = vst [vmem:[%s8174_s23 + $0x170] sm:$0xff] %v6384_v42 }
 0x71f   :  { %4637 = vpow2.f32 %v1678_v22  ;;  %1553 = vst [vmem:[%s8174_s23 + $0x28] sm:$0xff] %v1372_v28  ;;  %v1646_v59 = vmul.f32 0.5, %v1372_v28  ;;  %1595 = vst [vmem:[%s8174_s23 + $0x178] sm:$0xff] %v1498_v26  ;;  %v1667_v58 = vmul.f32 0.5, %v1498_v26  ;;  %v1375_v34 = vpop.f32.mrb[70].mxu0  ;;  %v1501_v44 = vpop.f32.mrb[14].mxu1 }
 0x720   :  { %4639 = vpow2.f32 %v1720_v13  ;;  %v6403_v54 = vadd.f32 %v1375_v34, %v6332_v8  ;;  %v6406_v7 = vadd.f32 %v1501_v44, %v6332_v8  ;;  %v1377_v6 = vpop.f32.mrb[71].mxu0  ;;  %v1503_v12 = vpop.f32.mrb[15].mxu1  ;;  %v1614_v28 = vld [vmem:[%s8175_s1 + $0x10] sm:$0xff] }
 0x721   :  { %v1680_v60 = vmul.f32 1.442695, %v1646_v59  ;;  %v1722_v33 = vmul.f32 1.442695, %v1667_v58  ;;  %v1378_v5 = vadd.f32 %v1377_v6, %v6334_v53  ;;  %v1504_v63 = vadd.f32 %v1503_v12, %v6334_v53  ;;  %v1635_v6 = vld [vmem:[%s8175_s1 + $0xb8] sm:$0xff] }
 0x722   :  { %1554 = vst [vmem:[%s8174_s23 + $0x30] sm:$0xff] %v6403_v54  ;;  %1596 = vst [vmem:[%s8174_s23 + $0x180] sm:$0xff] %v6406_v7 }
 0x723   :  { %4641 = vpow2.f32 %v1680_v60  ;;  %1555 = vst [vmem:[%s8174_s23 + $0x38] sm:$0xff] %v1378_v5  ;;  %v1647_v50 = vmul.f32 0.5, %v1378_v5  ;;  %1597 = vst [vmem:[%s8174_s23 + $0x188] sm:$0xff] %v1504_v63  ;;  %v1668_v41 = vmul.f32 0.5, %v1504_v63  ;;  %v1381_v39 = vpop.f32.mrb[72].mxu0  ;;  %v1507_v40 = vpop.f32.mrb[16].mxu1 }
 0x724   :  { %4643 = vpow2.f32 %v1722_v33  ;;  %v6428_v48 = vadd.f32 %v1381_v39, %v6332_v8  ;;  %v6431_v36 = vadd.f32 %v1507_v40, %v6332_v8  ;;  %v1383_v15 = vpop.f32.mrb[73].mxu0  ;;  %v1509_v14 = vpop.f32.mrb[17].mxu1 }
 0x725   :  { %v4634_v47 = vpop.eup %4633  ;;  %v1682_v55 = vmul.f32 1.442695, %v1647_v50  ;;  %v1724_v56 = vmul.f32 1.442695, %v1668_v41  ;;  %v1384_v57 = vadd.f32 %v1383_v15, %v6334_v53  ;;  %v1510_v9 = vadd.f32 %v1509_v14, %v6334_v53  ;;  %v1615_v14 = vld [vmem:[%s8175_s1 + $0x18] sm:$0xff] }
 0x726   :  { %v4636_v3 = vpop.eup %4635  ;;  %1556 = vst [vmem:[%s8174_s23 + $0x40] sm:$0xff] %v6428_v48  ;;  %1598 = vst [vmem:[%s8174_s23 + $0x190] sm:$0xff] %v6431_v36  ;;  %v1740_v43 = vmul.f32 %v4634_v47, %v1612_v61 }
 0x727   :  { %4645 = vpow2.f32 %v1682_v55  ;;  %1557 = vst [vmem:[%s8174_s23 + $0x48] sm:$0xff] %v1384_v57  ;;  %v1648_v21 = vmul.f32 0.5, %v1384_v57  ;;  %1599 = vst [vmem:[%s8174_s23 + $0x198] sm:$0xff] %v1510_v9  ;;  %v1669_v51 = vmul.f32 0.5, %v1510_v9  ;;  %v1387_v17 = vpop.f32.mrb[74].mxu0  ;;  %v1513_v45 = vpop.f32.mrb[18].mxu1  ;;  %v1761_v32 = vmul.f32 %v4636_v3, %v1633_v27 }
 0x728   :  { %4647 = vpow2.f32 %v1724_v56  ;;  %v6456_v23 = vadd.f32 %v1387_v17, %v6332_v8  ;;  %v6459_v62 = vadd.f32 %v1513_v45, %v6332_v8  ;;  %v1389_v49 = vpop.f32.mrb[75].mxu0  ;;  %v1515_v31 = vpop.f32.mrb[19].mxu1  ;;  %v1772_v11 = vadd.f32 %v1740_v43, %v6337_v37  ;;  %v1636_v9 = vld [vmem:[%s8175_s1 + $0xc0] sm:$0xff] }
 0x729   :  { %v4638_v46 = vpop.eup %4637  ;;  %v1684_v4 = vmul.f32 1.442695, %v1648_v21  ;;  %v1726_v24 = vmul.f32 1.442695, %v1669_v51  ;;  %v1390_v10 = vadd.f32 %v1389_v49, %v6334_v53  ;;  %v1516_v18 = vadd.f32 %v1515_v31, %v6334_v53 }
 0x72a   :  { %v4640_v29 = vpop.eup %4639  ;;  %1558 = vst [vmem:[%s8174_s23 + $0x50] sm:$0xff] %v6456_v23  ;;  %1600 = vst [vmem:[%s8174_s23 + $0x1a0] sm:$0xff] %v6459_v62  ;;  %3955 = vmatprep.mubr.f32.mxu1 %v1772_v11  ;;  %v1741_v37 = vmul.f32 %v4638_v46, %v1613_v38  ;;  %v6476_v52 = vadd.f32 %v1761_v32, %v6340_v19 }
 0x72b   :  { %4649 = vpow2.f32 %v1684_v4  ;;  %1559 = vst [vmem:[%s8174_s23 + $0x58] sm:$0xff] %v1390_v10  ;;  %v1649_v16 = vmul.f32 0.5, %v1390_v10  ;;  %1601 = vst [vmem:[%s8174_s23 + $0x1a8] sm:$0xff] %v1516_v18  ;;  %v1670_v1 = vmul.f32 0.5, %v1516_v18  ;;  %v1393_v22 = vpop.f32.mrb[76].mxu0  ;;  %v1519_v13 = vpop.f32.mrb[20].mxu1  ;;  %v1762_v26 = vmul.f32 %v4640_v29, %v1634_v2 }
 0x72c   :  { %4651 = vpow2.f32 %v1726_v24  ;;  %v6488_v19 = vadd.f32 %v1393_v22, %v6332_v8  ;;  %v6491_v59 = vadd.f32 %v1519_v13, %v6332_v8  ;;  %v1395_v58 = vpop.f32.mrb[77].mxu0  ;;  %v1521_v34 = vpop.f32.mrb[21].mxu1  ;;  %v1773_v44 = vadd.f32 %v1741_v37, %v6359_v35  ;;  %v1616_v2 = vld [vmem:[%s8175_s1 + $0x20] sm:$0xff]  ;;  %v1637_v29 = vld [vmem:[%s8175_s1 + $0xc8] sm:$0xff] }
 0x72d   :  { %v4642_v12 = vpop.eup %4641  ;;  %v1686_v60 = vmul.f32 1.442695, %v1649_v16  ;;  %v1728_v33 = vmul.f32 1.442695, %v1670_v1  ;;  %v1396_v5 = vadd.f32 %v1395_v58, %v6334_v53  ;;  %v1522_v63 = vadd.f32 %v1521_v34, %v6334_v53 }
 0x72e   :  { %v4644_v50 = vpop.eup %4643  ;;  %1560 = vst [vmem:[%s8174_s23 + $0x60] sm:$0xff] %v6488_v19  ;;  %1602 = vst [vmem:[%s8174_s23 + $0x1b0] sm:$0xff] %v6491_v59  ;;  %3956 = vmatmul.mubr.f32.vlgmr.msra.gmra.mrb[30].mxu1 %v1773_v44  ;;  %v1742_v35 = vmul.f32 %v4642_v12, %v1614_v28  ;;  %v6508_v41 = vadd.f32 %v1762_v26, %v6362_v0  ;;  %v1617_v12 = vld [vmem:[%s8175_s1 + $0x28] sm:$0xff] }
 0x72f   :  { %4653 = vpow2.f32 %v1686_v60  ;;  %1561 = vst [vmem:[%s8174_s23 + $0x68] sm:$0xff] %v1396_v5  ;;  %v1650_v39 = vmul.f32 0.5, %v1396_v5  ;;  %1603 = vst [vmem:[%s8174_s23 + $0x1b8] sm:$0xff] %v1522_v63  ;;  %v1671_v40 = vmul.f32 0.5, %v1522_v63  ;;  %v1399_v61 = vpop.f32.mrb[78].mxu0  ;;  %v1525_v15 = vpop.f32.mrb[22].mxu1  ;;  %v1763_v27 = vmul.f32 %v4644_v50, %v1635_v6 }
 0x730   :  { %4655 = vpow2.f32 %v1728_v33  ;;  %v6520_v0 = vadd.f32 %v1399_v61, %v6332_v8  ;;  %v6523_v47 = vadd.f32 %v1525_v15, %v6332_v8  ;;  %v1401_v55 = vpop.f32.mrb[79].mxu0  ;;  %v1527_v56 = vpop.f32.mrb[23].mxu1  ;;  %v1774_v57 = vadd.f32 %v1742_v35, %v6381_v20  ;;  %v1638_v35 = vld [vmem:[%s8175_s1 + $0xd0] sm:$0xff] }
 0x731   :  { %v4646_v3 = vpop.eup %4645  ;;  %v1688_v43 = vmul.f32 1.442695, %v1650_v39  ;;  %v1730_v21 = vmul.f32 1.442695, %v1671_v40  ;;  %v1402_v51 = vadd.f32 %v1401_v55, %v6334_v53  ;;  %v1528_v17 = vadd.f32 %v1527_v56, %v6334_v53 }
 0x732   :  { %v4648_v45 = vpop.eup %4647  ;;  %1562 = vst [vmem:[%s8174_s23 + $0x70] sm:$0xff] %v6520_v0  ;;  %1604 = vst [vmem:[%s8174_s23 + $0x1c0] sm:$0xff] %v6523_v47  ;;  %3958 = vmatprep.mubr.f32.mxu1 %v1774_v57  ;;  %v1743_v20 = vmul.f32 %v4646_v3, %v1615_v14  ;;  %v6540_v38 = vadd.f32 %v1763_v27, %v6384_v42 }
 0x733   :  { %4657 = vpow2.f32 %v1688_v43  ;;  %1563 = vst [vmem:[%s8174_s23 + $0x78] sm:$0xff] %v1402_v51  ;;  %v1651_v32 = vmul.f32 0.5, %v1402_v51  ;;  %1605 = vst [vmem:[%s8174_s23 + $0x1c8] sm:$0xff] %v1528_v17  ;;  %v1672_v49 = vmul.f32 0.5, %v1528_v17  ;;  %v1405_v31 = vpop.f32.mrb[80].mxu0  ;;  %v1531_v11 = vpop.f32.mrb[24].mxu1  ;;  %v1764_v46 = vmul.f32 %v4648_v45, %v1636_v9 }
 0x734   :  { %4659 = vpow2.f32 %v1730_v21  ;;  %v6552_v42 = vadd.f32 %v1405_v31, %v6332_v8  ;;  %v6555_v4 = vadd.f32 %v1531_v11, %v6332_v8  ;;  %v1407_v24 = vpop.f32.mrb[81].mxu0  ;;  %v1533_v10 = vpop.f32.mrb[25].mxu1  ;;  %v1775_v18 = vadd.f32 %v1743_v20, %v6403_v54  ;;  %v1618_v43 = vld [vmem:[%s8175_s1 + $0x30] sm:$0xff] }
 0x735   :  { %v4650_v37 = vpop.eup %4649  ;;  %v1690_v16 = vmul.f32 1.442695, %v1651_v32  ;;  %v1732_v1 = vmul.f32 1.442695, %v1672_v49  ;;  %v1408_v22 = vadd.f32 %v1407_v24, %v6334_v53  ;;  %v1534_v13 = vadd.f32 %v1533_v10, %v6334_v53  ;;  %v1639_v32 = vld [vmem:[%s8175_s1 + $0xd8] sm:$0xff] }
 0x736   :  { %v4652_v28 = vpop.eup %4651  ;;  %1564 = vst [vmem:[%s8174_s23 + $0x80] sm:$0xff] %v6552_v42  ;;  %1606 = vst [vmem:[%s8174_s23 + $0x1d0] sm:$0xff] %v6555_v4  ;;  %3959 = vmatmul.mubr.f32.gmra.mrb[32].mxu1 %v1775_v18  ;;  %v1744_v54 = vmul.f32 %v4650_v37, %v1616_v2  ;;  %v6572_v26 = vadd.f32 %v1764_v46, %v6406_v7 }
 0x737   :  { %4661 = vpow2.f32 %v1690_v16  ;;  %1565 = vst [vmem:[%s8174_s23 + $0x88] sm:$0xff] %v1408_v22  ;;  %v1652_v58 = vmul.f32 0.5, %v1408_v22  ;;  %1607 = vst [vmem:[%s8174_s23 + $0x1d8] sm:$0xff] %v1534_v13  ;;  %v1673_v34 = vmul.f32 0.5, %v1534_v13  ;;  %v1411_v44 = vpop.f32.mrb[82].mxu0  ;;  %v1537_v6 = vpop.f32.mrb[26].mxu1  ;;  %v1765_v60 = vmul.f32 %v4652_v28, %v1637_v29 }
 0x738   :  { %4663 = vpow2.f32 %v1732_v1  ;;  %v6584_v7 = vadd.f32 %v1411_v44, %v6332_v8  ;;  %v6587_v33 = vadd.f32 %v1537_v6, %v6332_v8  ;;  %v1413_v5 = vpop.f32.mrb[83].mxu0  ;;  %v1539_v63 = vpop.f32.mrb[27].mxu1  ;;  %v1776_v50 = vadd.f32 %v1744_v54, %v6428_v48  ;;  %v1619_v16 = vld [vmem:[%s8175_s1 + $0x38] sm:$0xff]  ;;  %v1640_v28 = vld [vmem:[%s8175_s1 + $0xe0] sm:$0xff] }
 0x739   :  { %v4654_v39 = vpop.eup %4653  ;;  %v1692_v40 = vmul.f32 1.442695, %v1652_v58  ;;  %v1734_v61 = vmul.f32 1.442695, %v1673_v34  ;;  %v1414_v15 = vadd.f32 %v1413_v5, %v6334_v53  ;;  %v1540_v14 = vadd.f32 %v1539_v63, %v6334_v53 }
 0x73a   :  { %v4656_v27 = vpop.eup %4655  ;;  %1566 = vst [vmem:[%s8174_s23 + $0x90] sm:$0xff] %v6584_v7  ;;  %1608 = vst [vmem:[%s8174_s23 + $0x1e0] sm:$0xff] %v6587_v33  ;;  %3961 = vmatprep.mubr.f32.mxu1 %v1776_v50  ;;  %v1745_v48 = vmul.f32 %v4654_v39, %v1617_v12  ;;  %v6604_v55 = vadd.f32 %v1765_v60, %v6431_v36 }
 0x73b   :  { %4665 = vpow2.f32 %v1692_v40  ;;  %1567 = vst [vmem:[%s8174_s23 + $0x98] sm:$0xff] %v1414_v15  ;;  %v1653_v56 = vmul.f32 0.5, %v1414_v15  ;;  %1609 = vst [vmem:[%s8174_s23 + $0x1e8] sm:$0xff] %v1540_v14  ;;  %v1674_v57 = vmul.f32 0.5, %v1540_v14  ;;  %v1417_v9 = vpop.f32.mrb[84].mxu0  ;;  %v1543_v3 = vpop.f32.mrb[28].mxu1  ;;  %v1766_v21 = vmul.f32 %v4656_v27, %v1638_v35 }
 0x73c   :  { %4667 = vpow2.f32 %v1734_v61  ;;  %v6616_v36 = vadd.f32 %v1417_v9, %v6332_v8  ;;  %v6619_v51 = vadd.f32 %v1543_v3, %v6332_v8  ;;  %v1419_v17 = vpop.f32.mrb[85].mxu0  ;;  %v1545_v45 = vpop.f32.mrb[29].mxu1  ;;  %v1777_v20 = vadd.f32 %v1745_v48, %v6456_v23  ;;  %v1641_v40 = vld [vmem:[%s8175_s1 + $0xe8] sm:$0xff] }
 0x73d   :  { %v4658_v49 = vpop.eup %4657  ;;  %v1694_v31 = vmul.f32 1.442695, %v1653_v56  ;;  %v1736_v11 = vmul.f32 1.442695, %v1674_v57  ;;  %v1420_v2 = vadd.f32 %v1419_v17, %v6334_v53  ;;  %v1546_v46 = vadd.f32 %v1545_v45, %v6334_v53  ;;  %v1642_v17 = vld [vmem:[%s8175_s1 + $0xf0] sm:$0xff] }
 0x73e   :  { %v4660_v24 = vpop.eup %4659  ;;  %1568 = vst [vmem:[%s8174_s23 + $0xa0] sm:$0xff] %v6616_v36  ;;  %1610 = vst [vmem:[%s8174_s23 + $0x1f0] sm:$0xff] %v6619_v51  ;;  %3962 = vmatmul.mubr.f32.gmra.mrb[34].mxu1 %v1777_v20  ;;  %v1746_v23 = vmul.f32 %v4658_v49, %v1618_v43  ;;  %v6636_v10 = vadd.f32 %v1766_v21, %v6459_v62 }
 0x73f   :  { %4669 = vpow2.f32 %v1694_v31  ;;  %1569 = vst [vmem:[%s8174_s23 + $0xa8] sm:$0xff] %v1420_v2  ;;  %v1654_v18 = vmul.f32 0.5, %v1420_v2  ;;  %1611 = vst [vmem:[%s8174_s23 + $0x1f8] sm:$0xff] %v1546_v46  ;;  %v1675_v29 = vmul.f32 0.5, %v1546_v46  ;;  %v1423_v37 = vpop.f32.mrb[86].mxu0  ;;  %v1767_v1 = vmul.f32 %v4660_v24, %v1639_v32 }
 0x740   :  { %4671 = vpow2.f32 %v1736_v11  ;;  %v6648_v62 = vadd.f32 %v1423_v37, %v6332_v8  ;;  %v1425_v22 = vpop.f32.mrb[87].mxu0  ;;  %v1778_v13 = vadd.f32 %v1746_v23, %v6488_v19 }
 0x741   :  { %v4662_v54 = vpop.eup %4661  ;;  %v1696_v58 = vmul.f32 1.442695, %v1654_v18  ;;  %v1738_v34 = vmul.f32 1.442695, %v1675_v29  ;;  %v1426_v44 = vadd.f32 %v1425_v22, %v6334_v53  ;;  %v6656_v6 = vadd.f32 %v1767_v1, %v6491_v59  ;;  %v1620_v59 = vld [vmem:[%s8175_s1 + $0x40] sm:$0xff]  ;;  %v1643_v29 = vld [vmem:[%s8175_s1 + $0xf8] sm:$0xff] }
 0x742   :  { %v4664_v12 = vpop.eup %4663  ;;  %1570 = vst [vmem:[%s8174_s23 + $0xb0] sm:$0xff] %v6648_v62  ;;  %3964 = vmatprep.mubr.f32.mxu1 %v1778_v13  ;;  %v1747_v19 = vmul.f32 %v4662_v54, %v1619_v16 }
 0x743   :  { %4673 = vpow2.f32 %v1696_v58  ;;  %1571 = vst [vmem:[%s8174_s23 + $0xb8] sm:$0xff] %v1426_v44  ;;  %v1655_v60 = vmul.f32 0.5, %v1426_v44  ;;  %v1429_v5 = vpop.f32.mrb[88].mxu0  ;;  %v1768_v63 = vmul.f32 %v4664_v12, %v1640_v28 }
 0x744   :  { %4675 = vpow2.f32 %v1738_v34  ;;  %v6669_v50 = vadd.f32 %v1429_v5, %v6332_v8  ;;  %v1431_v35 = vpop.f32.mrb[89].mxu0  ;;  %v1779_v39 = vadd.f32 %v1747_v19, %v6520_v0 }
 0x745   :  { %v4666_v61 = vpop.eup %4665  ;;  %v1698_v15 = vmul.f32 1.442695, %v1655_v60  ;;  %v1432_v14 = vadd.f32 %v1431_v35, %v6334_v53  ;;  %v6677_v27 = vadd.f32 %v1768_v63, %v6523_v47  ;;  %v1621_v47 = vld [vmem:[%s8175_s1 + $0x48] sm:$0xff] }
 0x746   :  { %v4668_v48 = vpop.eup %4667  ;;  %1572 = vst [vmem:[%s8174_s23 + $0xc0] sm:$0xff] %v6669_v50  ;;  %3965 = vmatmul.mubr.f32.gmra.mrb[36].mxu1 %v1779_v39  ;;  %v1748_v56 = vmul.f32 %v4666_v61, %v1620_v59  ;;  %v1624_v39 = vld [vmem:[%s8175_s1 + $0x60] sm:$0xff] }
 0x747   :  { %4677 = vpow2.f32 %v1698_v15  ;;  %1573 = vst [vmem:[%s8174_s23 + $0xc8] sm:$0xff] %v1432_v14  ;;  %v1656_v0 = vmul.f32 0.5, %v1432_v14  ;;  %v1435_v57 = vpop.f32.mrb[90].mxu0  ;;  %v1769_v9 = vmul.f32 %v4668_v48, %v1641_v40 }
 0x748   :  { %v6690_v3 = vadd.f32 %v1435_v57, %v6332_v8  ;;  %v1437_v43 = vpop.f32.mrb[91].mxu0  ;;  %v1780_v21 = vadd.f32 %v1748_v56, %v6552_v42 }
 0x749   :  { %v4670_v45 = vpop.eup %4669  ;;  %v1700_v20 = vmul.f32 1.442695, %v1656_v0  ;;  %v1438_v32 = vadd.f32 %v1437_v43, %v6334_v53  ;;  %v6698_v49 = vadd.f32 %v1769_v9, %v6555_v4  ;;  %v1622_v4 = vld [vmem:[%s8175_s1 + $0x50] sm:$0xff] }
 0x74a   :  { %v4672_v31 = vpop.eup %4671  ;;  %1574 = vst [vmem:[%s8174_s23 + $0xd0] sm:$0xff] %v6690_v3  ;;  %3967 = vmatprep.mubr.f32.mxu1 %v1780_v21  ;;  %v1749_v11 = vmul.f32 %v4670_v45, %v1621_v47 }
 0x74b   :  { %4679 = vpow2.f32 %v1700_v20  ;;  %1575 = vst [vmem:[%s8174_s23 + $0xd8] sm:$0xff] %v1438_v32  ;;  %v1657_v42 = vmul.f32 0.5, %v1438_v32  ;;  %v1441_v2 = vpop.f32.mrb[92].mxu0  ;;  %v1770_v46 = vmul.f32 %v4672_v31, %v1642_v17 }
 0x74c   :  { %v6711_v24 = vadd.f32 %v1441_v2, %v6332_v8  ;;  %v1443_v23 = vpop.f32.mrb[93].mxu0  ;;  %v1781_v18 = vadd.f32 %v1749_v11, %v6584_v7 }
 0x74d   :  { %v4674_v37 = vpop.eup %4673  ;;  %v1702_v16 = vmul.f32 1.442695, %v1657_v42  ;;  %v1444_v1 = vadd.f32 %v1443_v23, %v6334_v53  ;;  %v6719_v22 = vadd.f32 %v1770_v46, %v6587_v33  ;;  %v1623_v33 = vld [vmem:[%s8175_s1 + $0x58] sm:$0xff] }
 0x74e   :  { %v4676_v13 = vpop.eup %4675  ;;  %1576 = vst [vmem:[%s8174_s23 + $0xe0] sm:$0xff] %v6711_v24  ;;  %3968 = vmatmul.mubr.f32.gmra.mrb[38].mxu1 %v1781_v18  ;;  %v1750_v28 = vmul.f32 %v4674_v37, %v1622_v4 }
 0x74f   :  { %4681 = vpow2.f32 %v1702_v16  ;;  %1577 = vst [vmem:[%s8174_s23 + $0xe8] sm:$0xff] %v1444_v1  ;;  %v1658_v7 = vmul.f32 0.5, %v1444_v1  ;;  %v1447_v54 = vpop.f32.mrb[94].mxu0  ;;  %v1771_v58 = vmul.f32 %v4676_v13, %v1643_v29 }
 0x750   :  { %v6732_v34 = vadd.f32 %v1447_v54, %v6332_v8  ;;  %v1449_v44 = vpop.f32.mrb[95].mxu0  ;;  %v1782_v12 = vadd.f32 %v1750_v28, %v6616_v36 }
 0x751   :  { %v4678_v19 = vpop.eup %4677  ;;  %v1704_v60 = vmul.f32 1.442695, %v1658_v7  ;;  %v1450_v5 = vadd.f32 %v1449_v44, %v6334_v53  ;;  %v6737_v59 = vadd.f32 %v1771_v58, %v6619_v51 }
 0x752   :  { %1578 = vst [vmem:[%s8174_s23 + $0xf0] sm:$0xff] %v6732_v34  ;;  %3970 = vmatprep.mubr.f32.mxu1 %v1782_v12  ;;  %v1751_v63 = vmul.f32 %v4678_v19, %v1623_v33 }
 0x753   :  { %4683 = vpow2.f32 %v1704_v60  ;;  %1579 = vst [vmem:[%s8174_s23 + $0xf8] sm:$0xff] %v1450_v5  ;;  %v1659_v36 = vmul.f32 0.5, %v1450_v5  ;;  %v1453_v35 = vpop.f32.mrb[96].mxu0 }
 0x754   :  { %v6750_v51 = vadd.f32 %v1453_v35, %v6332_v8  ;;  %v1455_v40 = vpop.f32.mrb[97].mxu0  ;;  %v1783_v61 = vadd.f32 %v1751_v63, %v6648_v62  ;;  %v1625_v62 = vld [vmem:[%s8175_s1 + $0x68] sm:$0xff] }
 0x755   :  { %v4680_v15 = vpop.eup %4679  ;;  %v1706_v14 = vmul.f32 1.442695, %v1659_v36  ;;  %v1456_v48 = vadd.f32 %v1455_v40, %v6334_v53 }
 0x756   :  { %1580 = vst [vmem:[%s8174_s23 + $0x100] sm:$0xff] %v6750_v51  ;;  %3971 = vmatmul.mubr.f32.gmra.mrb[40].mxu1 %v1783_v61  ;;  %v1752_v56 = vmul.f32 %v4680_v15, %v1624_v39  ;;  %v1630_v15 = vld [vmem:[%s8175_s1 + $0x90] sm:$0xff] }
 0x757   :  { %4685 = vpow2.f32 %v1706_v14  ;;  %1581 = vst [vmem:[%s8174_s23 + $0x108] sm:$0xff] %v1456_v48  ;;  %v1660_v0 = vmul.f32 0.5, %v1456_v48  ;;  %v1459_v57 = vpop.f32.mrb[98].mxu0 }
 0x758   :  { %v1460_v47 = vadd.f32 %v1459_v57, %v6332_v8  ;;  %v1461_v9 = vpop.f32.mrb[99].mxu0  ;;  %v1784_v43 = vadd.f32 %v1752_v56, %v6669_v50  ;;  %v1626_v50 = vld [vmem:[%s8175_s1 + $0x70] sm:$0xff] }
 0x759   :  { %v4682_v21 = vpop.eup %4681  ;;  %v1708_v17 = vmul.f32 1.442695, %v1660_v0  ;;  %v1462_v45 = vadd.f32 %v1461_v9, %v6334_v53  ;;  %v1631_v0 = vld [vmem:[%s8175_s1 + $0x98] sm:$0xff]  ;;  %v1632_v9 = vld [vmem:[%s8175_s1 + $0xa0] sm:$0xff] }
 0x75a   :  { %1582 = vst [vmem:[%s8174_s23 + $0x110] sm:$0xff] %v1460_v47  ;;  %3973 = vmatprep.mubr.f32.mxu1 %v1784_v43  ;;  %v1753_v20 = vmul.f32 %v4682_v21, %v1625_v62 }
 0x75b   :  { %4687 = vpow2.f32 %v1708_v17  ;;  %1583 = vst [vmem:[%s8174_s23 + $0x118] sm:$0xff] %v1462_v45  ;;  %v1661_v32 = vmul.f32 0.5, %v1462_v45  ;;  %v1465_v31 = vpop.f32.mrb[100].mxu0 }
 0x75c   :  { %v1466_v11 = vadd.f32 %v1465_v31, %v6332_v8  ;;  %v1467_v42 = vpop.f32.mrb[101].mxu0  ;;  %v1785_v2 = vadd.f32 %v1753_v20, %v6690_v3  ;;  %v1627_v3 = vld [vmem:[%s8175_s1 + $0x78] sm:$0xff] }
 0x75d   :  { %v4684_v4 = vpop.eup %4683  ;;  %v1710_v46 = vmul.f32 1.442695, %v1661_v32  ;;  %v1468_v23 = vadd.f32 %v1467_v42, %v6334_v53 }
 0x75e   :  { %1584 = vst [vmem:[%s8174_s23 + $0x120] sm:$0xff] %v1466_v11  ;;  %3974 = vmatmul.mubr.f32.gmra.mrb[42].mxu1 %v1785_v2  ;;  %v1754_v18 = vmul.f32 %v4684_v4, %v1626_v50 }
 0x75f   :  { %4689 = vpow2.f32 %v1710_v46  ;;  %1585 = vst [vmem:[%s8174_s23 + $0x128] sm:$0xff] %v1468_v23  ;;  %v1662_v29 = vmul.f32 0.5, %v1468_v23  ;;  %v1471_v37 = vpop.f32.mrb[102].mxu0 }
 0x760   :  { %v1472_v16 = vadd.f32 %v1471_v37, %v6332_v8  ;;  %v1473_v1 = vpop.f32.mrb[103].mxu0  ;;  %v1786_v13 = vadd.f32 %v1754_v18, %v6711_v24  ;;  %v1628_v24 = vld [vmem:[%s8175_s1 + $0x80] sm:$0xff] }
 0x761   :  { %v4686_v28 = vpop.eup %4685  ;;  %v1712_v7 = vmul.f32 1.442695, %v1662_v29  ;;  %v1474_v54 = vadd.f32 %v1473_v1, %v6334_v53 }
 0x762   :  { %1586 = vst [vmem:[%s8174_s23 + $0x130] sm:$0xff] %v1472_v16  ;;  %3976 = vmatprep.mubr.f32.mxu1 %v1786_v13  ;;  %v1755_v33 = vmul.f32 %v4686_v28, %v1627_v3 }
 0x763   :  { %4691 = vpow2.f32 %v1712_v7  ;;  %1587 = vst [vmem:[%s8174_s23 + $0x138] sm:$0xff] %v1474_v54  ;;  %v1663_v58 = vmul.f32 0.5, %v1474_v54  ;;  %v1477_v44 = vpop.f32.mrb[104].mxu0 }
 0x764   :  { %v1478_v12 = vadd.f32 %v1477_v44, %v6332_v8  ;;  %v1479_v19 = vpop.f32.mrb[105].mxu0  ;;  %v1787_v60 = vadd.f32 %v1755_v33, %v6732_v34  ;;  %v1629_v8 = vld [vmem:[%s8175_s1 + $0x88] sm:$0xff] }
 0x765   :  { %v4688_v5 = vpop.eup %4687  ;;  %v1714_v63 = vmul.f32 1.442695, %v1663_v58  ;;  %v1480_v36 = vadd.f32 %v1479_v19, %v6334_v53 }
 0x766   :  { %1588 = vst [vmem:[%s8174_s23 + $0x140] sm:$0xff] %v1478_v12  ;;  %3977 = vmatmul.mubr.f32.gmra.mrb[44].mxu1 %v1787_v60  ;;  %v1756_v35 = vmul.f32 %v4688_v5, %v1628_v24 }
 0x767   :  { %4693 = vpow2.f32 %v1714_v63  ;;  %1589 = vst [vmem:[%s8174_s23 + $0x148] sm:$0xff] %v1480_v36  ;;  %v1664_v39 = vmul.f32 0.5, %v1480_v36 }
 0x768   :  { %v1788_v34 = vadd.f32 %v1756_v35, %v6750_v51 }
 0x769   :  { %v4690_v40 = vpop.eup %4689  ;;  %v1716_v53 = vmul.f32 1.442695, %v1664_v39 }
 0x76a   :  { %3979 = vmatprep.mubr.f32.mxu1 %v1788_v34  ;;  %v1757_v61 = vmul.f32 %v4690_v40, %v1629_v8 }
 0x76b   :  { %4695 = vpow2.f32 %v1716_v53 }
 0x76c   :  { %v1789_v14 = vadd.f32 %v1757_v61, %v1460_v47 }
 0x76d   :  { %v4692_v48 = vpop.eup %4691 }
 0x76e   :  { %3980 = vmatmul.mubr.f32.gmra.mrb[46].mxu1 %v1789_v14  ;;  %v1758_v56 = vmul.f32 %v4692_v48, %v1630_v15 }
 0x770   :  { %v1790_v57 = vadd.f32 %v1758_v56, %v1466_v11  ;;  %v6847_v11 = vld [vmem:[%s8176_s13] ss:$0 sm:$0xff] }
 0x771   :  { %v4694_v62 = vpop.eup %4693 }
 0x772   :  { %3982 = vmatprep.mubr.f32.mxu1 %v1790_v57  ;;  %v1759_v51 = vmul.f32 %v4694_v62, %v1631_v0 }
 0x774   :  { %v1791_v43 = vadd.f32 %v1759_v51, %v1472_v16 }
 0x775   :  { %v4696_v21 = vpop.eup %4695 }
 0x776   :  { %3983 = vmatmul.mubr.f32.gmra.mrb[48].mxu1 %v1791_v43  ;;  %v1760_v17 = vmul.f32 %v4696_v21, %v1632_v9 }
 0x778   :  { %v1792_v47 = vadd.f32 %v1760_v17, %v1478_v12 }
 0x77a   :  { %3985 = vmatprep.mubr.f32.mxu1 %v1792_v47 }
 0x77b   :  { %3986 = vmatmul.mubr.f32.gmra.mrb[50].mxu1 %v6476_v52 }
 0x77c   :  { %3988 = vmatprep.mubr.f32.mxu1 %v6508_v41 }
 0x77f   :  { %3989 = vmatmul.mubr.f32.gmra.mrb[52].mxu1 %v6540_v38 }
 0x780   :  { %3991 = vmatprep.mubr.f32.mxu1 %v6572_v26 }
 0x783   :  { %3992 = vmatmul.mubr.f32.gmra.mrb[54].mxu1 %v6604_v55 }
 0x784   :  { %3994 = vmatprep.mubr.f32.mxu1 %v6636_v10 }
 0x787   :  { %3995 = vmatmul.mubr.f32.gmra.mrb[56].mxu1 %v6656_v6 }
 0x788   :  { %3997 = vmatprep.mubr.f32.mxu1 %v6677_v27 }
 0x78b   :  { %3998 = vmatmul.mubr.f32.gmra.mrb[58].mxu1 %v6698_v49 }
 0x78c   :  { %4000 = vmatprep.mubr.f32.mxu1 %v6719_v22 }
 0x78f   :  { %4001 = vmatmul.mubr.f32.gmra.mrb[60].mxu1 %v6737_v59 }
 0x790   :  { %2148 = vmatprep.mubr.f32.mxu1 %v8271_v30 }
 0x801   :  { %v3957_v52 = vpop.f32.mrb[30].mxu1 }
 0x802   :  { %v1893_v41 = vpop.f32.mrb[31].mxu1  ;;  %v6850_v42 = vadd.f32 %v3957_v52, %v6847_v11 }
 0x803   :  { %v6853_v2 = vadd.f32 %v6847_v11, %v1893_v41 }
 0x804   :  { %v2053_v29 = vmax.f32 %v6850_v42, 0.0 }
 0x805   :  { %v2052_v37 = vmax.f32 %v6853_v2, 0.0 }
 0x807   :  { %v4421_v7 = vpack.c.bf16 %v2053_v29, %v2052_v37 }
 0x809   :  { %v3960_v38 = vpop.f32.mrb[32].mxu1 }
 0x80a   :  { %v1903_v26 = vpop.f32.mrb[33].mxu1  ;;  %v6866_v1 = vadd.f32 %v3960_v38, %v6847_v11 }
 0x80b   :  { %v6869_v13 = vadd.f32 %v6847_v11, %v1903_v26 }
 0x80c   :  { %v2055_v44 = vmax.f32 %v6866_v1, 0.0 }
 0x80d   :  { %v2054_v24 = vmax.f32 %v6869_v13, 0.0 }
 0x80f   :  { %v4425_v35 = vpack.c.bf16 %v2055_v44, %v2054_v24 }
 0x811   :  { %v3963_v45 = vpop.f32.mrb[34].mxu1 }
 0x812   :  { %v1913_v55 = vpop.f32.mrb[35].mxu1  ;;  %v6888_v19 = vadd.f32 %v3963_v45, %v6847_v11 }
 0x813   :  { %v6891_v60 = vadd.f32 %v6847_v11, %v1913_v55 }
 0x814   :  { %v2057_v40 = vmax.f32 %v6888_v19, 0.0 }
 0x815   :  { %v2056_v53 = vmax.f32 %v6891_v60, 0.0 }
 0x817   :  { %v4429_v51 = vpack.c.bf16 %v2057_v40, %v2056_v53 }
 0x819   :  { %v3966_v20 = vpop.f32.mrb[36].mxu1 }
 0x81a   :  { %v1923_v10 = vpop.f32.mrb[37].mxu1  ;;  %v6909_v61 = vadd.f32 %v3966_v20, %v6847_v11 }
 0x81b   :  { %v6915_v14 = vadd.f32 %v6847_v11, %v1923_v10 }
 0x81c   :  { %v2059_v9 = vmax.f32 %v6909_v61, 0.0 }
 0x81d   :  { %v2058_v17 = vmax.f32 %v6915_v14, 0.0 }
 0x821   :  { %v3969_v32 = vpop.f32.mrb[38].mxu1 }
 0x822   :  { %v1933_v6 = vpop.f32.mrb[39].mxu1  ;;  %v6936_v47 = vadd.f32 %v3969_v32, %v6847_v11 }
 0x823   :  { %v6939_v52 = vadd.f32 %v6847_v11, %v1933_v6 }
 0x829   :  { %v3972_v31 = vpop.f32.mrb[40].mxu1 }
 0x82a   :  { %v6834_v27 = vpop.f32.mrb[41].mxu1  ;;  %v6944_v45 = vadd.f32 %v3972_v31, %v6847_v11  ;;  %v4433_v31 = vpack.c.bf16 %v2059_v9, %v2058_v17 }
 0x82b   :  { %v6951_v10 = vadd.f32 %v6847_v11, %v6834_v27 }
 0x831   :  { %v6836_v49 = vpop.f32.mrb[42].mxu1 }
 0x832   :  { %v6838_v22 = vpop.f32.mrb[43].mxu1 }
 0x839   :  { %v6840_v59 = vpop.f32.mrb[44].mxu1 }
 0x83a   :  { %v6842_v50 = vpop.f32.mrb[45].mxu1 }
 0x841   :  { %v3981_v4 = vpop.f32.mrb[46].mxu1 }
 0x842   :  { %v6856_v46 = vadd.f32 %v3981_v4, %v6847_v11  ;;  %v1973_v23 = vpop.f32.mrb[47].mxu1  ;;  %v8222_v4 = vmax.f32 %v6936_v47, 0.0 }
 0x843   :  { %v6859_v18 = vadd.f32 %v6847_v11, %v1973_v23  ;;  %v8225_v23 = vmax.f32 %v6939_v52, 0.0 }
 0x844   :  { %v2069_v3 = vmax.f32 %v6856_v46, 0.0 }
 0x845   :  { %v2068_v16 = vmax.f32 %v6859_v18, 0.0 }
 0x847   :  { %v4419_v28 = vpack.c.bf16 %v2069_v3, %v2068_v16 }
 0x849   :  { %v3984_v54 = vpop.f32.mrb[48].mxu1  ;;  %4420 = vmatprep.subr.bf16.mxu1 %v4419_v28 }
 0x84a   :  { %v6880_v33 = vadd.f32 %v3984_v54, %v6847_v11  ;;  %v1983_v58 = vpop.f32.mrb[49].mxu1  ;;  %4422 = vmatpush3.bf16.msra.mxu1 %v4421_v7  ;;  %v8220_v54 = vmax.f32 %v6944_v45, 0.0 }
 0x84b   :  { %v6885_v12 = vadd.f32 %v6847_v11, %v1983_v58 }
 0x84c   :  { %v2071_v5 = vmax.f32 %v6880_v33, 0.0 }
 0x84d   :  { %v2070_v63 = vmax.f32 %v6885_v12, 0.0 }
 0x84e   :  { %v3987_v36 = vpop.f32.mrb[50].mxu1 }
 0x84f   :  { %v4423_v39 = vpack.c.bf16 %v2071_v5, %v2070_v63  ;;  %v6904_v8 = vadd.f32 %v3987_v36, %v6847_v11  ;;  %v1993_v34 = vpop.f32.mrb[51].mxu1 }
 0x850   :  { %v6912_v15 = vadd.f32 %v6847_v11, %v1993_v34 }
 0x851   :  { %v2073_v48 = vmax.f32 %v6904_v8, 0.0  ;;  %4424 = vmatprep.subr.bf16.mxu1 %v4423_v39  ;;  %v6975_v39 = vadd.f32 %v6836_v49, %v6847_v11 }
 0x852   :  { %v2072_v56 = vmax.f32 %v6912_v15, 0.0  ;;  %v3990_v0 = vpop.f32.mrb[52].mxu1  ;;  %4426 = vmatpush3.bf16.msra.mxu1 %v4425_v35  ;;  %v8221_v35 = vmax.f32 %v6951_v10, 0.0 }
 0x853   :  { %v6920_v57 = vadd.f32 %v3990_v0, %v6847_v11  ;;  %v2003_v62 = vpop.f32.mrb[53].mxu1 }
 0x854   :  { %v4427_v43 = vpack.c.bf16 %v2073_v48, %v2072_v56  ;;  %v6932_v21 = vadd.f32 %v6847_v11, %v2003_v62  ;;  %v4437_v62 = vpack.c.bf16 %v8222_v4, %v8225_v23 }
 0x855   :  { %v2075_v41 = vmax.f32 %v6920_v57, 0.0 }
 0x856   :  { %v2074_v38 = vmax.f32 %v6932_v21, 0.0  ;;  %v3993_v26 = vpop.f32.mrb[54].mxu1  ;;  %4428 = vmatprep.subr.bf16.mxu1 %v4427_v43 }
 0x857   :  { %v6947_v55 = vadd.f32 %v3993_v26, %v6847_v11  ;;  %v2013_v20 = vpop.f32.mrb[55].mxu1  ;;  %4430 = vmatpush3.bf16.msra.mxu1 %v4429_v51  ;;  %v6990_v51 = vadd.f32 %v6847_v11, %v6838_v22 }
 0x858   :  { %v4431_v32 = vpack.c.bf16 %v2075_v41, %v2074_v38  ;;  %v6958_v6 = vadd.f32 %v6847_v11, %v2013_v20 }
 0x859   :  { %v2077_v27 = vmax.f32 %v6947_v55, 0.0 }
 0x85a   :  { %v2076_v28 = vmax.f32 %v6958_v6, 0.0  ;;  %v3996_v7 = vpop.f32.mrb[56].mxu1  ;;  %4432 = vmatprep.subr.bf16.mxu1 %v4431_v32 }
 0x85b   :  { %v6970_v58 = vadd.f32 %v3996_v7, %v6847_v11  ;;  %v2023_v36 = vpop.f32.mrb[57].mxu1  ;;  %4434 = vmatpush3.bf16.msra.mxu1 %v4433_v31  ;;  %v4441_v31 = vpack.c.bf16 %v8220_v54, %v8221_v35  ;;  %v8230_v7 = vmax.f32 %v6975_v39, 0.0 }
 0x85c   :  { %v4435_v34 = vpack.c.bf16 %v2077_v27, %v2076_v28  ;;  %v6982_v0 = vadd.f32 %v6847_v11, %v2023_v36 }
 0x85d   :  { %v8223_v49 = vmax.f32 %v6970_v58, 0.0 }
 0x85e   :  { %v8224_v43 = vmax.f32 %v6982_v0, 0.0  ;;  %v3999_v26 = vpop.f32.mrb[58].mxu1  ;;  %4436 = vmatprep.subr.bf16.mxu1 %v4435_v34  ;;  %v8231_v34 = vmax.f32 %v6990_v51, 0.0  ;;  %v8293_v55 = vmax.f32 %v6982_v0, 0.0 }
 0x85f   :  { %v6995_v20 = vadd.f32 %v3999_v26, %v6847_v11  ;;  %v2033_v32 = vpop.f32.mrb[59].mxu1  ;;  %4438 = vmatpush3.bf16.msra.mxu1 %v4437_v62  ;;  %v7012_v62 = vadd.f32 %v6840_v59, %v6847_v11  ;;  %v7016_v26 = vadd.f32 %v6847_v11, %v6842_v50 }
 0x860   :  { %v4439_v22 = vpack.c.bf16 %v8223_v49, %v8224_v43  ;;  %v7007_v36 = vadd.f32 %v6847_v11, %v2033_v32  ;;  %v4445_v50 = vpack.c.bf16 %v8230_v7, %v8231_v34 }
 0x861   :  { %v8232_v54 = vmax.f32 %v6995_v20, 0.0 }
 0x862   :  { %v2080_v35 = vmax.f32 %v7007_v36, 0.0  ;;  %v4002_v4 = vpop.f32.mrb[60].mxu1  ;;  %4440 = vmatprep.subr.bf16.mxu1 %v4439_v22  ;;  %v8228_v22 = vmax.f32 %v7012_v62, 0.0 }
 0x863   :  { %v7021_v49 = vadd.f32 %v4002_v4, %v6847_v11  ;;  %v2043_v32 = vpop.f32.mrb[61].mxu1  ;;  %4442 = vmatpush3.bf16.msra.mxu1 %v4441_v31  ;;  %v8229_v4 = vmax.f32 %v7016_v26, 0.0 }
 0x864   :  { %v4443_v59 = vpack.c.bf16 %v8232_v54, %v2080_v35  ;;  %v7028_v43 = vadd.f32 %v6847_v11, %v2043_v32 }
 0x865   :  { %v8226_v23 = vmax.f32 %v7021_v49, 0.0  ;;  %v4449_v32 = vpack.c.bf16 %v8228_v22, %v8229_v4  ;;  %v2379_v22 = vld [vmem:[%s8177_s16 + $0x20] sm:$0xff]  ;;  %v2380_v4 = vld [vmem:[%s8177_s16 + $0x28] sm:$0xff] }
 0x866   :  { %v8227_v31 = vmax.f32 %v7028_v43, 0.0  ;;  %4444 = vmatprep.subr.bf16.mxu1 %v4443_v59  ;;  %v2375_v59 = vld [vmem:[%s8177_s16] sm:$0xff]  ;;  %v4491_v7 = vpack.c.bf16 %v2380_v4, %v2379_v22  ;;  %v8292_v22 = vmax.f32 %v6936_v47, 0.0 }
 0x867   :  { %4446 = vmatpush3.bf16.msra.mxu1 %v4445_v50  ;;  %v2376_v50 = vld [vmem:[%s8177_s16 + $0x8] sm:$0xff] }
 0x868   :  { %v4447_v11 = vpack.c.bf16 %v8226_v23, %v8227_v31  ;;  %v2377_v23 = vld [vmem:[%s8177_s16 + $0x10] sm:$0xff]  ;;  %v4483_v31 = vpack.c.bf16 %v2376_v50, %v2375_v59 }
 0x86a   :  { %4448 = vmatprep.subr.bf16.mxu1 %v4447_v11  ;;  %v2378_v11 = vld [vmem:[%s8177_s16 + $0x18] sm:$0xff]  ;;  %4484 = vmatprep.subr.bf16.mxu0 %v4483_v31 }
 0x86b   :  { %4450 = vmatpush3.bf16.msra.mxu1 %v4449_v32  ;;  %v4487_v32 = vpack.c.bf16 %v2378_v11, %v2377_v23  ;;  %4486 = vmatpush3.bf16.msra.mxu0 %v4483_v31 }
 0x86d   :  { %4488 = vmatprep.subr.bf16.mxu0 %v4487_v32 }
 0x86e   :  { %2149 = vmatmul.mubr.f32.vlgmr.msra.gmra.mrb[62].mxu1 %v8271_v30 }
 0x86f   :  { %2287 = vmatprep.mubr.f32.mxu1 %v8271_v30  ;;  %4490 = vmatpush3.bf16.msra.mxu0 %v4487_v32 }
 0x870   :  { %4492 = vmatprep.subr.bf16.mxu0 %v4491_v7 }
 0x873   :  { %4494 = vmatpush3.bf16.msra.mxu0 %v4491_v7 }
 0x941   :  { %v3559_v59 = vpop.f32.mrb[62].mxu1 }
 0x942   :  { %v3560_v50 = vpop.f32.mrb[63].mxu1 }
 0x943   :  { %v3561_v34 = vadd.f32 %v3560_v50, %v3559_v59  ;;  %v8294_v50 = vmax.f32 %v6970_v58, 0.0 }
 0x945   :  { %v2154_v54 = vmul.f32 0.00390625, %v3561_v34 }
 0x947   :  { %v7067_v23 = vrot.slane %v2154_v54, %v5197_v25 }
 0x949   :  { %v7072_v11 = vsub.f32 %v2052_v37, %v7067_v23  ;;  %v7077_v31 = vsub.f32 %v2053_v29, %v7067_v23  ;;  %v7082_v7 = vsub.f32 %v2068_v16, %v7067_v23  ;;  %v7087_v54 = vsub.f32 %v2069_v3, %v7067_v23 }
 0x94a   :  { %v7092_v2 = vsub.f32 %v2070_v63, %v7067_v23  ;;  %v7097_v42 = vsub.f32 %v2071_v5, %v7067_v23  ;;  %v7110_v3 = vsub.f32 %v2054_v24, %v7067_v23  ;;  %v7115_v16 = vsub.f32 %v2055_v44, %v7067_v23 }
 0x94b   :  { %v2191_v18 = vmul.f32 %v7072_v11, %v7072_v11  ;;  %v2192_v29 = vmul.f32 %v7077_v31, %v7077_v31  ;;  %v2207_v46 = vmul.f32 %v7082_v7, %v7082_v7  ;;  %v2208_v37 = vmul.f32 %v7087_v54, %v7087_v54 }
 0x94c   :  { %v7120_v33 = vsub.f32 %v2072_v56, %v7067_v23  ;;  %v7125_v12 = vsub.f32 %v2073_v48, %v7067_v23  ;;  %v2209_v13 = vmul.f32 %v7092_v2, %v7092_v2  ;;  %v2210_v24 = vmul.f32 %v7097_v42, %v7097_v42 }
 0x94d   :  { %v7134_v1 = vsub.f32 %v2056_v53, %v7067_v23  ;;  %v4451_v44 = vpack.c.bf16 %v2208_v37, %v2207_v46  ;;  %v4453_v5 = vpack.c.bf16 %v2192_v29, %v2191_v18  ;;  %v7139_v63 = vsub.f32 %v2057_v40, %v7067_v23 }
 0x94e   :  { %v7144_v8 = vsub.f32 %v2074_v38, %v7067_v23  ;;  %v2193_v15 = vmul.f32 %v7110_v3, %v7110_v3  ;;  %v2194_v60 = vmul.f32 %v7115_v16, %v7115_v16  ;;  %v7153_v53 = vsub.f32 %v2075_v41, %v7067_v23 }
 0x94f   :  { %v2211_v19 = vmul.f32 %v7120_v33, %v7120_v33  ;;  %v2212_v40 = vmul.f32 %v7125_v12, %v7125_v12  ;;  %4452 = vmatprep.subr.bf16.mxu1 %v4451_v44  ;;  %v4455_v48 = vpack.c.bf16 %v2210_v24, %v2209_v13  ;;  %v7162_v56 = vsub.f32 %v2058_v17, %v7067_v23 }
 0x950   :  { %4454 = vmatpush3.bf16.msra.mxu1 %v4453_v5  ;;  %v7167_v57 = vsub.f32 %v2059_v9, %v7067_v23  ;;  %v7172_v21 = vsub.f32 %v2076_v28, %v7067_v23  ;;  %v2195_v41 = vmul.f32 %v7134_v1, %v7134_v1  ;;  %v2196_v38 = vmul.f32 %v7139_v63, %v7139_v63 }
 0x951   :  { %4456 = vmatprep.subr.bf16.mxu1 %v4455_v48  ;;  %v4457_v14 = vpack.c.bf16 %v2194_v60, %v2193_v15  ;;  %v7181_v17 = vsub.f32 %v2077_v27, %v7067_v23  ;;  %v2213_v61 = vmul.f32 %v7144_v8, %v7144_v8  ;;  %v2214_v9 = vmul.f32 %v7153_v53, %v7153_v53 }
 0x952   :  { %v4459_v6 = vpack.c.bf16 %v2212_v40, %v2211_v19  ;;  %v8291_v28 = vmax.f32 %v6939_v52, 0.0  ;;  %v7195_v4 = vsub.f32 %v8292_v22, %v7067_v23  ;;  %v7200_v27 = vsub.f32 %v8293_v55, %v7067_v23 }
 0x953   :  { %v2197_v32 = vmul.f32 %v7162_v56, %v7162_v56  ;;  %v2198_v59 = vmul.f32 %v7167_v57, %v7167_v57  ;;  %v4461_v52 = vpack.c.bf16 %v2196_v38, %v2195_v41  ;;  %v7209_v18 = vsub.f32 %v8294_v50, %v7067_v23 }
 0x954   :  { %4458 = vmatpush3.bf16.msra.mxu1 %v4457_v14  ;;  %v7190_v34 = vsub.f32 %v8291_v28, %v7067_v23  ;;  %v2215_v47 = vmul.f32 %v7172_v21, %v7172_v21  ;;  %v2216_v0 = vmul.f32 %v7181_v17, %v7181_v17  ;;  %v4463_v29 = vpack.c.bf16 %v2214_v9, %v2213_v61 }
 0x955   :  { %4460 = vmatprep.subr.bf16.mxu1 %v4459_v6  ;;  %v8295_v46 = vmax.f32 %v6951_v10, 0.0  ;;  %v8296_v13 = vmax.f32 %v6944_v45, 0.0  ;;  %v7228_v58 = vsub.f32 %v2080_v35, %v7067_v23  ;;  %v2200_v5 = vmul.f32 %v7195_v4, %v7195_v4 }
 0x956   :  { %v2199_v44 = vmul.f32 %v7190_v34, %v7190_v34  ;;  %v4465_v10 = vpack.c.bf16 %v2198_v59, %v2197_v32  ;;  %v8297_v15 = vmax.f32 %v6995_v20, 0.0  ;;  %v2217_v45 = vmul.f32 %v7200_v27, %v7200_v27 }
 0x957   :  { %v7218_v37 = vsub.f32 %v8295_v46, %v7067_v23  ;;  %v7223_v24 = vsub.f32 %v8296_v13, %v7067_v23  ;;  %v2218_v36 = vmul.f32 %v7209_v18, %v7209_v18  ;;  %v4467_v35 = vpack.c.bf16 %v2216_v0, %v2215_v47 }
 0x958   :  { %4462 = vmatpush3.bf16.msra.mxu1 %v4461_v52  ;;  %v7237_v60 = vsub.f32 %v8297_v15, %v7067_v23  ;;  %v8298_v19 = vmax.f32 %v6990_v51, 0.0  ;;  %v8299_v48 = vmax.f32 %v6975_v39, 0.0  ;;  %v8300_v20 = vmax.f32 %v7028_v43, 0.0  ;;  %v2383_v15 = vld [vmem:[%s8177_s16 + $0x40] sm:$0xff] }
 0x959   :  { %4464 = vmatprep.subr.bf16.mxu1 %v4463_v29  ;;  %v2201_v14 = vmul.f32 %v7218_v37, %v7218_v37  ;;  %v2202_v61 = vmul.f32 %v7223_v24, %v7223_v24  ;;  %v4469_v51 = vpack.c.bf16 %v2200_v5, %v2199_v44  ;;  %v8301_v9 = vmax.f32 %v7021_v49, 0.0  ;;  %v2381_v44 = vld [vmem:[%s8177_s16 + $0x30] sm:$0xff]  ;;  %v2382_v5 = vld [vmem:[%s8177_s16 + $0x38] sm:$0xff] }
 0x95a   :  { %v7246_v40 = vsub.f32 %v8298_v19, %v7067_v23  ;;  %v7251_v41 = vsub.f32 %v8299_v48, %v7067_v23  ;;  %v7256_v38 = vsub.f32 %v8300_v20, %v7067_v23  ;;  %v2219_v39 = vmul.f32 %v7228_v58, %v7228_v58  ;;  %v2386_v19 = vld [vmem:[%s8177_s16 + $0x58] sm:$0xff]  ;;  %v2387_v20 = vld [vmem:[%s8177_s16 + $0x60] sm:$0xff] }
 0x95b   :  { %v7265_v6 = vsub.f32 %v8301_v9, %v7067_v23  ;;  %v2220_v43 = vmul.f32 %v7237_v60, %v7237_v60  ;;  %v4471_v28 = vpack.c.bf16 %v2218_v36, %v2217_v45  ;;  %v8302_v22 = vmax.f32 %v7016_v26, 0.0  ;;  %v2384_v45 = vld [vmem:[%s8177_s16 + $0x48] sm:$0xff]  ;;  %v2390_v9 = vld [vmem:[%s8177_s16 + $0x78] sm:$0xff] }
 0x95c   :  { %4466 = vmatpush3.bf16.msra.mxu1 %v4465_v10  ;;  %v8303_v32 = vmax.f32 %v7012_v62, 0.0  ;;  %v2203_v59 = vmul.f32 %v7246_v40, %v7246_v40  ;;  %v2204_v52 = vmul.f32 %v7251_v41, %v7251_v41  ;;  %v4473_v50 = vpack.c.bf16 %v2202_v61, %v2201_v14  ;;  %v2388_v14 = vld [vmem:[%s8177_s16 + $0x68] sm:$0xff] }
 0x95d   :  { %4468 = vmatprep.subr.bf16.mxu1 %v4467_v35  ;;  %v7274_v55 = vsub.f32 %v8302_v22, %v7067_v23  ;;  %v2221_v47 = vmul.f32 %v7256_v38, %v7256_v38  ;;  %v2222_v26 = vmul.f32 %v7265_v6, %v7265_v6  ;;  %v4475_v0 = vpack.c.bf16 %v2220_v43, %v2219_v39  ;;  %v2385_v35 = vld [vmem:[%s8177_s16 + $0x50] sm:$0xff] }
 0x95e   :  { %v7279_v49 = vsub.f32 %v8303_v32, %v7067_v23  ;;  %v4477_v29 = vpack.c.bf16 %v2204_v52, %v2203_v59  ;;  %v4495_v10 = vpack.c.bf16 %v2382_v5, %v2381_v44  ;;  %v4499_v36 = vpack.c.bf16 %v2384_v45, %v2383_v15  ;;  %v2294_v52 = vld [vmem:[%s8178_s14] sm:$0x1] }
 0x95f   :  { %v2205_v62 = vmul.f32 %v7274_v55, %v7274_v55  ;;  %v4479_v46 = vpack.c.bf16 %v2222_v26, %v2221_v47  ;;  %v4503_v48 = vpack.c.bf16 %v2386_v19, %v2385_v35  ;;  %v4507_v61 = vpack.c.bf16 %v2388_v14, %v2387_v20 }
 0x960   :  { %4470 = vmatpush3.bf16.msra.mxu1 %v4469_v51  ;;  %v2206_v23 = vmul.f32 %v7279_v49, %v7279_v49  ;;  %4496 = vmatprep.subr.bf16.mxu0 %v4495_v10  ;;  %v2389_v51 = vld [vmem:[%s8177_s16 + $0x70] sm:$0xff] }
 0x961   :  { %4472 = vmatprep.subr.bf16.mxu1 %v4471_v28  ;;  %4498 = vmatpush3.bf16.msra.mxu0 %v4495_v10  ;;  %v4511_v39 = vpack.c.bf16 %v2390_v9, %v2389_v51 }
 0x962   :  { %v4481_v13 = vpack.c.bf16 %v2206_v23, %v2205_v62  ;;  %4500 = vmatprep.subr.bf16.mxu0 %v4499_v36  ;;  %v7338_v23 = vld [vmem:[%s8179_s15] ss:$0 sm:$0xff] }
 0x964   :  { %4474 = vmatpush3.bf16.msra.mxu1 %v4473_v50 }
 0x965   :  { %4476 = vmatprep.subr.bf16.mxu1 %v4475_v0  ;;  %4502 = vmatpush3.bf16.msra.mxu0 %v4499_v36 }
 0x966   :  { %4504 = vmatprep.subr.bf16.mxu0 %v4503_v48 }
 0x968   :  { %4478 = vmatpush3.bf16.msra.mxu1 %v4477_v29 }
 0x969   :  { %4480 = vmatprep.subr.bf16.mxu1 %v4479_v46  ;;  %4506 = vmatpush3.bf16.msra.mxu0 %v4503_v48 }
 0x96a   :  { %4508 = vmatprep.subr.bf16.mxu0 %v4507_v61 }
 0x96c   :  { %4482 = vmatpush3.bf16.msra.mxu1 %v4481_v13 }
 0x96d   :  { %4510 = vmatpush3.bf16.msra.mxu0 %v4507_v61 }
 0x96e   :  { %4512 = vmatprep.subr.bf16.mxu0 %v4511_v39 }
 0x96f   :  { %2288 = vmatmul.mubr.f32.vlgmr.msra.gmra.mrb[64].mxu1 %v8271_v30 }
 0x970   :  { %2719 = vmatprep.mubr.f32.mxu1 %v8271_v30 }
 0x971   :  { %4514 = vmatpush3.bf16.msra.mxu0 %v4511_v39 }
 0xa42   :  { %v3594_v43 = vpop.f32.mrb[64].mxu1 }
 0xa43   :  { %v3595_v28 = vpop.f32.mrb[65].mxu1 }
 0xa44   :  { %v3596_v22 = vadd.f32 %v3595_v28, %v3594_v43 }
 0xa46   :  { %v2293_v32 = vmul.f32 0.00390625, %v3596_v22 }
 0xa48   :  { %v2295_v59 = vadd.f32 1e-05, %v2293_v32 }
 0xa4a   :  { %4697 = vrsqrt.f32 %v2295_v59 }
 0xa54   :  { %v4698_v50 = vpop.eup %4697 }
 0xa55   :  { %v2297_v47 = vmul.f32 %v4698_v50, %v2294_v52 }
 0xa57   :  { %v7329_v26 = vrot.slane %v2297_v47, %v5197_v25 }
 0xa59   :  { %v2304_v0 = vmul.f32 %v7329_v26, %v7072_v11  ;;  %v2305_v62 = vmul.f32 %v7329_v26, %v7077_v31  ;;  %v2306_v29 = vmul.f32 %v7329_v26, %v7110_v3  ;;  %v2307_v44 = vmul.f32 %v7329_v26, %v7115_v16 }
 0xa5a   :  { %v2308_v11 = vmul.f32 %v7329_v26, %v7134_v1  ;;  %v2309_v5 = vmul.f32 %v7329_v26, %v7139_v63  ;;  %v2310_v10 = vmul.f32 %v7329_v26, %v7162_v56  ;;  %v2311_v16 = vmul.f32 %v7329_v26, %v7167_v57 }
 0xa5b   :  { %v2344_v46 = vadd.f32 %v7338_v23, %v2305_v62  ;;  %v2343_v13 = vadd.f32 %v7338_v23, %v2304_v0  ;;  %v2345_v31 = vadd.f32 %v7338_v23, %v2306_v29  ;;  %v2346_v3 = vadd.f32 %v7338_v23, %v2307_v44 }
 0xa5c   :  { %v2347_v15 = vadd.f32 %v7338_v23, %v2308_v11  ;;  %v2348_v1 = vadd.f32 %v7338_v23, %v2309_v5  ;;  %v2312_v45 = vmul.f32 %v7329_v26, %v7190_v34  ;;  %v2349_v36 = vadd.f32 %v7338_v23, %v2310_v10 }
 0xa5d   :  { %4035 = vmatprep.mubr.f32.mxu0 %v2343_v13  ;;  %v2313_v63 = vmul.f32 %v7329_v26, %v7195_v4  ;;  %v2350_v56 = vadd.f32 %v7338_v23, %v2311_v16  ;;  %v2314_v35 = vmul.f32 %v7329_v26, %v7218_v37  ;;  %v2315_v57 = vmul.f32 %v7329_v26, %v7223_v24 }
 0xa5e   :  { %4036 = vmatmul.mubr.f32.vlgmr.msra.gmra.mrb[106].mxu0 %v2344_v46  ;;  %v2351_v19 = vadd.f32 %v7338_v23, %v2312_v45  ;;  %v2316_v48 = vmul.f32 %v7329_v26, %v7246_v40  ;;  %v2317_v4 = vmul.f32 %v7329_v26, %v7251_v41  ;;  %v2318_v14 = vmul.f32 %v7329_v26, %v7274_v55 }
 0xa5f   :  { %4038 = vmatprep.mubr.f32.mxu0 %v2345_v31  ;;  %v2352_v34 = vadd.f32 %v7338_v23, %v2313_v63  ;;  %v2353_v20 = vadd.f32 %v7338_v23, %v2314_v35  ;;  %v2354_v37 = vadd.f32 %v7338_v23, %v2315_v57  ;;  %v2319_v24 = vmul.f32 %v7329_v26, %v7279_v49 }
 0xa60   :  { %v2355_v61 = vadd.f32 %v7338_v23, %v2316_v48  ;;  %v2356_v40 = vadd.f32 %v7338_v23, %v2317_v4  ;;  %v2320_v51 = vmul.f32 %v7329_v26, %v7082_v7  ;;  %v2357_v9 = vadd.f32 %v7338_v23, %v2318_v14 }
 0xa61   :  { %v2321_v41 = vmul.f32 %v7329_v26, %v7087_v54  ;;  %v2358_v55 = vadd.f32 %v7338_v23, %v2319_v24  ;;  %v2322_v39 = vmul.f32 %v7329_v26, %v7092_v2  ;;  %v2323_v49 = vmul.f32 %v7329_v26, %v7097_v42 }
 0xa62   :  { %4039 = vmatmul.mubr.f32.gmra.mrb[108].mxu0 %v2346_v3  ;;  %v2359_v43 = vadd.f32 %v7338_v23, %v2320_v51  ;;  %v2324_v28 = vmul.f32 %v7329_v26, %v7120_v33  ;;  %v2325_v54 = vmul.f32 %v7329_v26, %v7125_v12  ;;  %v2326_v32 = vmul.f32 %v7329_v26, %v7144_v8 }
 0xa63   :  { %4041 = vmatprep.mubr.f32.mxu0 %v2347_v15  ;;  %v2360_v7 = vadd.f32 %v7338_v23, %v2321_v41  ;;  %v2361_v22 = vadd.f32 %v7338_v23, %v2322_v39  ;;  %v2362_v2 = vadd.f32 %v7338_v23, %v2323_v49  ;;  %v2327_v42 = vmul.f32 %v7329_v26, %v7153_v53 }
 0xa64   :  { %v2363_v59 = vadd.f32 %v7338_v23, %v2324_v28  ;;  %v2364_v33 = vadd.f32 %v7338_v23, %v2325_v54  ;;  %v2328_v52 = vmul.f32 %v7329_v26, %v7172_v21  ;;  %v2365_v50 = vadd.f32 %v7338_v23, %v2326_v32 }
 0xa65   :  { %v2329_v12 = vmul.f32 %v7329_v26, %v7181_v17  ;;  %v2366_v8 = vadd.f32 %v7338_v23, %v2327_v42  ;;  %v2330_v47 = vmul.f32 %v7329_v26, %v7200_v27  ;;  %v2331_v53 = vmul.f32 %v7329_v26, %v7209_v18 }
 0xa66   :  { %4042 = vmatmul.mubr.f32.gmra.mrb[110].mxu0 %v2348_v1  ;;  %v2367_v0 = vadd.f32 %v7338_v23, %v2328_v52  ;;  %v2332_v62 = vmul.f32 %v7329_v26, %v7228_v58  ;;  %v2333_v17 = vmul.f32 %v7329_v26, %v7237_v60  ;;  %v2334_v46 = vmul.f32 %v7329_v26, %v7256_v38 }
 0xa67   :  { %4044 = vmatprep.mubr.f32.mxu0 %v2349_v36  ;;  %v2368_v21 = vadd.f32 %v7338_v23, %v2329_v12  ;;  %v2369_v29 = vadd.f32 %v7338_v23, %v2330_v47  ;;  %v2370_v27 = vadd.f32 %v7338_v23, %v2331_v53  ;;  %v2335_v18 = vmul.f32 %v7329_v26, %v7265_v6 }
 0xa68   :  { %v2371_v13 = vadd.f32 %v7338_v23, %v2332_v62  ;;  %v2372_v58 = vadd.f32 %v7338_v23, %v2333_v17  ;;  %v2373_v44 = vadd.f32 %v7338_v23, %v2334_v46 }
 0xa69   :  { %v2374_v60 = vadd.f32 %v7338_v23, %v2335_v18  ;;  %v7441_v23 = vld [vmem:[%s8180_s17] ss:$0 sm:$0xff] }
 0xa6a   :  { %4045 = vmatmul.mubr.f32.gmra.mrb[112].mxu0 %v2350_v56 }
 0xa6b   :  { %4047 = vmatprep.mubr.f32.mxu0 %v2351_v19 }
 0xa6e   :  { %4048 = vmatmul.mubr.f32.gmra.mrb[114].mxu0 %v2352_v34 }
 0xa6f   :  { %4050 = vmatprep.mubr.f32.mxu0 %v2353_v20 }
 0xa72   :  { %4051 = vmatmul.mubr.f32.gmra.mrb[116].mxu0 %v2354_v37 }
 0xa73   :  { %4053 = vmatprep.mubr.f32.mxu0 %v2355_v61 }
 0xa76   :  { %4054 = vmatmul.mubr.f32.gmra.mrb[118].mxu0 %v2356_v40 }
 0xa77   :  { %4056 = vmatprep.mubr.f32.mxu0 %v2357_v9 }
 0xa7a   :  { %4057 = vmatmul.mubr.f32.gmra.mrb[120].mxu0 %v2358_v55 }
 0xa7b   :  { %4059 = vmatprep.mubr.f32.mxu0 %v2359_v43 }
 0xa7e   :  { %4060 = vmatmul.mubr.f32.gmra.mrb[122].mxu0 %v2360_v7 }
 0xa7f   :  { %4062 = vmatprep.mubr.f32.mxu0 %v2361_v22 }
 0xa82   :  { %4063 = vmatmul.mubr.f32.gmra.mrb[124].mxu0 %v2362_v2 }
 0xa83   :  { %4065 = vmatprep.mubr.f32.mxu0 %v2363_v59 }
 0xa86   :  { %4066 = vmatmul.mubr.f32.gmra.mrb[126].mxu0 %v2364_v33 }
 0xa87   :  { %4068 = vmatprep.mubr.f32.mxu0 %v2365_v50 }
 0xa8a   :  { %4069 = vmatmul.mubr.f32.gmra.mrb[128].mxu0 %v2366_v8 }
 0xa8b   :  { %4071 = vmatprep.mubr.f32.mxu0 %v2367_v0 }
 0xa8e   :  { %4072 = vmatmul.mubr.f32.gmra.mrb[130].mxu0 %v2368_v21 }
 0xa8f   :  { %4074 = vmatprep.mubr.f32.mxu0 %v2369_v29 }
 0xa92   :  { %4075 = vmatmul.mubr.f32.gmra.mrb[132].mxu0 %v2370_v27 }
 0xa93   :  { %4077 = vmatprep.mubr.f32.mxu0 %v2371_v13 }
 0xa96   :  { %4078 = vmatmul.mubr.f32.gmra.mrb[134].mxu0 %v2372_v58 }
 0xa97   :  { %4080 = vmatprep.mubr.f32.mxu0 %v2373_v44 }
 0xa9a   :  { %4081 = vmatmul.mubr.f32.gmra.mrb[136].mxu0 %v2374_v60 }
 0xb31   :  { %v4037_v11 = vpop.f32.mrb[106].mxu0 }
 0xb32   :  { %v2464_v31 = vpop.f32.mrb[107].mxu0  ;;  %v7448_v19 = vadd.f32 %v4037_v11, %v7441_v23 }
 0xb33   :  { %v7451_v57 = vadd.f32 %v7441_v23, %v2464_v31 }
 0xb34   :  { %v2624_v4 = vmax.f32 %v7448_v19, 0.0 }
 0xb35   :  { %v4040_v5 = vpop.f32.mrb[108].mxu0  ;;  %v2623_v14 = vmax.f32 %v7451_v57, 0.0 }
 0xb36   :  { %v2474_v38 = vpop.f32.mrb[109].mxu0  ;;  %v7462_v61 = vadd.f32 %v4040_v5, %v7441_v23 }
 0xb37   :  { %v7465_v24 = vadd.f32 %v7441_v23, %v2474_v38  ;;  %v4517_v28 = vpack.c.bf16 %v2624_v4, %v2623_v14 }
 0xb38   :  { %v2626_v22 = vmax.f32 %v7462_v61, 0.0 }
 0xb39   :  { %v4043_v3 = vpop.f32.mrb[110].mxu0  ;;  %v2625_v54 = vmax.f32 %v7465_v24, 0.0 }
 0xb3a   :  { %v2484_v10 = vpop.f32.mrb[111].mxu0  ;;  %v7470_v41 = vadd.f32 %v4043_v3, %v7441_v23 }
 0xb3b   :  { %v7476_v43 = vadd.f32 %v7441_v23, %v2484_v10  ;;  %v4521_v0 = vpack.c.bf16 %v2626_v22, %v2625_v54 }
 0xb3c   :  { %v2628_v42 = vmax.f32 %v7470_v41, 0.0 }
 0xb3d   :  { %v4046_v15 = vpop.f32.mrb[112].mxu0  ;;  %v2627_v50 = vmax.f32 %v7476_v43, 0.0 }
 0xb3e   :  { %v2494_v16 = vpop.f32.mrb[113].mxu0  ;;  %v7499_v12 = vadd.f32 %v4046_v15, %v7441_v23 }
 0xb3f   :  { %v7513_v53 = vadd.f32 %v7441_v23, %v2494_v16  ;;  %v4525_v46 = vpack.c.bf16 %v2628_v42, %v2627_v50 }
 0xb40   :  { %v2630_v13 = vmax.f32 %v7499_v12, 0.0 }
 0xb41   :  { %v4049_v1 = vpop.f32.mrb[114].mxu0  ;;  %v2629_v44 = vmax.f32 %v7513_v53, 0.0 }
 0xb42   :  { %v2504_v45 = vpop.f32.mrb[115].mxu0  ;;  %v7534_v60 = vadd.f32 %v4049_v1, %v7441_v23 }
 0xb43   :  { %v7537_v11 = vadd.f32 %v7441_v23, %v2504_v45 }
 0xb45   :  { %v4052_v6 = vpop.f32.mrb[116].mxu0 }
 0xb46   :  { %v7432_v26 = vpop.f32.mrb[117].mxu0  ;;  %v7542_v3 = vadd.f32 %v4052_v6, %v7441_v23  ;;  %v4529_v6 = vpack.c.bf16 %v2630_v13, %v2629_v44 }
 0xb47   :  { %v7549_v16 = vadd.f32 %v7441_v23, %v7432_v26 }
 0xb49   :  { %v7434_v36 = vpop.f32.mrb[118].mxu0 }
 0xb4a   :  { %v7436_v63 = vpop.f32.mrb[119].mxu0 }
 0xb4d   :  { %v7443_v56 = vpop.f32.mrb[120].mxu0 }
 0xb4e   :  { %v7445_v35 = vpop.f32.mrb[121].mxu0 }
 0xb51   :  { %v4061_v34 = vpop.f32.mrb[122].mxu0 }
 0xb52   :  { %v7454_v48 = vadd.f32 %v4061_v34, %v7441_v23  ;;  %v2544_v20 = vpop.f32.mrb[123].mxu0  ;;  %v8235_v34 = vmax.f32 %v7534_v60, 0.0 }
 0xb53   :  { %v7458_v37 = vadd.f32 %v7441_v23, %v2544_v20  ;;  %v8238_v20 = vmax.f32 %v7537_v11, 0.0 }
 0xb54   :  { %v2640_v40 = vmax.f32 %v7454_v48, 0.0 }
 0xb55   :  { %v2639_v51 = vmax.f32 %v7458_v37, 0.0  ;;  %v4064_v9 = vpop.f32.mrb[124].mxu0 }
 0xb56   :  { %v7473_v55 = vadd.f32 %v4064_v9, %v7441_v23  ;;  %v2554_v39 = vpop.f32.mrb[125].mxu0 }
 0xb57   :  { %v4515_v49 = vpack.c.bf16 %v2640_v40, %v2639_v51  ;;  %v7483_v7 = vadd.f32 %v7441_v23, %v2554_v39 }
 0xb58   :  { %v2642_v2 = vmax.f32 %v7473_v55, 0.0 }
 0xb59   :  { %v2641_v32 = vmax.f32 %v7483_v7, 0.0  ;;  %v4067_v59 = vpop.f32.mrb[126].mxu0  ;;  %4516 = vmatprep.subr.bf16.mxu1 %v4515_v49  ;;  %v8233_v49 = vmax.f32 %v7542_v3, 0.0 }
 0xb5a   :  { %v7495_v33 = vadd.f32 %v4067_v59, %v7441_v23  ;;  %v2564_v52 = vpop.f32.mrb[127].mxu0  ;;  %4518 = vmatpush3.bf16.msra.mxu1 %v4517_v28 }
 0xb5b   :  { %v4519_v8 = vpack.c.bf16 %v2642_v2, %v2641_v32  ;;  %v7506_v47 = vadd.f32 %v7441_v23, %v2564_v52  ;;  %v8234_v52 = vmax.f32 %v7549_v16, 0.0 }
 0xb5c   :  { %v2644_v21 = vmax.f32 %v7495_v33, 0.0 }
 0xb5d   :  { %v2643_v62 = vmax.f32 %v7506_v47, 0.0  ;;  %v4070_v29 = vpop.f32.mrb[128].mxu0  ;;  %4520 = vmatprep.subr.bf16.mxu1 %v4519_v8  ;;  %v7573_v8 = vadd.f32 %v7434_v36, %v7441_v23 }
 0xb5e   :  { %v7518_v17 = vadd.f32 %v4070_v29, %v7441_v23  ;;  %v2574_v27 = vpop.f32.mrb[129].mxu0  ;;  %4522 = vmatpush3.bf16.msra.mxu1 %v4521_v0 }
 0xb5f   :  { %v4523_v18 = vpack.c.bf16 %v2644_v21, %v2643_v62  ;;  %v7530_v58 = vadd.f32 %v7441_v23, %v2574_v27  ;;  %v4533_v27 = vpack.c.bf16 %v8235_v34, %v8238_v20 }
 0xb60   :  { %v2646_v31 = vmax.f32 %v7518_v17, 0.0 }
 0xb61   :  { %v2645_v5 = vmax.f32 %v7530_v58, 0.0  ;;  %v4073_v38 = vpop.f32.mrb[130].mxu0  ;;  %4524 = vmatprep.subr.bf16.mxu1 %v4523_v18 }
 0xb62   :  { %v7545_v10 = vadd.f32 %v4073_v38, %v7441_v23  ;;  %v2584_v15 = vpop.f32.mrb[131].mxu0  ;;  %4526 = vmatpush3.bf16.msra.mxu1 %v4525_v46  ;;  %v7588_v46 = vadd.f32 %v7441_v23, %v7436_v63 }
 0xb63   :  { %v4527_v1 = vpack.c.bf16 %v2646_v31, %v2645_v5  ;;  %v7556_v45 = vadd.f32 %v7441_v23, %v2584_v15 }
 0xb64   :  { %v2648_v26 = vmax.f32 %v7545_v10, 0.0 }
 0xb65   :  { %v2647_v9 = vmax.f32 %v7556_v45, 0.0  ;;  %v4076_v39 = vpop.f32.mrb[132].mxu0  ;;  %4528 = vmatprep.subr.bf16.mxu1 %v4527_v1 }
 0xb66   :  { %v7568_v28 = vadd.f32 %v4076_v39, %v7441_v23  ;;  %v2594_v59 = vpop.f32.mrb[133].mxu0  ;;  %4530 = vmatpush3.bf16.msra.mxu1 %v4529_v6  ;;  %v4537_v6 = vpack.c.bf16 %v8233_v49, %v8234_v52  ;;  %v8243_v39 = vmax.f32 %v7573_v8, 0.0 }
 0xb67   :  { %v4531_v0 = vpack.c.bf16 %v2648_v26, %v2647_v9  ;;  %v7580_v29 = vadd.f32 %v7441_v23, %v2594_v59 }
 0xb68   :  { %v8236_v36 = vmax.f32 %v7568_v28, 0.0 }
 0xb69   :  { %v8237_v18 = vmax.f32 %v7580_v29, 0.0  ;;  %v4079_v38 = vpop.f32.mrb[134].mxu0  ;;  %4532 = vmatprep.subr.bf16.mxu1 %v4531_v0  ;;  %v8244_v0 = vmax.f32 %v7588_v46, 0.0  ;;  %v8306_v10 = vmax.f32 %v7580_v29, 0.0 }
 0xb6a   :  { %v7593_v15 = vadd.f32 %v4079_v38, %v7441_v23  ;;  %v2604_v1 = vpop.f32.mrb[135].mxu0  ;;  %4534 = vmatpush3.bf16.msra.mxu1 %v4533_v27  ;;  %v7610_v27 = vadd.f32 %v7443_v56, %v7441_v23  ;;  %v7614_v38 = vadd.f32 %v7441_v23, %v7445_v35 }
 0xb6b   :  { %v4535_v63 = vpack.c.bf16 %v8236_v36, %v8237_v18  ;;  %v7605_v59 = vadd.f32 %v7441_v23, %v2604_v1  ;;  %v4541_v35 = vpack.c.bf16 %v8243_v39, %v8244_v0 }
 0xb6c   :  { %v8245_v49 = vmax.f32 %v7593_v15, 0.0 }
 0xb6d   :  { %v2651_v52 = vmax.f32 %v7605_v59, 0.0  ;;  %v4082_v34 = vpop.f32.mrb[136].mxu0  ;;  %4536 = vmatprep.subr.bf16.mxu1 %v4535_v63  ;;  %v8241_v63 = vmax.f32 %v7610_v27, 0.0 }
 0xb6e   :  { %v7619_v36 = vadd.f32 %v4082_v34, %v7441_v23  ;;  %v2614_v1 = vpop.f32.mrb[137].mxu0  ;;  %4538 = vmatpush3.bf16.msra.mxu1 %v4537_v6  ;;  %v8242_v34 = vmax.f32 %v7614_v38, 0.0 }
 0xb6f   :  { %v4539_v56 = vpack.c.bf16 %v8245_v49, %v2651_v52  ;;  %v7626_v18 = vadd.f32 %v7441_v23, %v2614_v1 }
 0xb70   :  { %v8239_v20 = vmax.f32 %v7619_v36, 0.0  ;;  %v4545_v1 = vpack.c.bf16 %v8241_v63, %v8242_v34 }
 0xb71   :  { %v8240_v6 = vmax.f32 %v7626_v18, 0.0  ;;  %4540 = vmatprep.subr.bf16.mxu1 %v4539_v56  ;;  %v2946_v56 = vld [vmem:[%s8181_s20] sm:$0xff] }
 0xb72   :  { %4542 = vmatpush3.bf16.msra.mxu1 %v4541_v35  ;;  %v2947_v35 = vld [vmem:[%s8181_s20 + $0x8] sm:$0xff] }
 0xb73   :  { %v4543_v23 = vpack.c.bf16 %v8239_v20, %v8240_v6  ;;  %v2948_v20 = vld [vmem:[%s8181_s20 + $0x10] sm:$0xff]  ;;  %v4579_v6 = vpack.c.bf16 %v2947_v35, %v2946_v56 }
 0xb75   :  { %4544 = vmatprep.subr.bf16.mxu1 %v4543_v23  ;;  %v2949_v23 = vld [vmem:[%s8181_s20 + $0x18] sm:$0xff]  ;;  %4580 = vmatprep.subr.bf16.mxu0 %v4579_v6 }
 0xb76   :  { %4546 = vmatpush3.bf16.msra.mxu1 %v4545_v1  ;;  %v4583_v1 = vpack.c.bf16 %v2949_v23, %v2948_v20  ;;  %4582 = vmatpush3.bf16.msra.mxu0 %v4579_v6 }
 0xb78   :  { %4584 = vmatprep.subr.bf16.mxu0 %v4583_v1 }
 0xb79   :  { %2720 = vmatmul.mubr.f32.vlgmr.msra.gmra.mrb[66].mxu1 %v8271_v30 }
 0xb7a   :  { %2858 = vmatprep.mubr.f32.mxu1 %v8271_v30  ;;  %4586 = vmatpush3.bf16.msra.mxu0 %v4583_v1  ;;  %v8307_v1 = vmax.f32 %v7568_v28, 0.0 }
 0xc4c   :  { %v3677_v63 = vpop.f32.mrb[66].mxu1 }
 0xc4d   :  { %v3678_v34 = vpop.f32.mrb[67].mxu1 }
 0xc4e   :  { %v3679_v39 = vadd.f32 %v3678_v34, %v3677_v63  ;;  %v8305_v63 = vmax.f32 %v7534_v60, 0.0 }
 0xc50   :  { %v2725_v0 = vmul.f32 0.00390625, %v3679_v39 }
 0xc52   :  { %v7659_v49 = vrot.slane %v2725_v0, %v5197_v25 }
 0xc54   :  { %v7664_v56 = vsub.f32 %v2623_v14, %v7659_v49  ;;  %v7669_v20 = vsub.f32 %v2624_v4, %v7659_v49  ;;  %v7674_v6 = vsub.f32 %v2639_v51, %v7659_v49  ;;  %v7679_v39 = vsub.f32 %v2640_v40, %v7659_v49 }
 0xc55   :  { %v7684_v57 = vsub.f32 %v2641_v32, %v7659_v49  ;;  %v7689_v19 = vsub.f32 %v2642_v2, %v7659_v49  ;;  %v7702_v40 = vsub.f32 %v2625_v54, %v7659_v49  ;;  %v7707_v51 = vsub.f32 %v2626_v22, %v7659_v49 }
 0xc56   :  { %v2762_v4 = vmul.f32 %v7664_v56, %v7664_v56  ;;  %v2763_v37 = vmul.f32 %v7669_v20, %v7669_v20  ;;  %v2778_v48 = vmul.f32 %v7674_v6, %v7674_v6  ;;  %v2779_v14 = vmul.f32 %v7679_v39, %v7679_v39 }
 0xc57   :  { %v7712_v55 = vsub.f32 %v2643_v62, %v7659_v49  ;;  %v7717_v7 = vsub.f32 %v2644_v21, %v7659_v49  ;;  %v2780_v24 = vmul.f32 %v7684_v57, %v7684_v57  ;;  %v2781_v54 = vmul.f32 %v7689_v19, %v7689_v19 }
 0xc58   :  { %v7726_v61 = vsub.f32 %v2627_v50, %v7659_v49  ;;  %v4547_v22 = vpack.c.bf16 %v2779_v14, %v2778_v48  ;;  %v4549_v2 = vpack.c.bf16 %v2763_v37, %v2762_v4  ;;  %v7731_v32 = vsub.f32 %v2628_v42, %v7659_v49 }
 0xc59   :  { %v7736_v33 = vsub.f32 %v2645_v5, %v7659_v49  ;;  %v2764_v47 = vmul.f32 %v7702_v40, %v7702_v40  ;;  %v2765_v43 = vmul.f32 %v7707_v51, %v7707_v51  ;;  %v7745_v50 = vsub.f32 %v2646_v31, %v7659_v49 }
 0xc5a   :  { %v2782_v41 = vmul.f32 %v7712_v55, %v7712_v55  ;;  %v2783_v42 = vmul.f32 %v7717_v7, %v7717_v7  ;;  %4548 = vmatprep.subr.bf16.mxu1 %v4547_v22  ;;  %v4551_v21 = vpack.c.bf16 %v2781_v54, %v2780_v24  ;;  %v7754_v62 = vsub.f32 %v2629_v44, %v7659_v49 }
 0xc5b   :  { %4550 = vmatpush3.bf16.msra.mxu1 %v4549_v2  ;;  %v7759_v17 = vsub.f32 %v2630_v13, %v7659_v49  ;;  %v7764_v58 = vsub.f32 %v2647_v9, %v7659_v49  ;;  %v2766_v31 = vmul.f32 %v7726_v61, %v7726_v61  ;;  %v2767_v5 = vmul.f32 %v7731_v32, %v7731_v32 }
 0xc5c   :  { %4552 = vmatprep.subr.bf16.mxu1 %v4551_v21  ;;  %v4553_v53 = vpack.c.bf16 %v2765_v43, %v2764_v47  ;;  %v7773_v44 = vsub.f32 %v2648_v26, %v7659_v49  ;;  %v2784_v12 = vmul.f32 %v7736_v33, %v7736_v33  ;;  %v2785_v13 = vmul.f32 %v7745_v50, %v7745_v50 }
 0xc5d   :  { %v4555_v45 = vpack.c.bf16 %v2783_v42, %v2782_v41  ;;  %v8304_v9 = vmax.f32 %v7537_v11, 0.0  ;;  %v7787_v34 = vsub.f32 %v8305_v63, %v7659_v49  ;;  %v7792_v26 = vsub.f32 %v8306_v10, %v7659_v49 }
 0xc5e   :  { %v2768_v35 = vmul.f32 %v7754_v62, %v7754_v62  ;;  %v2769_v23 = vmul.f32 %v7759_v17, %v7759_v17  ;;  %v4557_v11 = vpack.c.bf16 %v2767_v5, %v2766_v31  ;;  %v7801_v4 = vsub.f32 %v8307_v1, %v7659_v49 }
 0xc5f   :  { %4554 = vmatpush3.bf16.msra.mxu1 %v4553_v53  ;;  %v7782_v0 = vsub.f32 %v8304_v9, %v7659_v49  ;;  %v2786_v60 = vmul.f32 %v7764_v58, %v7764_v58  ;;  %v2787_v29 = vmul.f32 %v7773_v44, %v7773_v44  ;;  %v4559_v37 = vpack.c.bf16 %v2785_v13, %v2784_v12 }
 0xc60   :  { %4556 = vmatprep.subr.bf16.mxu1 %v4555_v45  ;;  %v8308_v48 = vmax.f32 %v7549_v16, 0.0  ;;  %v8309_v24 = vmax.f32 %v7542_v3, 0.0  ;;  %v7820_v28 = vsub.f32 %v2651_v52, %v7659_v49  ;;  %v2771_v2 = vmul.f32 %v7787_v34, %v7787_v34 }
 0xc61   :  { %v2770_v22 = vmul.f32 %v7782_v0, %v7782_v0  ;;  %v4561_v16 = vpack.c.bf16 %v2769_v23, %v2768_v35  ;;  %v8310_v47 = vmax.f32 %v7593_v15, 0.0  ;;  %v2788_v3 = vmul.f32 %v7792_v26, %v7792_v26 }
 0xc62   :  { %v7810_v14 = vsub.f32 %v8308_v48, %v7659_v49  ;;  %v7815_v54 = vsub.f32 %v8309_v24, %v7659_v49  ;;  %v2789_v59 = vmul.f32 %v7801_v4, %v7801_v4  ;;  %v4563_v52 = vpack.c.bf16 %v2787_v29, %v2786_v60 }
 0xc63   :  { %4558 = vmatpush3.bf16.msra.mxu1 %v4557_v11  ;;  %v7829_v43 = vsub.f32 %v8310_v47, %v7659_v49  ;;  %v8311_v41 = vmax.f32 %v7588_v46, 0.0  ;;  %v8312_v21 = vmax.f32 %v7573_v8, 0.0  ;;  %v8313_v15 = vmax.f32 %v7626_v18, 0.0  ;;  %v2952_v47 = vld [vmem:[%s8181_s20 + $0x30] sm:$0xff] }
 0xc64   :  { %4560 = vmatprep.subr.bf16.mxu1 %v4559_v37  ;;  %v2772_v53 = vmul.f32 %v7810_v14, %v7810_v14  ;;  %v2773_v12 = vmul.f32 %v7815_v54, %v7815_v54  ;;  %v4565_v46 = vpack.c.bf16 %v2771_v2, %v2770_v22  ;;  %v8314_v13 = vmax.f32 %v7619_v36, 0.0  ;;  %v2950_v22 = vld [vmem:[%s8181_s20 + $0x20] sm:$0xff]  ;;  %v2951_v2 = vld [vmem:[%s8181_s20 + $0x28] sm:$0xff] }
 0xc65   :  { %v7838_v42 = vsub.f32 %v8311_v41, %v7659_v49  ;;  %v7843_v31 = vsub.f32 %v8312_v21, %v7659_v49  ;;  %v7848_v5 = vsub.f32 %v8313_v15, %v7659_v49  ;;  %v2790_v8 = vmul.f32 %v7820_v28, %v7820_v28  ;;  %v2956_v21 = vld [vmem:[%s8181_s20 + $0x50] sm:$0xff]  ;;  %v2957_v15 = vld [vmem:[%s8181_s20 + $0x58] sm:$0xff] }
 0xc66   :  { %v7857_v45 = vsub.f32 %v8314_v13, %v7659_v49  ;;  %v2791_v18 = vmul.f32 %v7829_v43, %v7829_v43  ;;  %v4567_v9 = vpack.c.bf16 %v2789_v59, %v2788_v3  ;;  %v8315_v63 = vmax.f32 %v7614_v38, 0.0  ;;  %v2953_v3 = vld [vmem:[%s8181_s20 + $0x38] sm:$0xff]  ;;  %v2954_v59 = vld [vmem:[%s8181_s20 + $0x40] sm:$0xff] }
 0xc67   :  { %4562 = vmatpush3.bf16.msra.mxu1 %v4561_v16  ;;  %v8316_v35 = vmax.f32 %v7610_v27, 0.0  ;;  %v2774_v23 = vmul.f32 %v7838_v42, %v7838_v42  ;;  %v2775_v11 = vmul.f32 %v7843_v31, %v7843_v31  ;;  %v4569_v1 = vpack.c.bf16 %v2773_v12, %v2772_v53  ;;  %v2958_v12 = vld [vmem:[%s8181_s20 + $0x60] sm:$0xff] }
 0xc68   :  { %4564 = vmatprep.subr.bf16.mxu1 %v4563_v52  ;;  %v7866_v10 = vsub.f32 %v8315_v63, %v7659_v49  ;;  %v2792_v60 = vmul.f32 %v7848_v5, %v7848_v5  ;;  %v2793_v38 = vmul.f32 %v7857_v45, %v7857_v45  ;;  %v4571_v29 = vpack.c.bf16 %v2791_v18, %v2790_v8  ;;  %v2955_v52 = vld [vmem:[%s8181_s20 + $0x48] sm:$0xff]  ;;  %v2960_v8 = vld [vmem:[%s8181_s20 + $0x70] sm:$0xff]  ;;  %v2961_v18 = vld [vmem:[%s8181_s20 + $0x78] sm:$0xff] }
 0xc69   :  { %v7871_v36 = vsub.f32 %v8316_v35, %v7659_v49  ;;  %v4573_v37 = vpack.c.bf16 %v2775_v11, %v2774_v23  ;;  %v4587_v16 = vpack.c.bf16 %v2951_v2, %v2950_v22  ;;  %v4595_v41 = vpack.c.bf16 %v2955_v52, %v2954_v59 }
 0xc6a   :  { %v2776_v49 = vmul.f32 %v7866_v10, %v7866_v10  ;;  %v4575_v48 = vpack.c.bf16 %v2793_v38, %v2792_v60  ;;  %v4599_v53 = vpack.c.bf16 %v2957_v15, %v2956_v21  ;;  %v2865_v60 = vld [vmem:[%s8182_s18] sm:$0x1] }
 0xc6b   :  { %4566 = vmatpush3.bf16.msra.mxu1 %v4565_v46  ;;  %v2777_v27 = vmul.f32 %v7871_v36, %v7871_v36  ;;  %4588 = vmatprep.subr.bf16.mxu0 %v4587_v16  ;;  %v2959_v46 = vld [vmem:[%s8181_s20 + $0x68] sm:$0xff] }
 0xc6c   :  { %4568 = vmatprep.subr.bf16.mxu1 %v4567_v9  ;;  %4590 = vmatpush3.bf16.msra.mxu0 %v4587_v16  ;;  %v4603_v13 = vpack.c.bf16 %v2959_v46, %v2958_v12  ;;  %v4607_v9 = vpack.c.bf16 %v2961_v18, %v2960_v8 }
 0xc6d   :  { %v4577_v24 = vpack.c.bf16 %v2777_v27, %v2776_v49 }
 0xc6f   :  { %4570 = vmatpush3.bf16.msra.mxu1 %v4569_v1 }
 0xc70   :  { %4572 = vmatprep.subr.bf16.mxu1 %v4571_v29 }
 0xc73   :  { %4574 = vmatpush3.bf16.msra.mxu1 %v4573_v37 }
 0xc74   :  { %4576 = vmatprep.subr.bf16.mxu1 %v4575_v48  ;;  %v7935_v48 = vld [vmem:[%s8183_s19] ss:$0 sm:$0xff] }
 0xc77   :  { %4578 = vmatpush3.bf16.msra.mxu1 %v4577_v24 }
 0xc7a   :  { %2859 = vmatmul.mubr.f32.vlgmr.msra.gmra.mrb[68].mxu1 %v8271_v30  ;;  %v4591_v30 = vpack.c.bf16 %v2953_v3, %v2952_v47 }
 0xc7c   :  { %4592 = vmatprep.subr.bf16.mxu0 %v4591_v30 }
 0xc7d   :  { %4594 = vmatpush3.bf16.msra.mxu0 %v4591_v30 }
 0xc7e   :  { %4596 = vmatprep.subr.bf16.mxu0 %v4595_v41 }
 0xc81   :  { %4598 = vmatpush3.bf16.msra.mxu0 %v4595_v41 }
 0xc82   :  { %4600 = vmatprep.subr.bf16.mxu0 %v4599_v53 }
 0xc85   :  { %4602 = vmatpush3.bf16.msra.mxu0 %v4599_v53 }
 0xc86   :  { %4604 = vmatprep.subr.bf16.mxu0 %v4603_v13 }
 0xc89   :  { %4606 = vmatpush3.bf16.msra.mxu0 %v4603_v13 }
 0xc8a   :  { %4608 = vmatprep.subr.bf16.mxu0 %v4607_v9 }
 0xc8d   :  { %4610 = vmatpush3.bf16.msra.mxu0 %v4607_v9 }
 0xd4d   :  { %v3712_v63 = vpop.f32.mrb[68].mxu1 }
 0xd4e   :  { %v3713_v35 = vpop.f32.mrb[69].mxu1 }
 0xd4f   :  { %v3714_v23 = vadd.f32 %v3713_v35, %v3712_v63 }
 0xd51   :  { %v2864_v11 = vmul.f32 0.00390625, %v3714_v23 }
 0xd53   :  { %v2866_v1 = vadd.f32 1e-05, %v2864_v11 }
 0xd55   :  { %4699 = vrsqrt.f32 %v2866_v1 }
 0xd5f   :  { %v4700_v38 = vpop.eup %4699 }
 0xd60   :  { %v2868_v29 = vmul.f32 %v4700_v38, %v2865_v60 }
 0xd62   :  { %v7926_v49 = vrot.slane %v2868_v29, %v5197_v25 }
 0xd64   :  { %v2875_v27 = vmul.f32 %v7926_v49, %v7664_v56  ;;  %v2876_v37 = vmul.f32 %v7926_v49, %v7669_v20  ;;  %v2877_v24 = vmul.f32 %v7926_v49, %v7702_v40  ;;  %v2878_v25 = vmul.f32 %v7926_v49, %v7707_v51 }
 0xd65   :  { %v2879_v56 = vmul.f32 %v7926_v49, %v7726_v61  ;;  %v2880_v16 = vmul.f32 %v7926_v49, %v7731_v32  ;;  %v2881_v47 = vmul.f32 %v7926_v49, %v7754_v62  ;;  %v2882_v51 = vmul.f32 %v7926_v49, %v7759_v17 }
 0xd66   :  { %v2915_v22 = vadd.f32 %v7935_v48, %v2876_v37  ;;  %v2914_v2 = vadd.f32 %v7935_v48, %v2875_v27  ;;  %v2916_v20 = vadd.f32 %v7935_v48, %v2877_v24  ;;  %v2917_v40 = vadd.f32 %v7935_v48, %v2878_v25 }
 0xd67   :  { %v2918_v3 = vadd.f32 %v7935_v48, %v2879_v56  ;;  %v2919_v61 = vadd.f32 %v7935_v48, %v2880_v16  ;;  %v2883_v30 = vmul.f32 %v7926_v49, %v7782_v0  ;;  %v2920_v59 = vadd.f32 %v7935_v48, %v2881_v47 }
 0xd68   :  { %4115 = vmatprep.mubr.f32.mxu0 %v2914_v2  ;;  %v2884_v32 = vmul.f32 %v7926_v49, %v7787_v34  ;;  %v2921_v62 = vadd.f32 %v7935_v48, %v2882_v51  ;;  %v2885_v52 = vmul.f32 %v7926_v49, %v7810_v14  ;;  %v2886_v17 = vmul.f32 %v7926_v49, %v7815_v54 }
 0xd69   :  { %4116 = vmatmul.mubr.f32.vlgmr.msra.gmra.mrb[138].mxu0 %v2915_v22  ;;  %v2922_v41 = vadd.f32 %v7935_v48, %v2883_v30  ;;  %v2887_v21 = vmul.f32 %v7926_v49, %v7838_v42  ;;  %v2888_v34 = vmul.f32 %v7926_v49, %v7843_v31  ;;  %v2889_v53 = vmul.f32 %v7926_v49, %v7866_v10 }
 0xd6a   :  { %4118 = vmatprep.mubr.f32.mxu0 %v2916_v20  ;;  %v2923_v0 = vadd.f32 %v7935_v48, %v2884_v32  ;;  %v2924_v15 = vadd.f32 %v7935_v48, %v2885_v52  ;;  %v2925_v14 = vadd.f32 %v7935_v48, %v2886_v17  ;;  %v2890_v54 = vmul.f32 %v7926_v49, %v7871_v36 }
 0xd6b   :  { %v2926_v12 = vadd.f32 %v7935_v48, %v2887_v21  ;;  %v2927_v42 = vadd.f32 %v7935_v48, %v2888_v34  ;;  %v2891_v46 = vmul.f32 %v7926_v49, %v7674_v6  ;;  %v2928_v13 = vadd.f32 %v7935_v48, %v2889_v53 }
 0xd6c   :  { %v2892_v31 = vmul.f32 %v7926_v49, %v7679_v39  ;;  %v2929_v10 = vadd.f32 %v7935_v48, %v2890_v54  ;;  %v2893_v8 = vmul.f32 %v7926_v49, %v7684_v57  ;;  %v2894_v36 = vmul.f32 %v7926_v49, %v7689_v19 }
 0xd6d   :  { %4119 = vmatmul.mubr.f32.gmra.mrb[140].mxu0 %v2917_v40  ;;  %v2930_v18 = vadd.f32 %v7935_v48, %v2891_v46  ;;  %v2895_v9 = vmul.f32 %v7926_v49, %v7712_v55  ;;  %v2896_v39 = vmul.f32 %v7926_v49, %v7717_v7  ;;  %v2897_v35 = vmul.f32 %v7926_v49, %v7736_v33 }
 0xd6e   :  { %4121 = vmatprep.mubr.f32.mxu0 %v2918_v3  ;;  %v2931_v6 = vadd.f32 %v7935_v48, %v2892_v31  ;;  %v2932_v63 = vadd.f32 %v7935_v48, %v2893_v8  ;;  %v2933_v57 = vadd.f32 %v7935_v48, %v2894_v36  ;;  %v2898_v19 = vmul.f32 %v7926_v49, %v7745_v50 }
 0xd6f   :  { %v2934_v23 = vadd.f32 %v7935_v48, %v2895_v9  ;;  %v2935_v55 = vadd.f32 %v7935_v48, %v2896_v39  ;;  %v2899_v11 = vmul.f32 %v7926_v49, %v7764_v58  ;;  %v2936_v1 = vadd.f32 %v7935_v48, %v2897_v35 }
 0xd70   :  { %v2900_v7 = vmul.f32 %v7926_v49, %v7773_v44  ;;  %v2937_v33 = vadd.f32 %v7935_v48, %v2898_v19  ;;  %v2901_v60 = vmul.f32 %v7926_v49, %v7792_v26  ;;  %v2902_v50 = vmul.f32 %v7926_v49, %v7801_v4 }
 0xd71   :  { %4122 = vmatmul.mubr.f32.gmra.mrb[142].mxu0 %v2919_v61  ;;  %v2938_v38 = vadd.f32 %v7935_v48, %v2899_v11  ;;  %v2903_v29 = vmul.f32 %v7926_v49, %v7820_v28  ;;  %v2904_v44 = vmul.f32 %v7926_v49, %v7829_v43  ;;  %v2905_v37 = vmul.f32 %v7926_v49, %v7848_v5  ;;  %v8032_v5 = vld [vmem:[%s8184_s21] ss:$0 sm:$0xff] }
 0xd72   :  { %4124 = vmatprep.mubr.f32.mxu0 %v2920_v59  ;;  %v2939_v58 = vadd.f32 %v7935_v48, %v2900_v7  ;;  %v2940_v27 = vadd.f32 %v7935_v48, %v2901_v60  ;;  %v2941_v26 = vadd.f32 %v7935_v48, %v2902_v50  ;;  %v2906_v4 = vmul.f32 %v7926_v49, %v7857_v45 }
 0xd73   :  { %v2942_v24 = vadd.f32 %v7935_v48, %v2903_v29  ;;  %v2943_v28 = vadd.f32 %v7935_v48, %v2904_v44  ;;  %v2944_v22 = vadd.f32 %v7935_v48, %v2905_v37 }
 0xd74   :  { %v2945_v43 = vadd.f32 %v7935_v48, %v2906_v4 }
 0xd75   :  { %4125 = vmatmul.mubr.f32.gmra.mrb[144].mxu0 %v2921_v62 }
 0xd76   :  { %4127 = vmatprep.mubr.f32.mxu0 %v2922_v41 }
 0xd79   :  { %4128 = vmatmul.mubr.f32.gmra.mrb[146].mxu0 %v2923_v0 }
 0xd7a   :  { %4130 = vmatprep.mubr.f32.mxu0 %v2924_v15 }
 0xd7d   :  { %4131 = vmatmul.mubr.f32.gmra.mrb[148].mxu0 %v2925_v14 }
 0xd7e   :  { %4133 = vmatprep.mubr.f32.mxu0 %v2926_v12 }
 0xd81   :  { %4134 = vmatmul.mubr.f32.gmra.mrb[150].mxu0 %v2927_v42 }
 0xd82   :  { %4136 = vmatprep.mubr.f32.mxu0 %v2928_v13 }
 0xd85   :  { %4137 = vmatmul.mubr.f32.gmra.mrb[152].mxu0 %v2929_v10 }
 0xd86   :  { %4139 = vmatprep.mubr.f32.mxu0 %v2930_v18 }
 0xd89   :  { %4140 = vmatmul.mubr.f32.gmra.mrb[154].mxu0 %v2931_v6 }
 0xd8a   :  { %4142 = vmatprep.mubr.f32.mxu0 %v2932_v63 }
 0xd8d   :  { %4143 = vmatmul.mubr.f32.gmra.mrb[156].mxu0 %v2933_v57 }
 0xd8e   :  { %4145 = vmatprep.mubr.f32.mxu0 %v2934_v23 }
 0xd91   :  { %4146 = vmatmul.mubr.f32.gmra.mrb[158].mxu0 %v2935_v55 }
 0xd92   :  { %4148 = vmatprep.mubr.f32.mxu0 %v2936_v1 }
 0xd95   :  { %4149 = vmatmul.mubr.f32.gmra.mrb[160].mxu0 %v2937_v33 }
 0xd96   :  { %4151 = vmatprep.mubr.f32.mxu0 %v2938_v38 }
 0xd99   :  { %4152 = vmatmul.mubr.f32.gmra.mrb[162].mxu0 %v2939_v58 }
 0xd9a   :  { %4154 = vmatprep.mubr.f32.mxu0 %v2940_v27 }
 0xd9d   :  { %4155 = vmatmul.mubr.f32.gmra.mrb[164].mxu0 %v2941_v26 }
 0xd9e   :  { %4157 = vmatprep.mubr.f32.mxu0 %v2942_v24 }
 0xda1   :  { %4158 = vmatmul.mubr.f32.gmra.mrb[166].mxu0 %v2943_v28 }
 0xda2   :  { %4160 = vmatprep.mubr.f32.mxu0 %v2944_v22 }
 0xda5   :  { %4161 = vmatmul.mubr.f32.gmra.mrb[168].mxu0 %v2945_v43 }
 0xe3c   :  { %v4117_v2 = vpop.f32.mrb[138].mxu0 }
 0xe3d   :  { %v3041_v25 = vadd.f32 %v4117_v2, %v8032_v5  ;;  %v3035_v56 = vpop.f32.mrb[139].mxu0 }
 0xe3e   :  { %v3036_v45 = vadd.f32 %v8032_v5, %v3035_v56 }
 0xe3f   :  { %3195 = vst [vmem:[%s8185_s22 + $0x8] sm:$0xff] %v3041_v25 }
 0xe40   :  { %3194 = vst [vmem:[%s8185_s22] sm:$0xff] %v3036_v45  ;;  %v4120_v49 = vpop.f32.mrb[140].mxu0 }
 0xe41   :  { %v3051_v48 = vadd.f32 %v4120_v49, %v8032_v5  ;;  %v3045_v20 = vpop.f32.mrb[141].mxu0 }
 0xe42   :  { %v3046_v16 = vadd.f32 %v8032_v5, %v3045_v20 }
 0xe43   :  { %3197 = vst [vmem:[%s8185_s22 + $0x18] sm:$0xff] %v3051_v48 }
 0xe44   :  { %3196 = vst [vmem:[%s8185_s22 + $0x10] sm:$0xff] %v3046_v16  ;;  %v4123_v40 = vpop.f32.mrb[142].mxu0 }
 0xe45   :  { %v3061_v47 = vadd.f32 %v4123_v40, %v8032_v5  ;;  %v3055_v3 = vpop.f32.mrb[143].mxu0 }
 0xe46   :  { %v3056_v51 = vadd.f32 %v8032_v5, %v3055_v3 }
 0xe47   :  { %3199 = vst [vmem:[%s8185_s22 + $0x28] sm:$0xff] %v3061_v47 }
 0xe48   :  { %3198 = vst [vmem:[%s8185_s22 + $0x20] sm:$0xff] %v3056_v51  ;;  %v4126_v61 = vpop.f32.mrb[144].mxu0 }
 0xe49   :  { %v3071_v30 = vadd.f32 %v4126_v61, %v8032_v5  ;;  %v3065_v59 = vpop.f32.mrb[145].mxu0 }
 0xe4a   :  { %v3066_v32 = vadd.f32 %v8032_v5, %v3065_v59 }
 0xe4b   :  { %3201 = vst [vmem:[%s8185_s22 + $0x38] sm:$0xff] %v3071_v30 }
 0xe4c   :  { %3200 = vst [vmem:[%s8185_s22 + $0x30] sm:$0xff] %v3066_v32  ;;  %v4129_v62 = vpop.f32.mrb[146].mxu0 }
 0xe4d   :  { %v3081_v52 = vadd.f32 %v4129_v62, %v8032_v5  ;;  %v3075_v41 = vpop.f32.mrb[147].mxu0 }
 0xe4e   :  { %v3076_v17 = vadd.f32 %v8032_v5, %v3075_v41 }
 0xe4f   :  { %3203 = vst [vmem:[%s8185_s22 + $0x48] sm:$0xff] %v3081_v52 }
 0xe50   :  { %3202 = vst [vmem:[%s8185_s22 + $0x40] sm:$0xff] %v3076_v17  ;;  %v4132_v0 = vpop.f32.mrb[148].mxu0 }
 0xe51   :  { %v3091_v21 = vadd.f32 %v4132_v0, %v8032_v5  ;;  %v3085_v15 = vpop.f32.mrb[149].mxu0 }
 0xe52   :  { %v3086_v34 = vadd.f32 %v8032_v5, %v3085_v15 }
 0xe53   :  { %3205 = vst [vmem:[%s8185_s22 + $0x58] sm:$0xff] %v3091_v21 }
 0xe54   :  { %3204 = vst [vmem:[%s8185_s22 + $0x50] sm:$0xff] %v3086_v34  ;;  %v4135_v14 = vpop.f32.mrb[150].mxu0 }
 0xe55   :  { %v3101_v53 = vadd.f32 %v4135_v14, %v8032_v5  ;;  %v3095_v12 = vpop.f32.mrb[151].mxu0 }
 0xe56   :  { %v3096_v54 = vadd.f32 %v8032_v5, %v3095_v12 }
 0xe57   :  { %3207 = vst [vmem:[%s8185_s22 + $0x68] sm:$0xff] %v3101_v53 }
 0xe58   :  { %3206 = vst [vmem:[%s8185_s22 + $0x60] sm:$0xff] %v3096_v54  ;;  %v4138_v42 = vpop.f32.mrb[152].mxu0 }
 0xe59   :  { %v3111_v46 = vadd.f32 %v4138_v42, %v8032_v5  ;;  %v3105_v13 = vpop.f32.mrb[153].mxu0 }
 0xe5a   :  { %v3106_v31 = vadd.f32 %v8032_v5, %v3105_v13 }
 0xe5b   :  { %3209 = vst [vmem:[%s8185_s22 + $0x78] sm:$0xff] %v3111_v46 }
 0xe5c   :  { %3208 = vst [vmem:[%s8185_s22 + $0x70] sm:$0xff] %v3106_v31  ;;  %v4141_v10 = vpop.f32.mrb[154].mxu0 }
 0xe5d   :  { %v3121_v8 = vadd.f32 %v4141_v10, %v8032_v5  ;;  %v3115_v18 = vpop.f32.mrb[155].mxu0 }
 0xe5e   :  { %v3116_v36 = vadd.f32 %v8032_v5, %v3115_v18 }
 0xe5f   :  { %3211 = vst [vmem:[%s8185_s22 + $0x88] sm:$0xff] %v3121_v8 }
 0xe60   :  { %3210 = vst [vmem:[%s8185_s22 + $0x80] sm:$0xff] %v3116_v36  ;;  %v4144_v6 = vpop.f32.mrb[156].mxu0 }
 0xe61   :  { %v3131_v9 = vadd.f32 %v4144_v6, %v8032_v5  ;;  %v3125_v63 = vpop.f32.mrb[157].mxu0 }
 0xe62   :  { %v3126_v39 = vadd.f32 %v8032_v5, %v3125_v63 }
 0xe63   :  { %3213 = vst [vmem:[%s8185_s22 + $0x98] sm:$0xff] %v3131_v9 }
 0xe64   :  { %3212 = vst [vmem:[%s8185_s22 + $0x90] sm:$0xff] %v3126_v39  ;;  %v4147_v57 = vpop.f32.mrb[158].mxu0 }
 0xe65   :  { %v3141_v35 = vadd.f32 %v4147_v57, %v8032_v5  ;;  %v3135_v23 = vpop.f32.mrb[159].mxu0 }
 0xe66   :  { %v3136_v19 = vadd.f32 %v8032_v5, %v3135_v23 }
 0xe67   :  { %3215 = vst [vmem:[%s8185_s22 + $0xa8] sm:$0xff] %v3141_v35 }
 0xe68   :  { %3214 = vst [vmem:[%s8185_s22 + $0xa0] sm:$0xff] %v3136_v19  ;;  %v4150_v55 = vpop.f32.mrb[160].mxu0 }
 0xe69   :  { %v3151_v11 = vadd.f32 %v4150_v55, %v8032_v5  ;;  %v3145_v1 = vpop.f32.mrb[161].mxu0 }
 0xe6a   :  { %v3146_v7 = vadd.f32 %v8032_v5, %v3145_v1 }
 0xe6b   :  { %3217 = vst [vmem:[%s8185_s22 + $0xb8] sm:$0xff] %v3151_v11 }
 0xe6c   :  { %3216 = vst [vmem:[%s8185_s22 + $0xb0] sm:$0xff] %v3146_v7  ;;  %v4153_v33 = vpop.f32.mrb[162].mxu0 }
 0xe6d   :  { %v3161_v60 = vadd.f32 %v4153_v33, %v8032_v5  ;;  %v3155_v38 = vpop.f32.mrb[163].mxu0 }
 0xe6e   :  { %v3156_v50 = vadd.f32 %v8032_v5, %v3155_v38 }
 0xe6f   :  { %3219 = vst [vmem:[%s8185_s22 + $0xc8] sm:$0xff] %v3161_v60 }
 0xe70   :  { %3218 = vst [vmem:[%s8185_s22 + $0xc0] sm:$0xff] %v3156_v50  ;;  %v4156_v58 = vpop.f32.mrb[164].mxu0 }
 0xe71   :  { %v3171_v29 = vadd.f32 %v4156_v58, %v8032_v5  ;;  %v3165_v27 = vpop.f32.mrb[165].mxu0 }
 0xe72   :  { %v3166_v44 = vadd.f32 %v8032_v5, %v3165_v27 }
 0xe73   :  { %3221 = vst [vmem:[%s8185_s22 + $0xd8] sm:$0xff] %v3171_v29 }
 0xe74   :  { %3220 = vst [vmem:[%s8185_s22 + $0xd0] sm:$0xff] %v3166_v44  ;;  %v4159_v26 = vpop.f32.mrb[166].mxu0 }
 0xe75   :  { %v3181_v37 = vadd.f32 %v4159_v26, %v8032_v5  ;;  %v3175_v24 = vpop.f32.mrb[167].mxu0 }
 0xe76   :  { %v3176_v4 = vadd.f32 %v8032_v5, %v3175_v24 }
 0xe77   :  { %3223 = vst [vmem:[%s8185_s22 + $0xe8] sm:$0xff] %v3181_v37 }
 0xe78   :  { %3222 = vst [vmem:[%s8185_s22 + $0xe0] sm:$0xff] %v3176_v4  ;;  %v4162_v28 = vpop.f32.mrb[168].mxu0 }
 0xe79   :  { %v3191_v22 = vadd.f32 %v4162_v28, %v8032_v5  ;;  %v3185_v43 = vpop.f32.mrb[169].mxu0 }
 0xe7a   :  { %v3186_v2 = vadd.f32 %v8032_v5, %v3185_v43 }
 0xe7b   :  { %3225 = vst [vmem:[%s8185_s22 + $0xf8] sm:$0xff] %v3191_v22 }
 0xe7c   :  { %3224 = vst [vmem:[%s8185_s22 + $0xf0] sm:$0xff] %v3186_v2 }

</bundles_post_ra>
